<compile_context>
chip_gen: v5e
topology: v5e:2x2
jax: 0.10.0
libtpu: 0.0.40
codegen_flags: <defaults>
</compile_context>

<pallas_src>
import functools
import math

import jax
import jax.numpy as jnp
from jax.experimental import pallas as pl
from jax.experimental.pallas import tpu as pltpu

# ----------------------------------------------------------------------------
# Model hyper-parameters (scaled down from the original d_model=512 config so
# the synthetic example stays small: d_model=64, d_inner=128, n_head=4).
# ----------------------------------------------------------------------------
D_MODEL = 64
D_INNER = 128
N_HEAD = 4
DK = D_MODEL // N_HEAD
D_IN = 11          # 9 anchor-point coords + slice position + slice resolution
D_IN_PAD = 16      # zero-padded so the PE projection K-dim is aligned
D_OUT = 9
HEAD_PAD = 128     # lane-dense merged head: cols 0..8 = dtheta, col 9 = IQA
N_LAYERS_1 = 2     # svrnet1 (original: 4)
N_LAYERS_2 = 3     # svrnet2 (original: 8)

VMEM_LIMIT = 64 * 1024 * 1024
RECON_TN_TARGET = 128   # small for the demo; raise to 512-2048 at real HW size


def _const_spec(shape):
    """Full-array block whose index does not change along the 1-D grid."""
    nd = len(shape)
    return pl.BlockSpec(shape, lambda l, _nd=nd: (0,) * _nd)


def _layer_spec(shape):
    """Per-layer block of a (L, d1, d2) stacked weight; layer axis squeezed."""
    return pl.BlockSpec((None,) + tuple(shape[1:]), lambda l: (l, 0, 0))


def _layernorm(x, g, b, eps=1e-5):
    mu = jnp.mean(x, axis=-1, keepdims=True)
    var = jnp.mean((x - mu) ** 2, axis=-1, keepdims=True)
    return (x - mu) * jax.lax.rsqrt(var + eps) * g + b


# ----------------------------------------------------------------------------
# SVR transformer kernel: grid over encoder layers, activation VMEM-resident.
# ----------------------------------------------------------------------------
def _svr_transformer_kernel(*refs, n_layers, n_head, with_vol, emit_attn):
    x_scr = refs[-1]
    n_out = 2 if emit_attn else 1
    out_refs = refs[-1 - n_out:-1]
    head_ref = out_refs[0]
    attn_ref = out_refs[1] if emit_attn else None

    it = iter(refs[:-1 - n_out])
    stacks_ref = next(it)
    pe_ref = next(it)
    if with_vol:
        a_ref = next(it)          # (S, Dvol) pre-normalized sampling weights
        vol_ref = next(it)        # (Dvol, HW) bf16
        w_img_b_ref = next(it)    # (HW, D) bf16
    (w_img_a_ref, b_img_pe_ref, w_pe_ref,
     wqkv_ref, bqkv_ref, wo_ref, bo_ref,
     w1_ref, b1_ref, w2_ref, b2_ref,
     g1_ref, n1_ref, g2_ref, n2_ref,
     w_head_ref, b_head_ref) = tuple(it)

    f32 = jnp.float32
    l = pl.program_id(0)

    # ---- grid step 0: slice / (volume) / PE projections into the resident
    # activation scratch.  bf16 operands are upcast to f32 before the MXU
    # (TODO(synk): feed bf16 directly on real TPU hardware).
    @pl.when(l == 0)
    def _init():
        x0 = jnp.dot(stacks_ref[...].astype(f32), w_img_a_ref[...].astype(f32),
                     preferred_element_type=f32)
        if with_vol:
            vsl = jnp.dot(a_ref[...], vol_ref[...].astype(f32),
                          preferred_element_type=f32)               # (S, HW)
            x0 = x0 + jnp.dot(vsl, w_img_b_ref[...].astype(f32),
                              preferred_element_type=f32)
        x0 = x0 + jnp.dot(pe_ref[...], w_pe_ref[...],
                          preferred_element_type=f32)
        x_scr[...] = x0 + b_img_pe_ref[...]

    x = x_scr[...]
    s_len, d = x.shape
    dk = d // n_head
    scale = 1.0 / float(dk) ** 0.5

    # ---- one encoder layer per grid step (layer weights double-buffered).
    # Merged QKV projection: one (S, D) @ (D, 3D) matmul.
    qkv = jnp.dot(x, wqkv_ref[...], preferred_element_type=f32) + bqkv_ref[...]
    ctx_heads = []
    for h in range(n_head):
        qh = qkv[:, h * dk:(h + 1) * dk]
        kh = qkv[:, d + h * dk:d + (h + 1) * dk]
        vh = qkv[:, 2 * d + h * dk:2 * d + (h + 1) * dk]
        sc = jax.lax.dot_general(qh, kh, (((1,), (1,)), ((), ())),
                                 preferred_element_type=f32) * scale
        sc = sc - jnp.max(sc, axis=-1, keepdims=True)
        p = jnp.exp(sc)
        p = p * pl.reciprocal(jnp.sum(p, axis=-1, keepdims=True), approx=True)
        if emit_attn:
            # Only the final layer's attention map is consumed downstream.
            @pl.when(l == n_layers - 1)
            def _store_attn(p=p, h=h):
                attn_ref[h] = p
        ctx_heads.append(jnp.dot(p, vh, preferred_element_type=f32))
    # Merged output projection: concat(ctx_heads) @ W_o, one (S,D)@(D,D).
    ctx = jnp.concatenate(ctx_heads, axis=-1)
    o = jnp.dot(ctx, wo_ref[...], preferred_element_type=f32) + bo_ref[...]

    h1 = _layernorm(x + o, g1_ref[...], n1_ref[...])
    ff = jnp.maximum(
        jnp.dot(h1, w1_ref[...], preferred_element_type=f32) + b1_ref[...],
        0.0)
    ff = jnp.dot(ff, w2_ref[...], preferred_element_type=f32) + b2_ref[...]
    x_new = _layernorm(h1 + ff, g2_ref[...], n2_ref[...])
    x_scr[...] = x_new

    @pl.when(l == n_layers - 1)
    def _head():
        head_ref[...] = (jnp.dot(x_new, w_head_ref[...],
                                 preferred_element_type=f32)
                         + b_head_ref[...])


def fused_svr_transformer(params, theta, stacks_bf, positions, res_s, *,
                          a=None, vol_bf=None, with_vol, emit_attn, n_layers):
    s_ = theta.shape[0]
    hw = stacks_bf.shape[1]
    pe = jnp.concatenate(
        [theta, positions.astype(jnp.float32),
         jnp.full((s_, 1), res_s, jnp.float32)], axis=1)
    pe = jnp.pad(pe, ((0, 0), (0, D_IN_PAD - D_IN)))

    # NOTE: the PE matmul stays a small separate in-kernel matmul instead of a
    # wrapper-side concat with the slices: pe changes every iteration, so a
    # fused [stacks|pe] operand would force a full copy of `stacks` per
    # iteration.  Biases b_img + b_pe are merged at init instead.
    const_inputs = [stacks_bf, pe]
    if with_vol:
        const_inputs += [a, vol_bf, params["w_img_b"]]
    const_inputs += [params["w_img_a"], params["b_img_pe"], params["w_pe"]]
    layer_inputs = [params[k] for k in
                    ("wqkv", "bqkv", "wo", "bo", "w1", "b1", "w2", "b2",
                     "g1", "n1", "g2", "n2")]
    tail_inputs = [params["w_head"], params["b_head"]]
    inputs = const_inputs + layer_inputs + tail_inputs

    in_specs = ([_const_spec(x.shape) for x in const_inputs]
                + [_layer_spec(x.shape) for x in layer_inputs]
                + [_const_spec(x.shape) for x in tail_inputs])

    out_shape = [jax.ShapeDtypeStruct((s_, HEAD_PAD), jnp.float32)]
    out_specs = [_const_spec((s_, HEAD_PAD))]
    if emit_attn:
        out_shape.append(jax.ShapeDtypeStruct((N_HEAD, s_, s_), jnp.float32))
        out_specs.append(_const_spec((N_HEAD, s_, s_)))

    # Rough cost hint so XLA schedules the unrolled iteration chain sensibly.
    flops = 2 * s_ * hw * D_MODEL + 2 * s_ * D_IN_PAD * D_MODEL
    if with_vol:
        flops += 2 * s_ * a.shape[1] * hw + 2 * s_ * hw * D_MODEL
    flops += n_layers * (2 * s_ * D_MODEL * 3 * D_MODEL
                         + 4 * N_HEAD * s_ * s_ * DK
                         + 2 * s_ * D_MODEL * D_MODEL
                         + 4 * s_ * D_MODEL * D_INNER)
    flops += 2 * s_ * D_MODEL * HEAD_PAD
    bytes_accessed = (sum(int(x.size) * x.dtype.itemsize for x in inputs)
                      + sum(math.prod(o.shape) * o.dtype.itemsize
                            for o in out_shape))
    transcendentals = n_layers * N_HEAD * s_ * s_

    outs = pl.pallas_call(
        functools.partial(_svr_transformer_kernel, n_layers=n_layers,
                          n_head=N_HEAD, with_vol=with_vol,
                          emit_attn=emit_attn),
        grid=(n_layers,),
        in_specs=in_specs,
        out_specs=tuple(out_specs),
        out_shape=tuple(out_shape),
        scratch_shapes=[pltpu.VMEM((s_, D_MODEL), jnp.float32)],
        compiler_params=pltpu.CompilerParams(
            dimension_semantics=("arbitrary",),
            vmem_limit_bytes=VMEM_LIMIT),
        cost_estimate=pl.CostEstimate(flops=flops,
                                      transcendentals=transcendentals,
                                      bytes_accessed=bytes_accessed),
    )(*inputs)

    head = outs[0]
    attn = outs[1] if emit_attn else None
    theta_new = theta + head[:, :D_OUT]
    score = jax.nn.sigmoid(head[:, D_OUT])
    score = score / (jnp.mean(score) + 1e-8)
    return theta_new, score, attn


# ----------------------------------------------------------------------------
# PSF back-projection + SRR data-consistency kernel, tiled over the HW axis
# ("parallel" grid axis; every column block is independent).
# ----------------------------------------------------------------------------
def _recon_srr_kernel(b_ref, a_ref, y_ref, iqa_ref, vol_ref, *, n_srr, alpha):
    f32 = jnp.float32
    y = y_ref[...].astype(f32)                                  # (S, TN)
    b = b_ref[...]                                              # (Dvol, S)
    v = jnp.dot(b, y, preferred_element_type=f32)               # (Dvol, TN)
    if n_srr > 0:
        a = a_ref[...]                                          # (S, Dvol)
        iqa = iqa_ref[...]                                      # (S, 1)
        for _ in range(n_srr):
            sim = jnp.dot(a, v, preferred_element_type=f32)     # (S, TN)
            err = iqa * (y - sim)
            v = v + alpha * jnp.dot(b, err, preferred_element_type=f32)
    vol_ref[...] = v


def _col_tile(hw, target=RECON_TN_TARGET):
    if hw % 128 != 0:
        return hw
    tn = min(target, hw)
    tn -= tn % 128
    tn = max(tn, 128)
    while hw % tn != 0:
        tn -= 128
    return tn


def fused_recon_srr(b, a, stacks_bf, iqa_col, *, n_srr, alpha=0.5):
    d_vol = b.shape[0]
    s_, hw = stacks_bf.shape
    tn = _col_tile(hw)
    grid = (hw // tn,)

    flops = 2 * d_vol * s_ * hw * (1 + 2 * n_srr)
    bytes_accessed = (int(b.size) + int(a.size) + int(iqa_col.size)
                      + d_vol * hw) * 4 + int(stacks_bf.size) * 2

    return pl.pallas_call(
        functools.partial(_recon_srr_kernel, n_srr=n_srr, alpha=alpha),
        grid=grid,
        in_specs=[
            pl.BlockSpec(b.shape, lambda j: (0, 0)),
            pl.BlockSpec(a.shape, lambda j: (0, 0)),
            pl.BlockSpec((s_, tn), lambda j: (0, j)),
            pl.BlockSpec(iqa_col.shape, lambda j: (0, 0)),
        ],
        out_specs=pl.BlockSpec((d_vol, tn), lambda j: (0, j)),
        out_shape=jax.ShapeDtypeStruct((d_vol, hw), jnp.float32),
        compiler_params=pltpu.CompilerParams(
            dimension_semantics=("parallel",),
            vmem_limit_bytes=VMEM_LIMIT),
        cost_estimate=pl.CostEstimate(flops=flops, transcendentals=0,
                                      bytes_accessed=bytes_accessed),
    )(b, a, stacks_bf, iqa_col)


# ----------------------------------------------------------------------------
# Rigid transform utilities (plain JAX glue — tiny per-slice math)
# ----------------------------------------------------------------------------
class RigidTransform:
    def __init__(self, mat):
        self._mat = mat  # (N, 3, 4)

    def matrix(self):
        return self._mat


def axisangle_to_matrix(ax):
    r, t = ax[:, :3], ax[:, 3:]
    angle = jnp.linalg.norm(r, axis=-1, keepdims=True)
    axis = r / (angle + 1e-8)
    x, y, z = axis[:, 0], axis[:, 1], axis[:, 2]
    c = jnp.cos(angle[:, 0])
    s = jnp.sin(angle[:, 0])
    C = 1.0 - c
    R = jnp.stack([
        jnp.stack([c + x * x * C, x * y * C - z * s, x * z * C + y * s], -1),
        jnp.stack([y * x * C + z * s, c + y * y * C, y * z * C - x * s], -1),
        jnp.stack([z * x * C - y * s, z * y * C + x * s, c + z * z * C], -1),
    ], axis=1)
    return jnp.concatenate([R, t[:, :, None]], axis=-1)


def _corner_points(sx, sy, rs):
    ax = (sx - 1) / 2.0 * rs
    ay = (sy - 1) / 2.0 * rs
    return jnp.array([[-ax, -ay, 0.0], [ax, -ay, 0.0], [-ax, ay, 0.0]],
                     dtype=jnp.float32)


def mat2point(mat, sx, sy, rs):
    q = _corner_points(sx, sy, rs)                                   # (3, 3)
    R, t = mat[:, :, :3], mat[:, :, 3]
    p = jnp.einsum("nij,kj->nki", R, q) + t[:, None, :]              # (N, 3, 3)
    return p.reshape(-1, 9)


def point2mat(p, sx, sy, rs):
    p = p.reshape(-1, 3, 3)
    p1, p2, p3 = p[:, 0], p[:, 1], p[:, 2]
    vx = p2 - p1
    vy0 = p3 - p1
    nx = vx / (jnp.linalg.norm(vx, axis=-1, keepdims=True) + 1e-8)
    nz = jnp.cross(vx, vy0)
    nz = nz / (jnp.linalg.norm(nz, axis=-1, keepdims=True) + 1e-8)
    ny = jnp.cross(nz, nx)
    R = jnp.stack([nx, ny, nz], axis=-1)                             # columns
    q1 = _corner_points(sx, sy, rs)[0]
    t = p1 - jnp.einsum("nij,j->ni", R, q1)
    return jnp.concatenate([R, t[:, :, None]], axis=-1)


def mat_update_resolution(mat, res_from, res_to):
    return jnp.concatenate(
        [mat[:, :, :3], mat[:, :, 3:] * (res_from / res_to)], axis=-1)


def splat_weights(mat_vox, d_vol, s_thick, res_r):
    # Through-plane Gaussian splat weights, (Dvol, S).
    z_s = mat_vox[:, 2, 3] + (d_vol - 1) / 2.0                       # (S,)
    d_idx = jnp.arange(d_vol, dtype=jnp.float32)
    sigma = max(s_thick / res_r / 2.355, 0.5)                        # static
    return jnp.exp(-0.5 * ((d_idx[:, None] - z_s[None, :]) / sigma) ** 2)


# ----------------------------------------------------------------------------
# Parameter init (per-layer weights stacked on a leading layer axis)
# ----------------------------------------------------------------------------
def _init_linear(key, fan_in, fan_out, scale=0.02):
    return jax.random.normal(key, (fan_in, fan_out), jnp.float32) * scale


def init_svrnet(key, n_layers, n_channels, H, W):
    hw = H * W
    ks = jax.random.split(key, 6 * n_layers + 6)

    def layer(i):
        kk = ks[6 + 6 * i: 6 + 6 * (i + 1)]
        wq = _init_linear(kk[0], D_MODEL, D_MODEL)
        wk = _init_linear(kk[1], D_MODEL, D_MODEL)
        wv = _init_linear(kk[2], D_MODEL, D_MODEL)
        z = lambda n: jnp.zeros((1, n), jnp.float32)
        return {
            "wqkv": jnp.concatenate([wq, wk, wv], axis=1),   # (D, 3D)
            "bqkv": z(3 * D_MODEL),
            "wo": _init_linear(kk[3], D_MODEL, D_MODEL), "bo": z(D_MODEL),
            "w1": _init_linear(kk[4], D_MODEL, D_INNER), "b1": z(D_INNER),
            "w2": _init_linear(kk[5], D_INNER, D_MODEL), "b2": z(D_MODEL),
            "g1": jnp.ones((1, D_MODEL), jnp.float32), "n1": z(D_MODEL),
            "g2": jnp.ones((1, D_MODEL), jnp.float32), "n2": z(D_MODEL),
        }

    layers = [layer(i) for i in range(n_layers)]
    stk = lambda name: jnp.stack([lp[name] for lp in layers], 0)

    # Merged lane-dense head: cols 0..8 dtheta, col 9 IQA logit, rest zero.
    w_out = _init_linear(ks[2], D_MODEL, D_OUT, scale=0.01)
    w_iqa = _init_linear(ks[3], D_MODEL, 1)
    w_head = jnp.zeros((D_MODEL, HEAD_PAD), jnp.float32)
    w_head = w_head.at[:, :D_OUT].set(w_out)
    w_head = w_head.at[:, D_OUT:D_OUT + 1].set(w_iqa)

    params = {
        "w_img_a": _init_linear(ks[0], hw, D_MODEL).astype(jnp.bfloat16),
        "w_pe": _init_linear(ks[1], D_IN_PAD, D_MODEL),
        "b_img_pe": jnp.zeros((1, D_MODEL), jnp.float32),   # b_img + b_pe merged
        "w_head": w_head,
        "b_head": jnp.zeros((1, HEAD_PAD), jnp.float32),
    }
    for name in ("wqkv", "bqkv", "wo", "bo", "w1", "b1", "w2", "b2",
                 "g1", "n1", "g2", "n2"):
        params[name] = stk(name)
    if n_channels == 2:
        params["w_img_b"] = _init_linear(ks[4], hw, D_MODEL).astype(jnp.bfloat16)
    return params


# ----------------------------------------------------------------------------
# Whole multi-iteration forward under one jit
# ----------------------------------------------------------------------------
@functools.partial(jax.jit, static_argnums=(5, 6, 7, 8, 9, 10))
def _svort_forward(p1, p2, transforms_ax, stacks, positions,
                   gp, n_iter, use_vol, use_iqa, use_pe, srr_n_iter):
    res_s, res_r, s_thick, vol_shape = gp
    s_ = stacks.shape[0]
    sx, sy = stacks.shape[-1], stacks.shape[-2]

    if not use_pe:
        transforms_ax = transforms_ax * 0
        positions = positions * 0 + s_thick

    theta = mat2point(axisangle_to_matrix(transforms_ax), sx, sy, res_s)
    stacks_bf = stacks.reshape(s_, -1).astype(jnp.bfloat16)

    mats, volumes, thetas = [], [], []
    vol_bf = None
    a_prev = None
    attn = None
    iqa_score = None

    for i in range(n_iter):
        params = p2 if i else p1
        n_layers = N_LAYERS_2 if i else N_LAYERS_1
        with_vol = bool(use_vol and i > 0)
        emit_attn = (i == n_iter - 1)   # only the final map is consumed

        theta, iqa_score, attn_i = fused_svr_transformer(
            params, theta, stacks_bf, positions, res_s,
            a=a_prev if with_vol else None,
            vol_bf=vol_bf if with_vol else None,
            with_vol=with_vol, emit_attn=emit_attn, n_layers=n_layers)
        if emit_attn:
            attn = attn_i
        thetas.append(theta)

        mat = point2mat(theta, sx, sy, res_s)
        mats.append(mat)
        # TODO(synk): 'transforms_gt' top-k error-correction branch not ported.

        mat_vox = mat_update_resolution(mat, 1.0, res_r)
        # Splat weights + exact (non-approx) normalizations computed ONCE per
        # iteration; shared by the recon kernel and the next iteration's
        # volume sampling.
        w = splat_weights(mat_vox, vol_shape[0], s_thick, res_r)   # (Dvol, S)
        b = w / jnp.maximum(jnp.sum(w, axis=1, keepdims=True), 1e-6)
        wt = w.T                                                    # (S, Dvol)
        a = wt / jnp.maximum(jnp.sum(wt, axis=1, keepdims=True), 1e-6)

        iqa_col = iqa_score.reshape(s_, 1)
        vol_flat = fused_recon_srr(b, a, stacks_bf, iqa_col,
                                   n_srr=srr_n_iter if use_iqa else 0)
        volumes.append(vol_flat.reshape(vol_shape))
        vol_bf = vol_flat.astype(jnp.bfloat16)
        a_prev = a

    return mats, volumes, thetas, iqa_score, attn


class SVoRTv2:
    def __init__(self, key, n_iter=4, iqa=True, vol=True, pe=True, H=16, W=16):
        self.vol = vol
        self.pe = pe
        self.iqa = iqa and vol
        self.n_iter = n_iter
        self.srr_n_iter = 2
        self.attn = None
        self.iqa_score = None
        k1, k2 = jax.random.split(key)
        self.svrnet1 = init_svrnet(k1, N_LAYERS_1, 1, H, W)
        self.svrnet2 = init_svrnet(k2, N_LAYERS_2, 2, H, W)

    def forward(self, data, n_iter=None):
        if n_iter is None:
            n_iter = self.n_iter
        # TODO(synk): torch grad toggling / random iter_grad is a training
        # detail; it is a no-op in this inference port.
        gp = (float(data["resolution_slice"]), float(data["resolution_recon"]),
              float(data["slice_thickness"]), tuple(data["volume_shape"]))
        mats, volumes, thetas, iqa_score, attn = _svort_forward(
            self.svrnet1, self.svrnet2, data["transforms"], data["stacks"],
            data["positions"], gp, int(n_iter), bool(self.vol),
            bool(self.iqa), bool(self.pe), int(self.srr_n_iter))
        self.attn = attn
        self.iqa_score = iqa_score
        trans = [RigidTransform(m) for m in mats]
        return trans, volumes, thetas


# ----------------------------------------------------------------------------
# Example run
# ----------------------------------------------------------------------------
if __name__ == "__main__":
    key = jax.random.PRNGKey(0)
    k_model, k_rot, k_xy, k_stack = jax.random.split(key, 4)

    S, C, H, W, DVOL = 8, 1, 16, 16, 16

    rot = jax.random.normal(k_rot, (S, 3), jnp.float32) * 0.05
    txy = jax.random.normal(k_xy, (S, 2), jnp.float32) * 0.5
    tz = jnp.linspace(-6.0, 6.0, S, dtype=jnp.float32).reshape(S, 1)
    transforms = jnp.concatenate([rot, txy, tz], axis=1)              # (S, 6)

    stacks = jax.random.uniform(k_stack, (S, C, H, W), jnp.float32)   # NCHW
    positions = jnp.arange(S, dtype=jnp.float32).reshape(S, 1) * 3.0

    data = {
        "psf_rec": jnp.ones((3, 3, 3), jnp.float32) / 27.0,  # unused (Gaussian splat)
        "slice_shape": (H, W),
        "resolution_slice": 1.0,
        "resolution_recon": 1.0,
        "slice_thickness": 3.0,
        "volume_shape": (DVOL, H, W),
        "transforms": transforms,
        "stacks": stacks,
        "positions": positions,
    }

    model = SVoRTv2(k_model, n_iter=4)
    trans, volumes, thetas = model.forward(data)

    jax.block_until_ready((volumes[-1], thetas[-1], model.attn))
    assert volumes[-1].shape == (DVOL, H, W)
    assert thetas[-1].shape == (S, 9)
    assert model.attn is not None and model.attn.shape == (N_HEAD, S, S)
    assert len(trans) == 4 and len(volumes) == 4 and len(thetas) == 4
    assert bool(jnp.all(jnp.isfinite(volumes[-1])))
    assert bool(jnp.all(jnp.isfinite(thetas[-1])))
    assert bool(jnp.all(jnp.isfinite(model.attn)))
    print("KERNEL_OK")
</pallas_src>

<mosaic_0001>
module attributes {stable_mosaic.version = 11 : i64} {
  func.func @_svr_transformer_kernel(%arg0: i32, %arg1: memref<8x256xbf16, #tpu.memory_space<vmem>>, %arg2: memref<8x16xf32, #tpu.memory_space<vmem>>, %arg3: memref<256x64xbf16, #tpu.memory_space<vmem>>, %arg4: memref<1x64xf32, #tpu.memory_space<vmem>>, %arg5: memref<16x64xf32, #tpu.memory_space<vmem>>, %arg6: memref<1x64x192xf32, #tpu.memory_space<vmem>>, %arg7: memref<1x1x192xf32, #tpu.memory_space<vmem>>, %arg8: memref<1x64x64xf32, #tpu.memory_space<vmem>>, %arg9: memref<1x1x64xf32, #tpu.memory_space<vmem>>, %arg10: memref<1x64x128xf32, #tpu.memory_space<vmem>>, %arg11: memref<1x1x128xf32, #tpu.memory_space<vmem>>, %arg12: memref<1x128x64xf32, #tpu.memory_space<vmem>>, %arg13: memref<1x1x64xf32, #tpu.memory_space<vmem>>, %arg14: memref<1x1x64xf32, #tpu.memory_space<vmem>>, %arg15: memref<1x1x64xf32, #tpu.memory_space<vmem>>, %arg16: memref<1x1x64xf32, #tpu.memory_space<vmem>>, %arg17: memref<1x1x64xf32, #tpu.memory_space<vmem>>, %arg18: memref<64x128xf32, #tpu.memory_space<vmem>>, %arg19: memref<1x128xf32, #tpu.memory_space<vmem>>, %arg20: memref<8x128xf32, #tpu.memory_space<vmem>>, %arg21: memref<8x64xf32, #tpu.memory_space<vmem>>) attributes {dimension_semantics = [#tpu.dimension_semantics<arbitrary>], iteration_bounds = array<i64: 2>, scalar_prefetch = 0 : i64, scratch_operands = 1 : i64, tpu.core_type = #tpu.core_type<tc>, window_params = [{pipeline_mode = #tpu.pipeline_mode<synchronous>, transform_indices = @transform_0, window_bounds = array<i64: 8, 256>}, {pipeline_mode = #tpu.pipeline_mode<synchronous>, transform_indices = @transform_1, window_bounds = array<i64: 8, 16>}, {pipeline_mode = #tpu.pipeline_mode<synchronous>, transform_indices = @transform_2, window_bounds = array<i64: 256, 64>}, {pipeline_mode = #tpu.pipeline_mode<synchronous>, transform_indices = @transform_3, window_bounds = array<i64: 1, 64>}, {pipeline_mode = #tpu.pipeline_mode<synchronous>, transform_indices = @transform_4, window_bounds = array<i64: 16, 64>}, {transform_indices = @transform_5, window_bounds = array<i64: 1, 64, 192>}, {transform_indices = @transform_6, window_bounds = array<i64: 1, 1, 192>}, {transform_indices = @transform_7, window_bounds = array<i64: 1, 64, 64>}, {transform_indices = @transform_8, window_bounds = array<i64: 1, 1, 64>}, {transform_indices = @transform_9, window_bounds = array<i64: 1, 64, 128>}, {transform_indices = @transform_10, window_bounds = array<i64: 1, 1, 128>}, {transform_indices = @transform_11, window_bounds = array<i64: 1, 128, 64>}, {transform_indices = @transform_12, window_bounds = array<i64: 1, 1, 64>}, {transform_indices = @transform_13, window_bounds = array<i64: 1, 1, 64>}, {transform_indices = @transform_14, window_bounds = array<i64: 1, 1, 64>}, {transform_indices = @transform_15, window_bounds = array<i64: 1, 1, 64>}, {transform_indices = @transform_16, window_bounds = array<i64: 1, 1, 64>}, {pipeline_mode = #tpu.pipeline_mode<synchronous>, transform_indices = @transform_17, window_bounds = array<i64: 64, 128>}, {pipeline_mode = #tpu.pipeline_mode<synchronous>, transform_indices = @transform_18, window_bounds = array<i64: 1, 128>}, {pipeline_mode = #tpu.pipeline_mode<synchronous>, transform_indices = @transform_19, window_bounds = array<i64: 8, 128>}]} {
    %c0_i32 = arith.constant 0 : i32
    %0 = arith.cmpi eq, %arg0, %c0_i32 : i32
    %1 = arith.extui %0 : i1 to i32
    %c0_i32_0 = arith.constant 0 : i32
    %2 = arith.cmpi ne, %1, %c0_i32_0 : i32
    scf.if %2 {
      %c0_75 = arith.constant 0 : index
      %c0_76 = arith.constant 0 : index
      %161 = vector.load %arg1[%c0_75, %c0_76] : memref<8x256xbf16, #tpu.memory_space<vmem>>, vector<8x256xbf16>
      %162 = arith.extf %161 : vector<8x256xbf16> to vector<8x256xf32>
      %c0_77 = arith.constant 0 : index
      %c0_78 = arith.constant 0 : index
      %163 = vector.load %arg3[%c0_77, %c0_78] : memref<256x64xbf16, #tpu.memory_space<vmem>>, vector<256x64xbf16>
      %164 = arith.extf %163 : vector<256x64xbf16> to vector<256x64xf32>
      %cst_79 = arith.constant dense<0.000000e+00> : vector<8x64xf32>
      %165 = tpu.matmul %162, %164, %cst_79 {dimension_numbers = #tpu.dot_dimension_numbers<[1], [0], [0], [1], [0, 0, 1, 1], [], []>} : vector<8x256xf32>, vector<256x64xf32>, vector<8x64xf32> -> vector<8x64xf32>
      %c0_80 = arith.constant 0 : index
      %c0_81 = arith.constant 0 : index
      %166 = vector.load %arg2[%c0_80, %c0_81] : memref<8x16xf32, #tpu.memory_space<vmem>>, vector<8x16xf32>
      %c0_82 = arith.constant 0 : index
      %c0_83 = arith.constant 0 : index
      %167 = vector.load %arg5[%c0_82, %c0_83] : memref<16x64xf32, #tpu.memory_space<vmem>>, vector<16x64xf32>
      %cst_84 = arith.constant dense<0.000000e+00> : vector<8x64xf32>
      %168 = tpu.matmul %166, %167, %cst_84 {dimension_numbers = #tpu.dot_dimension_numbers<[1], [0], [0], [1], [0, 0, 1, 1], [], []>} : vector<8x16xf32>, vector<16x64xf32>, vector<8x64xf32> -> vector<8x64xf32>
      %169 = arith.addf %165, %168 : vector<8x64xf32>
      %c0_85 = arith.constant 0 : index
      %c0_86 = arith.constant 0 : index
      %170 = vector.load %arg4[%c0_85, %c0_86] : memref<1x64xf32, #tpu.memory_space<vmem>>, vector<1x64xf32>
      %171 = vector.broadcast %170 : vector<1x64xf32> to vector<8x64xf32>
      %172 = arith.addf %169, %171 : vector<8x64xf32>
      %c0_87 = arith.constant 0 : index
      %c0_88 = arith.constant 0 : index
      %173 = vector.load %arg21[%c0_87, %c0_88] : memref<8x64xf32, #tpu.memory_space<vmem>>, vector<8x64xf32>
      tpu.vector_store %arg21[%c0_87, %c0_88], %172 {strides = array<i32>} : memref<8x64xf32, #tpu.memory_space<vmem>>, vector<8x64xf32>,
    } else {
    }
    %c0 = arith.constant 0 : index
    %c0_1 = arith.constant 0 : index
    %3 = vector.load %arg21[%c0, %c0_1] : memref<8x64xf32, #tpu.memory_space<vmem>>, vector<8x64xf32>
    %c0_2 = arith.constant 0 : index
    %c0_3 = arith.constant 0 : index
    %c0_4 = arith.constant 0 : index
    %4 = vector.load %arg6[%c0_2, %c0_3, %c0_4] : memref<1x64x192xf32, #tpu.memory_space<vmem>>, vector<1x64x192xf32>
    %5 = vector.shape_cast %4 : vector<1x64x192xf32> to vector<64x192xf32>
    %cst = arith.constant dense<0.000000e+00> : vector<8x192xf32>
    %6 = tpu.matmul %3, %5, %cst {dimension_numbers = #tpu.dot_dimension_numbers<[1], [0], [0], [1], [0, 0, 1, 1], [], []>} : vector<8x64xf32>, vector<64x192xf32>, vector<8x192xf32> -> vector<8x192xf32>
    %c0_5 = arith.constant 0 : index
    %c0_6 = arith.constant 0 : index
    %c0_7 = arith.constant 0 : index
    %7 = vector.load %arg7[%c0_5, %c0_6, %c0_7] : memref<1x1x192xf32, #tpu.memory_space<vmem>>, vector<1x1x192xf32>
    %8 = vector.shape_cast %7 : vector<1x1x192xf32> to vector<1x192xf32>
    %9 = vector.broadcast %8 : vector<1x192xf32> to vector<8x192xf32>
    %10 = arith.addf %6, %9 : vector<8x192xf32>
    %11 = vector.extract_strided_slice %10 {offsets = [0, 0], sizes = [8, 16], strides = [1, 1]} : vector<8x192xf32> to vector<8x16xf32>
    %12 = vector.extract_strided_slice %10 {offsets = [0, 64], sizes = [8, 16], strides = [1, 1]} : vector<8x192xf32> to vector<8x16xf32>
    %13 = vector.extract_strided_slice %10 {offsets = [0, 128], sizes = [8, 16], strides = [1, 1]} : vector<8x192xf32> to vector<8x16xf32>
    %cst_8 = arith.constant dense<0.000000e+00> : vector<8x8xf32>
    %14 = tpu.matmul %11, %12, %cst_8 {dimension_numbers = #tpu.dot_dimension_numbers<[1], [1], [0], [0], [0, 0, 1, 0], [], []>} : vector<8x16xf32>, vector<8x16xf32>, vector<8x8xf32> -> vector<8x8xf32>
    %cst_9 = arith.constant 2.500000e-01 : f32
    %15 = vector.broadcast %cst_9 : f32 to vector<8x8xf32>
    %16 = arith.mulf %14, %15 : vector<8x8xf32>
    %cst_10 = arith.constant dense<0xFF800000> : vector<8xf32>
    %17 = vector.multi_reduction <maximumf>, %16, %cst_10 [1] : vector<8x8xf32> to vector<8xf32>
    %18 = vector.shape_cast %17 : vector<8xf32> to vector<8x1xf32>
    %19 = vector.broadcast %18 : vector<8x1xf32> to vector<8x8xf32>
    %20 = arith.subf %16, %19 : vector<8x8xf32>
    %21 = math.exp %20 : vector<8x8xf32>
    %cst_11 = arith.constant dense<0.000000e+00> : vector<8xf32>
    %22 = vector.multi_reduction <add>, %21, %cst_11 [1] : vector<8x8xf32> to vector<8xf32>
    %23 = vector.shape_cast %22 : vector<8xf32> to vector<8x1xf32>
    %24 = tpu.reciprocal %23 {approx = true} : vector<8x1xf32> -> vector<8x1xf32>
    %25 = vector.broadcast %24 : vector<8x1xf32> to vector<8x8xf32>
    %26 = arith.mulf %21, %25 : vector<8x8xf32>
    %cst_12 = arith.constant dense<0.000000e+00> : vector<8x16xf32>
    %27 = tpu.matmul %26, %13, %cst_12 {dimension_numbers = #tpu.dot_dimension_numbers<[1], [0], [0], [1], [0, 0, 1, 1], [], []>} : vector<8x8xf32>, vector<8x16xf32>, vector<8x16xf32> -> vector<8x16xf32>
    %28 = vector.extract_strided_slice %10 {offsets = [0, 16], sizes = [8, 16], strides = [1, 1]} : vector<8x192xf32> to vector<8x16xf32>
    %29 = vector.extract_strided_slice %10 {offsets = [0, 80], sizes = [8, 16], strides = [1, 1]} : vector<8x192xf32> to vector<8x16xf32>
    %30 = vector.extract_strided_slice %10 {offsets = [0, 144], sizes = [8, 16], strides = [1, 1]} : vector<8x192xf32> to vector<8x16xf32>
    %cst_13 = arith.constant dense<0.000000e+00> : vector<8x8xf32>
    %31 = tpu.matmul %28, %29, %cst_13 {dimension_numbers = #tpu.dot_dimension_numbers<[1], [1], [0], [0], [0, 0, 1, 0], [], []>} : vector<8x16xf32>, vector<8x16xf32>, vector<8x8xf32> -> vector<8x8xf32>
    %cst_14 = arith.constant 2.500000e-01 : f32
    %32 = vector.broadcast %cst_14 : f32 to vector<8x8xf32>
    %33 = arith.mulf %31, %32 : vector<8x8xf32>
    %cst_15 = arith.constant dense<0xFF800000> : vector<8xf32>
    %34 = vector.multi_reduction <maximumf>, %33, %cst_15 [1] : vector<8x8xf32> to vector<8xf32>
    %35 = vector.shape_cast %34 : vector<8xf32> to vector<8x1xf32>
    %36 = vector.broadcast %35 : vector<8x1xf32> to vector<8x8xf32>
    %37 = arith.subf %33, %36 : vector<8x8xf32>
    %38 = math.exp %37 : vector<8x8xf32>
    %cst_16 = arith.constant dense<0.000000e+00> : vector<8xf32>
    %39 = vector.multi_reduction <add>, %38, %cst_16 [1] : vector<8x8xf32> to vector<8xf32>
    %40 = vector.shape_cast %39 : vector<8xf32> to vector<8x1xf32>
    %41 = tpu.reciprocal %40 {approx = true} : vector<8x1xf32> -> vector<8x1xf32>
    %42 = vector.broadcast %41 : vector<8x1xf32> to vector<8x8xf32>
    %43 = arith.mulf %38, %42 : vector<8x8xf32>
    %cst_17 = arith.constant dense<0.000000e+00> : vector<8x16xf32>
    %44 = tpu.matmul %43, %30, %cst_17 {dimension_numbers = #tpu.dot_dimension_numbers<[1], [0], [0], [1], [0, 0, 1, 1], [], []>} : vector<8x8xf32>, vector<8x16xf32>, vector<8x16xf32> -> vector<8x16xf32>
    %45 = vector.extract_strided_slice %10 {offsets = [0, 32], sizes = [8, 16], strides = [1, 1]} : vector<8x192xf32> to vector<8x16xf32>
    %46 = vector.extract_strided_slice %10 {offsets = [0, 96], sizes = [8, 16], strides = [1, 1]} : vector<8x192xf32> to vector<8x16xf32>
    %47 = vector.extract_strided_slice %10 {offsets = [0, 160], sizes = [8, 16], strides = [1, 1]} : vector<8x192xf32> to vector<8x16xf32>
    %cst_18 = arith.constant dense<0.000000e+00> : vector<8x8xf32>
    %48 = tpu.matmul %45, %46, %cst_18 {dimension_numbers = #tpu.dot_dimension_numbers<[1], [1], [0], [0], [0, 0, 1, 0], [], []>} : vector<8x16xf32>, vector<8x16xf32>, vector<8x8xf32> -> vector<8x8xf32>
    %cst_19 = arith.constant 2.500000e-01 : f32
    %49 = vector.broadcast %cst_19 : f32 to vector<8x8xf32>
    %50 = arith.mulf %48, %49 : vector<8x8xf32>
    %cst_20 = arith.constant dense<0xFF800000> : vector<8xf32>
    %51 = vector.multi_reduction <maximumf>, %50, %cst_20 [1] : vector<8x8xf32> to vector<8xf32>
    %52 = vector.shape_cast %51 : vector<8xf32> to vector<8x1xf32>
    %53 = vector.broadcast %52 : vector<8x1xf32> to vector<8x8xf32>
    %54 = arith.subf %50, %53 : vector<8x8xf32>
    %55 = math.exp %54 : vector<8x8xf32>
    %cst_21 = arith.constant dense<0.000000e+00> : vector<8xf32>
    %56 = vector.multi_reduction <add>, %55, %cst_21 [1] : vector<8x8xf32> to vector<8xf32>
    %57 = vector.shape_cast %56 : vector<8xf32> to vector<8x1xf32>
    %58 = tpu.reciprocal %57 {approx = true} : vector<8x1xf32> -> vector<8x1xf32>
    %59 = vector.broadcast %58 : vector<8x1xf32> to vector<8x8xf32>
    %60 = arith.mulf %55, %59 : vector<8x8xf32>
    %cst_22 = arith.constant dense<0.000000e+00> : vector<8x16xf32>
    %61 = tpu.matmul %60, %47, %cst_22 {dimension_numbers = #tpu.dot_dimension_numbers<[1], [0], [0], [1], [0, 0, 1, 1], [], []>} : vector<8x8xf32>, vector<8x16xf32>, vector<8x16xf32> -> vector<8x16xf32>
    %62 = vector.extract_strided_slice %10 {offsets = [0, 48], sizes = [8, 16], strides = [1, 1]} : vector<8x192xf32> to vector<8x16xf32>
    %63 = vector.extract_strided_slice %10 {offsets = [0, 112], sizes = [8, 16], strides = [1, 1]} : vector<8x192xf32> to vector<8x16xf32>
    %64 = vector.extract_strided_slice %10 {offsets = [0, 176], sizes = [8, 16], strides = [1, 1]} : vector<8x192xf32> to vector<8x16xf32>
    %cst_23 = arith.constant dense<0.000000e+00> : vector<8x8xf32>
    %65 = tpu.matmul %62, %63, %cst_23 {dimension_numbers = #tpu.dot_dimension_numbers<[1], [1], [0], [0], [0, 0, 1, 0], [], []>} : vector<8x16xf32>, vector<8x16xf32>, vector<8x8xf32> -> vector<8x8xf32>
    %cst_24 = arith.constant 2.500000e-01 : f32
    %66 = vector.broadcast %cst_24 : f32 to vector<8x8xf32>
    %67 = arith.mulf %65, %66 : vector<8x8xf32>
    %cst_25 = arith.constant dense<0xFF800000> : vector<8xf32>
    %68 = vector.multi_reduction <maximumf>, %67, %cst_25 [1] : vector<8x8xf32> to vector<8xf32>
    %69 = vector.shape_cast %68 : vector<8xf32> to vector<8x1xf32>
    %70 = vector.broadcast %69 : vector<8x1xf32> to vector<8x8xf32>
    %71 = arith.subf %67, %70 : vector<8x8xf32>
    %72 = math.exp %71 : vector<8x8xf32>
    %cst_26 = arith.constant dense<0.000000e+00> : vector<8xf32>
    %73 = vector.multi_reduction <add>, %72, %cst_26 [1] : vector<8x8xf32> to vector<8xf32>
    %74 = vector.shape_cast %73 : vector<8xf32> to vector<8x1xf32>
    %75 = tpu.reciprocal %74 {approx = true} : vector<8x1xf32> -> vector<8x1xf32>
    %76 = vector.broadcast %75 : vector<8x1xf32> to vector<8x8xf32>
    %77 = arith.mulf %72, %76 : vector<8x8xf32>
    %cst_27 = arith.constant dense<0.000000e+00> : vector<8x16xf32>
    %78 = tpu.matmul %77, %64, %cst_27 {dimension_numbers = #tpu.dot_dimension_numbers<[1], [0], [0], [1], [0, 0, 1, 1], [], []>} : vector<8x8xf32>, vector<8x16xf32>, vector<8x16xf32> -> vector<8x16xf32>
    %79 = tpu.concatenate %27, %44, %61, %78 in 1 : vector<8x16xf32>, vector<8x16xf32>, vector<8x16xf32>, vector<8x16xf32> -> vector<8x64xf32>
    %c0_28 = arith.constant 0 : index
    %c0_29 = arith.constant 0 : index
    %c0_30 = arith.constant 0 : index
    %80 = vector.load %arg8[%c0_28, %c0_29, %c0_30] : memref<1x64x64xf32, #tpu.memory_space<vmem>>, vector<1x64x64xf32>
    %81 = vector.shape_cast %80 : vector<1x64x64xf32> to vector<64x64xf32>
    %cst_31 = arith.constant dense<0.000000e+00> : vector<8x64xf32>
    %82 = tpu.matmul %79, %81, %cst_31 {dimension_numbers = #tpu.dot_dimension_numbers<[1], [0], [0], [1], [0, 0, 1, 1], [], []>} : vector<8x64xf32>, vector<64x64xf32>, vector<8x64xf32> -> vector<8x64xf32>
    %c0_32 = arith.constant 0 : index
    %c0_33 = arith.constant 0 : index
    %c0_34 = arith.constant 0 : index
    %83 = vector.load %arg9[%c0_32, %c0_33, %c0_34] : memref<1x1x64xf32, #tpu.memory_space<vmem>>, vector<1x1x64xf32>
    %84 = vector.shape_cast %83 : vector<1x1x64xf32> to vector<1x64xf32>
    %85 = vector.broadcast %84 : vector<1x64xf32> to vector<8x64xf32>
    %86 = arith.addf %82, %85 : vector<8x64xf32>
    %87 = arith.addf %3, %86 : vector<8x64xf32>
    %c0_35 = arith.constant 0 : index
    %c0_36 = arith.constant 0 : index
    %c0_37 = arith.constant 0 : index
    %88 = vector.load %arg14[%c0_35, %c0_36, %c0_37] : memref<1x1x64xf32, #tpu.memory_space<vmem>>, vector<1x1x64xf32>
    %89 = vector.shape_cast %88 : vector<1x1x64xf32> to vector<1x64xf32>
    %c0_38 = arith.constant 0 : index
    %c0_39 = arith.constant 0 : index
    %c0_40 = arith.constant 0 : index
    %90 = vector.load %arg15[%c0_38, %c0_39, %c0_40] : memref<1x1x64xf32, #tpu.memory_space<vmem>>, vector<1x1x64xf32>
    %91 = vector.shape_cast %90 : vector<1x1x64xf32> to vector<1x64xf32>
    %cst_41 = arith.constant dense<0.000000e+00> : vector<8xf32>
    %92 = vector.multi_reduction <add>, %87, %cst_41 [1] : vector<8x64xf32> to vector<8xf32>
    %93 = vector.shape_cast %92 : vector<8xf32> to vector<8x1xf32>
    %cst_42 = arith.constant 6.400000e+01 : f32
    %94 = vector.broadcast %cst_42 : f32 to vector<8x1xf32>
    %95 = arith.divf %93, %94 : vector<8x1xf32>
    %96 = vector.broadcast %95 : vector<8x1xf32> to vector<8x64xf32>
    %97 = arith.subf %87, %96 : vector<8x64xf32>
    %98 = arith.mulf %97, %97 : vector<8x64xf32>
    %cst_43 = arith.constant dense<0.000000e+00> : vector<8xf32>
    %99 = vector.multi_reduction <add>, %98, %cst_43 [1] : vector<8x64xf32> to vector<8xf32>
    %100 = vector.shape_cast %99 : vector<8xf32> to vector<8x1xf32>
    %cst_44 = arith.constant 6.400000e+01 : f32
    %101 = vector.broadcast %cst_44 : f32 to vector<8x1xf32>
    %102 = arith.divf %100, %101 : vector<8x1xf32>
    %103 = vector.broadcast %95 : vector<8x1xf32> to vector<8x64xf32>
    %104 = arith.subf %87, %103 : vector<8x64xf32>
    %cst_45 = arith.constant 9.99999974E-6 : f32
    %105 = vector.broadcast %cst_45 : f32 to vector<8x1xf32>
    %106 = arith.addf %102, %105 : vector<8x1xf32>
    %107 = math.rsqrt %106 : vector<8x1xf32>
    %108 = vector.broadcast %107 : vector<8x1xf32> to vector<8x64xf32>
    %109 = arith.mulf %104, %108 : vector<8x64xf32>
    %110 = vector.broadcast %89 : vector<1x64xf32> to vector<8x64xf32>
    %111 = arith.mulf %109, %110 : vector<8x64xf32>
    %112 = vector.broadcast %91 : vector<1x64xf32> to vector<8x64xf32>
    %113 = arith.addf %111, %112 : vector<8x64xf32>
    %c0_46 = arith.constant 0 : index
    %c0_47 = arith.constant 0 : index
    %c0_48 = arith.constant 0 : index
    %114 = vector.load %arg10[%c0_46, %c0_47, %c0_48] : memref<1x64x128xf32, #tpu.memory_space<vmem>>, vector<1x64x128xf32>
    %115 = vector.shape_cast %114 : vector<1x64x128xf32> to vector<64x128xf32>
    %cst_49 = arith.constant dense<0.000000e+00> : vector<8x128xf32>
    %116 = tpu.matmul %113, %115, %cst_49 {dimension_numbers = #tpu.dot_dimension_numbers<[1], [0], [0], [1], [0, 0, 1, 1], [], []>} : vector<8x64xf32>, vector<64x128xf32>, vector<8x128xf32> -> vector<8x128xf32>
    %c0_50 = arith.constant 0 : index
    %c0_51 = arith.constant 0 : index
    %c0_52 = arith.constant 0 : index
    %117 = vector.load %arg11[%c0_50, %c0_51, %c0_52] : memref<1x1x128xf32, #tpu.memory_space<vmem>>, vector<1x1x128xf32>
    %118 = vector.shape_cast %117 : vector<1x1x128xf32> to vector<1x128xf32>
    %119 = vector.broadcast %118 : vector<1x128xf32> to vector<8x128xf32>
    %120 = arith.addf %116, %119 : vector<8x128xf32>
    %cst_53 = arith.constant 0.000000e+00 : f32
    %121 = vector.broadcast %cst_53 : f32 to vector<8x128xf32>
    %122 = arith.maximumf %120, %121 : vector<8x128xf32>
    %c0_54 = arith.constant 0 : index
    %c0_55 = arith.constant 0 : index
    %c0_56 = arith.constant 0 : index
    %123 = vector.load %arg12[%c0_54, %c0_55, %c0_56] : memref<1x128x64xf32, #tpu.memory_space<vmem>>, vector<1x128x64xf32>
    %124 = vector.shape_cast %123 : vector<1x128x64xf32> to vector<128x64xf32>
    %cst_57 = arith.constant dense<0.000000e+00> : vector<8x64xf32>
    %125 = tpu.matmul %122, %124, %cst_57 {dimension_numbers = #tpu.dot_dimension_numbers<[1], [0], [0], [1], [0, 0, 1, 1], [], []>} : vector<8x128xf32>, vector<128x64xf32>, vector<8x64xf32> -> vector<8x64xf32>
    %c0_58 = arith.constant 0 : index
    %c0_59 = arith.constant 0 : index
    %c0_60 = arith.constant 0 : index
    %126 = vector.load %arg13[%c0_58, %c0_59, %c0_60] : memref<1x1x64xf32, #tpu.memory_space<vmem>>, vector<1x1x64xf32>
    %127 = vector.shape_cast %126 : vector<1x1x64xf32> to vector<1x64xf32>
    %128 = vector.broadcast %127 : vector<1x64xf32> to vector<8x64xf32>
    %129 = arith.addf %125, %128 : vector<8x64xf32>
    %130 = arith.addf %113, %129 : vector<8x64xf32>
    %c0_61 = arith.constant 0 : index
    %c0_62 = arith.constant 0 : index
    %c0_63 = arith.constant 0 : index
    %131 = vector.load %arg16[%c0_61, %c0_62, %c0_63] : memref<1x1x64xf32, #tpu.memory_space<vmem>>, vector<1x1x64xf32>
    %132 = vector.shape_cast %131 : vector<1x1x64xf32> to vector<1x64xf32>
    %c0_64 = arith.constant 0 : index
    %c0_65 = arith.constant 0 : index
    %c0_66 = arith.constant 0 : index
    %133 = vector.load %arg17[%c0_64, %c0_65, %c0_66] : memref<1x1x64xf32, #tpu.memory_space<vmem>>, vector<1x1x64xf32>
    %134 = vector.shape_cast %133 : vector<1x1x64xf32> to vector<1x64xf32>
    %cst_67 = arith.constant dense<0.000000e+00> : vector<8xf32>
    %135 = vector.multi_reduction <add>, %130, %cst_67 [1] : vector<8x64xf32> to vector<8xf32>
    %136 = vector.shape_cast %135 : vector<8xf32> to vector<8x1xf32>
    %cst_68 = arith.constant 6.400000e+01 : f32
    %137 = vector.broadcast %cst_68 : f32 to vector<8x1xf32>
    %138 = arith.divf %136, %137 : vector<8x1xf32>
    %139 = vector.broadcast %138 : vector<8x1xf32> to vector<8x64xf32>
    %140 = arith.subf %130, %139 : vector<8x64xf32>
    %141 = arith.mulf %140, %140 : vector<8x64xf32>
    %cst_69 = arith.constant dense<0.000000e+00> : vector<8xf32>
    %142 = vector.multi_reduction <add>, %141, %cst_69 [1] : vector<8x64xf32> to vector<8xf32>
    %143 = vector.shape_cast %142 : vector<8xf32> to vector<8x1xf32>
    %cst_70 = arith.constant 6.400000e+01 : f32
    %144 = vector.broadcast %cst_70 : f32 to vector<8x1xf32>
    %145 = arith.divf %143, %144 : vector<8x1xf32>
    %146 = vector.broadcast %138 : vector<8x1xf32> to vector<8x64xf32>
    %147 = arith.subf %130, %146 : vector<8x64xf32>
    %cst_71 = arith.constant 9.99999974E-6 : f32
    %148 = vector.broadcast %cst_71 : f32 to vector<8x1xf32>
    %149 = arith.addf %145, %148 : vector<8x1xf32>
    %150 = math.rsqrt %149 : vector<8x1xf32>
    %151 = vector.broadcast %150 : vector<8x1xf32> to vector<8x64xf32>
    %152 = arith.mulf %147, %151 : vector<8x64xf32>
    %153 = vector.broadcast %132 : vector<1x64xf32> to vector<8x64xf32>
    %154 = arith.mulf %152, %153 : vector<8x64xf32>
    %155 = vector.broadcast %134 : vector<1x64xf32> to vector<8x64xf32>
    %156 = arith.addf %154, %155 : vector<8x64xf32>
    %c0_72 = arith.constant 0 : index
    %c0_73 = arith.constant 0 : index
    %157 = vector.load %arg21[%c0_72, %c0_73] : memref<8x64xf32, #tpu.memory_space<vmem>>, vector<8x64xf32>
    tpu.vector_store %arg21[%c0_72, %c0_73], %156 {strides = array<i32>} : memref<8x64xf32, #tpu.memory_space<vmem>>, vector<8x64xf32>,
    %c1_i32 = arith.constant 1 : i32
    %158 = arith.cmpi eq, %arg0, %c1_i32 : i32
    %159 = arith.extui %158 : i1 to i32
    %c0_i32_74 = arith.constant 0 : i32
    %160 = arith.cmpi ne, %159, %c0_i32_74 : i32
    scf.if %160 {
      %c0_75 = arith.constant 0 : index
      %c0_76 = arith.constant 0 : index
      %161 = vector.load %arg18[%c0_75, %c0_76] : memref<64x128xf32, #tpu.memory_space<vmem>>, vector<64x128xf32>
      %cst_77 = arith.constant dense<0.000000e+00> : vector<8x128xf32>
      %162 = tpu.matmul %156, %161, %cst_77 {dimension_numbers = #tpu.dot_dimension_numbers<[1], [0], [0], [1], [0, 0, 1, 1], [], []>} : vector<8x64xf32>, vector<64x128xf32>, vector<8x128xf32> -> vector<8x128xf32>
      %c0_78 = arith.constant 0 : index
      %c0_79 = arith.constant 0 : index
      %163 = vector.load %arg19[%c0_78, %c0_79] : memref<1x128xf32, #tpu.memory_space<vmem>>, vector<1x128xf32>
      %164 = vector.broadcast %163 : vector<1x128xf32> to vector<8x128xf32>
      %165 = arith.addf %162, %164 : vector<8x128xf32>
      %c0_80 = arith.constant 0 : index
      %c0_81 = arith.constant 0 : index
      %166 = vector.load %arg20[%c0_80, %c0_81] : memref<8x128xf32, #tpu.memory_space<vmem>>, vector<8x128xf32>
      tpu.vector_store %arg20[%c0_80, %c0_81], %165 {strides = array<i32>} : memref<8x128xf32, #tpu.memory_space<vmem>>, vector<8x128xf32>,
    } else {
    }
    return
  }
  func.func @transform_0(%arg0: i32) -> (i32, i32) {
    %c0_i32 = arith.constant 0 : i32
    %c0_i32_0 = arith.constant 0 : i32
    %c0_i32_1 = arith.constant 0 : i32
    return %c0_i32, %c0_i32_0 : i32, i32
  }
  func.func @transform_1(%arg0: i32) -> (i32, i32) {
    %c0_i32 = arith.constant 0 : i32
    %c0_i32_0 = arith.constant 0 : i32
    %c0_i32_1 = arith.constant 0 : i32
    return %c0_i32, %c0_i32_0 : i32, i32
  }
  func.func @transform_2(%arg0: i32) -> (i32, i32) {
    %c0_i32 = arith.constant 0 : i32
    %c0_i32_0 = arith.constant 0 : i32
    %c0_i32_1 = arith.constant 0 : i32
    return %c0_i32, %c0_i32_0 : i32, i32
  }
  func.func @transform_3(%arg0: i32) -> (i32, i32) {
    %c0_i32 = arith.constant 0 : i32
    %c0_i32_0 = arith.constant 0 : i32
    %c0_i32_1 = arith.constant 0 : i32
    return %c0_i32, %c0_i32_0 : i32, i32
  }
  func.func @transform_4(%arg0: i32) -> (i32, i32) {
    %c0_i32 = arith.constant 0 : i32
    %c0_i32_0 = arith.constant 0 : i32
    %c0_i32_1 = arith.constant 0 : i32
    return %c0_i32, %c0_i32_0 : i32, i32
  }
  func.func @transform_5(%arg0: i32) -> (i32, i32, i32) {
    %c0_i32 = arith.constant 0 : i32
    %c0_i32_0 = arith.constant 0 : i32
    %c0_i32_1 = arith.constant 0 : i32
    return %arg0, %c0_i32, %c0_i32_0 : i32, i32, i32
  }
  func.func @transform_6(%arg0: i32) -> (i32, i32, i32) {
    %c0_i32 = arith.constant 0 : i32
    %c0_i32_0 = arith.constant 0 : i32
    %c0_i32_1 = arith.constant 0 : i32
    return %arg0, %c0_i32, %c0_i32_0 : i32, i32, i32
  }
  func.func @transform_7(%arg0: i32) -> (i32, i32, i32) {
    %c0_i32 = arith.constant 0 : i32
    %c0_i32_0 = arith.constant 0 : i32
    %c0_i32_1 = arith.constant 0 : i32
    return %arg0, %c0_i32, %c0_i32_0 : i32, i32, i32
  }
  func.func @transform_8(%arg0: i32) -> (i32, i32, i32) {
    %c0_i32 = arith.constant 0 : i32
    %c0_i32_0 = arith.constant 0 : i32
    %c0_i32_1 = arith.constant 0 : i32
    return %arg0, %c0_i32, %c0_i32_0 : i32, i32, i32
  }
  func.func @transform_9(%arg0: i32) -> (i32, i32, i32) {
    %c0_i32 = arith.constant 0 : i32
    %c0_i32_0 = arith.constant 0 : i32
    %c0_i32_1 = arith.constant 0 : i32
    return %arg0, %c0_i32, %c0_i32_0 : i32, i32, i32
  }
  func.func @transform_10(%arg0: i32) -> (i32, i32, i32) {
    %c0_i32 = arith.constant 0 : i32
    %c0_i32_0 = arith.constant 0 : i32
    %c0_i32_1 = arith.constant 0 : i32
    return %arg0, %c0_i32, %c0_i32_0 : i32, i32, i32
  }
  func.func @transform_11(%arg0: i32) -> (i32, i32, i32) {
    %c0_i32 = arith.constant 0 : i32
    %c0_i32_0 = arith.constant 0 : i32
    %c0_i32_1 = arith.constant 0 : i32
    return %arg0, %c0_i32, %c0_i32_0 : i32, i32, i32
  }
  func.func @transform_12(%arg0: i32) -> (i32, i32, i32) {
    %c0_i32 = arith.constant 0 : i32
    %c0_i32_0 = arith.constant 0 : i32
    %c0_i32_1 = arith.constant 0 : i32
    return %arg0, %c0_i32, %c0_i32_0 : i32, i32, i32
  }
  func.func @transform_13(%arg0: i32) -> (i32, i32, i32) {
    %c0_i32 = arith.constant 0 : i32
    %c0_i32_0 = arith.constant 0 : i32
    %c0_i32_1 = arith.constant 0 : i32
    return %arg0, %c0_i32, %c0_i32_0 : i32, i32, i32
  }
  func.func @transform_14(%arg0: i32) -> (i32, i32, i32) {
    %c0_i32 = arith.constant 0 : i32
    %c0_i32_0 = arith.constant 0 : i32
    %c0_i32_1 = arith.constant 0 : i32
    return %arg0, %c0_i32, %c0_i32_0 : i32, i32, i32
  }
  func.func @transform_15(%arg0: i32) -> (i32, i32, i32) {
    %c0_i32 = arith.constant 0 : i32
    %c0_i32_0 = arith.constant 0 : i32
    %c0_i32_1 = arith.constant 0 : i32
    return %arg0, %c0_i32, %c0_i32_0 : i32, i32, i32
  }
  func.func @transform_16(%arg0: i32) -> (i32, i32, i32) {
    %c0_i32 = arith.constant 0 : i32
    %c0_i32_0 = arith.constant 0 : i32
    %c0_i32_1 = arith.constant 0 : i32
    return %arg0, %c0_i32, %c0_i32_0 : i32, i32, i32
  }
  func.func @transform_17(%arg0: i32) -> (i32, i32) {
    %c0_i32 = arith.constant 0 : i32
    %c0_i32_0 = arith.constant 0 : i32
    %c0_i32_1 = arith.constant 0 : i32
    return %c0_i32, %c0_i32_0 : i32, i32
  }
  func.func @transform_18(%arg0: i32) -> (i32, i32) {
    %c0_i32 = arith.constant 0 : i32
    %c0_i32_0 = arith.constant 0 : i32
    %c0_i32_1 = arith.constant 0 : i32
    return %c0_i32, %c0_i32_0 : i32, i32
  }
  func.func @transform_19(%arg0: i32) -> (i32, i32) {
    %c0_i32 = arith.constant 0 : i32
    %c0_i32_0 = arith.constant 0 : i32
    %c0_i32_1 = arith.constant 0 : i32
    return %c0_i32, %c0_i32_0 : i32, i32
  }
}

module attributes {stable_mosaic.version = 11 : i64} {
  func.func @_recon_srr_kernel(%arg0: i32, %arg1: memref<16x8xf32, #tpu.memory_space<vmem>>, %arg2: memref<8x16xf32, #tpu.memory_space<vmem>>, %arg3: memref<8x128xbf16, #tpu.memory_space<vmem>>, %arg4: memref<8x1xf32, #tpu.memory_space<vmem>>, %arg5: memref<16x128xf32, #tpu.memory_space<vmem>>) attributes {dimension_semantics = [#tpu.dimension_semantics<parallel>], iteration_bounds = array<i64: 2>, scalar_prefetch = 0 : i64, scratch_operands = 0 : i64, tpu.core_type = #tpu.core_type<tc>, window_params = [{pipeline_mode = #tpu.pipeline_mode<synchronous>, transform_indices = @transform_0, window_bounds = array<i64: 16, 8>}, {pipeline_mode = #tpu.pipeline_mode<synchronous>, transform_indices = @transform_1, window_bounds = array<i64: 8, 16>}, {transform_indices = @transform_2, window_bounds = array<i64: 8, 128>}, {pipeline_mode = #tpu.pipeline_mode<synchronous>, transform_indices = @transform_3, window_bounds = array<i64: 8, 1>}, {transform_indices = @transform_4, window_bounds = array<i64: 16, 128>}]} {
    %c0 = arith.constant 0 : index
    %c0_0 = arith.constant 0 : index
    %0 = vector.load %arg3[%c0, %c0_0] : memref<8x128xbf16, #tpu.memory_space<vmem>>, vector<8x128xbf16>
    %1 = arith.extf %0 : vector<8x128xbf16> to vector<8x128xf32>
    %c0_1 = arith.constant 0 : index
    %c0_2 = arith.constant 0 : index
    %2 = vector.load %arg1[%c0_1, %c0_2] : memref<16x8xf32, #tpu.memory_space<vmem>>, vector<16x8xf32>
    %cst = arith.constant dense<0.000000e+00> : vector<16x128xf32>
    %3 = tpu.matmul %2, %1, %cst {dimension_numbers = #tpu.dot_dimension_numbers<[1], [0], [0], [1], [0, 0, 1, 1], [], []>} : vector<16x8xf32>, vector<8x128xf32>, vector<16x128xf32> -> vector<16x128xf32>
    %c0_3 = arith.constant 0 : index
    %c0_4 = arith.constant 0 : index
    %4 = vector.load %arg2[%c0_3, %c0_4] : memref<8x16xf32, #tpu.memory_space<vmem>>, vector<8x16xf32>
    %c0_5 = arith.constant 0 : index
    %c0_6 = arith.constant 0 : index
    %5 = vector.load %arg4[%c0_5, %c0_6] : memref<8x1xf32, #tpu.memory_space<vmem>>, vector<8x1xf32>
    %cst_7 = arith.constant dense<0.000000e+00> : vector<8x128xf32>
    %6 = tpu.matmul %4, %3, %cst_7 {dimension_numbers = #tpu.dot_dimension_numbers<[1], [0], [0], [1], [0, 0, 1, 1], [], []>} : vector<8x16xf32>, vector<16x128xf32>, vector<8x128xf32> -> vector<8x128xf32>
    %7 = arith.subf %1, %6 : vector<8x128xf32>
    %8 = vector.broadcast %5 : vector<8x1xf32> to vector<8x128xf32>
    %9 = arith.mulf %8, %7 : vector<8x128xf32>
    %cst_8 = arith.constant dense<0.000000e+00> : vector<16x128xf32>
    %10 = tpu.matmul %2, %9, %cst_8 {dimension_numbers = #tpu.dot_dimension_numbers<[1], [0], [0], [1], [0, 0, 1, 1], [], []>} : vector<16x8xf32>, vector<8x128xf32>, vector<16x128xf32> -> vector<16x128xf32>
    %cst_9 = arith.constant 5.000000e-01 : f32
    %11 = vector.broadcast %cst_9 : f32 to vector<16x128xf32>
    %12 = arith.mulf %11, %10 : vector<16x128xf32>
    %13 = arith.addf %3, %12 : vector<16x128xf32>
    %cst_10 = arith.constant dense<0.000000e+00> : vector<8x128xf32>
    %14 = tpu.matmul %4, %13, %cst_10 {dimension_numbers = #tpu.dot_dimension_numbers<[1], [0], [0], [1], [0, 0, 1, 1], [], []>} : vector<8x16xf32>, vector<16x128xf32>, vector<8x128xf32> -> vector<8x128xf32>
    %15 = arith.subf %1, %14 : vector<8x128xf32>
    %16 = vector.broadcast %5 : vector<8x1xf32> to vector<8x128xf32>
    %17 = arith.mulf %16, %15 : vector<8x128xf32>
    %cst_11 = arith.constant dense<0.000000e+00> : vector<16x128xf32>
    %18 = tpu.matmul %2, %17, %cst_11 {dimension_numbers = #tpu.dot_dimension_numbers<[1], [0], [0], [1], [0, 0, 1, 1], [], []>} : vector<16x8xf32>, vector<8x128xf32>, vector<16x128xf32> -> vector<16x128xf32>
    %cst_12 = arith.constant 5.000000e-01 : f32
    %19 = vector.broadcast %cst_12 : f32 to vector<16x128xf32>
    %20 = arith.mulf %19, %18 : vector<16x128xf32>
    %21 = arith.addf %13, %20 : vector<16x128xf32>
    %c0_13 = arith.constant 0 : index
    %c0_14 = arith.constant 0 : index
    %22 = vector.load %arg5[%c0_13, %c0_14] : memref<16x128xf32, #tpu.memory_space<vmem>>, vector<16x128xf32>
    tpu.vector_store %arg5[%c0_13, %c0_14], %21 {strides = array<i32>} : memref<16x128xf32, #tpu.memory_space<vmem>>, vector<16x128xf32>,
    return
  }
  func.func @transform_0(%arg0: i32) -> (i32, i32) {
    %c0_i32 = arith.constant 0 : i32
    %c0_i32_0 = arith.constant 0 : i32
    %c0_i32_1 = arith.constant 0 : i32
    return %c0_i32, %c0_i32_0 : i32, i32
  }
  func.func @transform_1(%arg0: i32) -> (i32, i32) {
    %c0_i32 = arith.constant 0 : i32
    %c0_i32_0 = arith.constant 0 : i32
    %c0_i32_1 = arith.constant 0 : i32
    return %c0_i32, %c0_i32_0 : i32, i32
  }
  func.func @transform_2(%arg0: i32) -> (i32, i32) {
    %c0_i32 = arith.constant 0 : i32
    %c0_i32_0 = arith.constant 0 : i32
    return %c0_i32, %arg0 : i32, i32
  }
  func.func @transform_3(%arg0: i32) -> (i32, i32) {
    %c0_i32 = arith.constant 0 : i32
    %c0_i32_0 = arith.constant 0 : i32
    %c0_i32_1 = arith.constant 0 : i32
    return %c0_i32, %c0_i32_0 : i32, i32
  }
  func.func @transform_4(%arg0: i32) -> (i32, i32) {
    %c0_i32 = arith.constant 0 : i32
    %c0_i32_0 = arith.constant 0 : i32
    return %c0_i32, %arg0 : i32, i32
  }
}

module attributes {stable_mosaic.version = 11 : i64} {
  func.func @_svr_transformer_kernel(%arg0: i32, %arg1: memref<8x256xbf16, #tpu.memory_space<vmem>>, %arg2: memref<8x16xf32, #tpu.memory_space<vmem>>, %arg3: memref<8x16xf32, #tpu.memory_space<vmem>>, %arg4: memref<16x256xbf16, #tpu.memory_space<vmem>>, %arg5: memref<256x64xbf16, #tpu.memory_space<vmem>>, %arg6: memref<256x64xbf16, #tpu.memory_space<vmem>>, %arg7: memref<1x64xf32, #tpu.memory_space<vmem>>, %arg8: memref<16x64xf32, #tpu.memory_space<vmem>>, %arg9: memref<1x64x192xf32, #tpu.memory_space<vmem>>, %arg10: memref<1x1x192xf32, #tpu.memory_space<vmem>>, %arg11: memref<1x64x64xf32, #tpu.memory_space<vmem>>, %arg12: memref<1x1x64xf32, #tpu.memory_space<vmem>>, %arg13: memref<1x64x128xf32, #tpu.memory_space<vmem>>, %arg14: memref<1x1x128xf32, #tpu.memory_space<vmem>>, %arg15: memref<1x128x64xf32, #tpu.memory_space<vmem>>, %arg16: memref<1x1x64xf32, #tpu.memory_space<vmem>>, %arg17: memref<1x1x64xf32, #tpu.memory_space<vmem>>, %arg18: memref<1x1x64xf32, #tpu.memory_space<vmem>>, %arg19: memref<1x1x64xf32, #tpu.memory_space<vmem>>, %arg20: memref<1x1x64xf32, #tpu.memory_space<vmem>>, %arg21: memref<64x128xf32, #tpu.memory_space<vmem>>, %arg22: memref<1x128xf32, #tpu.memory_space<vmem>>, %arg23: memref<8x128xf32, #tpu.memory_space<vmem>>, %arg24: memref<8x64xf32, #tpu.memory_space<vmem>>) attributes {dimension_semantics = [#tpu.dimension_semantics<arbitrary>], iteration_bounds = array<i64: 3>, scalar_prefetch = 0 : i64, scratch_operands = 1 : i64, tpu.core_type = #tpu.core_type<tc>, window_params = [{pipeline_mode = #tpu.pipeline_mode<synchronous>, transform_indices = @transform_0, window_bounds = array<i64: 8, 256>}, {pipeline_mode = #tpu.pipeline_mode<synchronous>, transform_indices = @transform_1, window_bounds = array<i64: 8, 16>}, {pipeline_mode = #tpu.pipeline_mode<synchronous>, transform_indices = @transform_2, window_bounds = array<i64: 8, 16>}, {pipeline_mode = #tpu.pipeline_mode<synchronous>, transform_indices = @transform_3, window_bounds = array<i64: 16, 256>}, {pipeline_mode = #tpu.pipeline_mode<synchronous>, transform_indices = @transform_4, window_bounds = array<i64: 256, 64>}, {pipeline_mode = #tpu.pipeline_mode<synchronous>, transform_indices = @transform_5, window_bounds = array<i64: 256, 64>}, {pipeline_mode = #tpu.pipeline_mode<synchronous>, transform_indices = @transform_6, window_bounds = array<i64: 1, 64>}, {pipeline_mode = #tpu.pipeline_mode<synchronous>, transform_indices = @transform_7, window_bounds = array<i64: 16, 64>}, {transform_indices = @transform_8, window_bounds = array<i64: 1, 64, 192>}, {transform_indices = @transform_9, window_bounds = array<i64: 1, 1, 192>}, {transform_indices = @transform_10, window_bounds = array<i64: 1, 64, 64>}, {transform_indices = @transform_11, window_bounds = array<i64: 1, 1, 64>}, {transform_indices = @transform_12, window_bounds = array<i64: 1, 64, 128>}, {transform_indices = @transform_13, window_bounds = array<i64: 1, 1, 128>}, {transform_indices = @transform_14, window_bounds = array<i64: 1, 128, 64>}, {transform_indices = @transform_15, window_bounds = array<i64: 1, 1, 64>}, {transform_indices = @transform_16, window_bounds = array<i64: 1, 1, 64>}, {transform_indices = @transform_17, window_bounds = array<i64: 1, 1, 64>}, {transform_indices = @transform_18, window_bounds = array<i64: 1, 1, 64>}, {transform_indices = @transform_19, window_bounds = array<i64: 1, 1, 64>}, {pipeline_mode = #tpu.pipeline_mode<synchronous>, transform_indices = @transform_20, window_bounds = array<i64: 64, 128>}, {pipeline_mode = #tpu.pipeline_mode<synchronous>, transform_indices = @transform_21, window_bounds = array<i64: 1, 128>}, {pipeline_mode = #tpu.pipeline_mode<synchronous>, transform_indices = @transform_22, window_bounds = array<i64: 8, 128>}]} {
    %c0_i32 = arith.constant 0 : i32
    %0 = arith.cmpi eq, %arg0, %c0_i32 : i32
    %1 = arith.extui %0 : i1 to i32
    %c0_i32_0 = arith.constant 0 : i32
    %2 = arith.cmpi ne, %1, %c0_i32_0 : i32
    scf.if %2 {
      %c0_75 = arith.constant 0 : index
      %c0_76 = arith.constant 0 : index
      %161 = vector.load %arg1[%c0_75, %c0_76] : memref<8x256xbf16, #tpu.memory_space<vmem>>, vector<8x256xbf16>
      %162 = arith.extf %161 : vector<8x256xbf16> to vector<8x256xf32>
      %c0_77 = arith.constant 0 : index
      %c0_78 = arith.constant 0 : index
      %163 = vector.load %arg6[%c0_77, %c0_78] : memref<256x64xbf16, #tpu.memory_space<vmem>>, vector<256x64xbf16>
      %164 = arith.extf %163 : vector<256x64xbf16> to vector<256x64xf32>
      %cst_79 = arith.constant dense<0.000000e+00> : vector<8x64xf32>
      %165 = tpu.matmul %162, %164, %cst_79 {dimension_numbers = #tpu.dot_dimension_numbers<[1], [0], [0], [1], [0, 0, 1, 1], [], []>} : vector<8x256xf32>, vector<256x64xf32>, vector<8x64xf32> -> vector<8x64xf32>
      %c0_80 = arith.constant 0 : index
      %c0_81 = arith.constant 0 : index
      %166 = vector.load %arg3[%c0_80, %c0_81] : memref<8x16xf32, #tpu.memory_space<vmem>>, vector<8x16xf32>
      %c0_82 = arith.constant 0 : index
      %c0_83 = arith.constant 0 : index
      %167 = vector.load %arg4[%c0_82, %c0_83] : memref<16x256xbf16, #tpu.memory_space<vmem>>, vector<16x256xbf16>
      %168 = arith.extf %167 : vector<16x256xbf16> to vector<16x256xf32>
      %cst_84 = arith.constant dense<0.000000e+00> : vector<8x256xf32>
      %169 = tpu.matmul %166, %168, %cst_84 {dimension_numbers = #tpu.dot_dimension_numbers<[1], [0], [0], [1], [0, 0, 1, 1], [], []>} : vector<8x16xf32>, vector<16x256xf32>, vector<8x256xf32> -> vector<8x256xf32>
      %c0_85 = arith.constant 0 : index
      %c0_86 = arith.constant 0 : index
      %170 = vector.load %arg5[%c0_85, %c0_86] : memref<256x64xbf16, #tpu.memory_space<vmem>>, vector<256x64xbf16>
      %171 = arith.extf %170 : vector<256x64xbf16> to vector<256x64xf32>
      %cst_87 = arith.constant dense<0.000000e+00> : vector<8x64xf32>
      %172 = tpu.matmul %169, %171, %cst_87 {dimension_numbers = #tpu.dot_dimension_numbers<[1], [0], [0], [1], [0, 0, 1, 1], [], []>} : vector<8x256xf32>, vector<256x64xf32>, vector<8x64xf32> -> vector<8x64xf32>
      %173 = arith.addf %165, %172 : vector<8x64xf32>
      %c0_88 = arith.constant 0 : index
      %c0_89 = arith.constant 0 : index
      %174 = vector.load %arg2[%c0_88, %c0_89] : memref<8x16xf32, #tpu.memory_space<vmem>>, vector<8x16xf32>
      %c0_90 = arith.constant 0 : index
      %c0_91 = arith.constant 0 : index
      %175 = vector.load %arg8[%c0_90, %c0_91] : memref<16x64xf32, #tpu.memory_space<vmem>>, vector<16x64xf32>
      %cst_92 = arith.constant dense<0.000000e+00> : vector<8x64xf32>
      %176 = tpu.matmul %174, %175, %cst_92 {dimension_numbers = #tpu.dot_dimension_numbers<[1], [0], [0], [1], [0, 0, 1, 1], [], []>} : vector<8x16xf32>, vector<16x64xf32>, vector<8x64xf32> -> vector<8x64xf32>
      %177 = arith.addf %173, %176 : vector<8x64xf32>
      %c0_93 = arith.constant 0 : index
      %c0_94 = arith.constant 0 : index
      %178 = vector.load %arg7[%c0_93, %c0_94] : memref<1x64xf32, #tpu.memory_space<vmem>>, vector<1x64xf32>
      %179 = vector.broadcast %178 : vector<1x64xf32> to vector<8x64xf32>
      %180 = arith.addf %177, %179 : vector<8x64xf32>
      %c0_95 = arith.constant 0 : index
      %c0_96 = arith.constant 0 : index
      %181 = vector.load %arg24[%c0_95, %c0_96] : memref<8x64xf32, #tpu.memory_space<vmem>>, vector<8x64xf32>
      tpu.vector_store %arg24[%c0_95, %c0_96], %180 {strides = array<i32>} : memref<8x64xf32, #tpu.memory_space<vmem>>, vector<8x64xf32>,
    } else {
    }
    %c0 = arith.constant 0 : index
    %c0_1 = arith.constant 0 : index
    %3 = vector.load %arg24[%c0, %c0_1] : memref<8x64xf32, #tpu.memory_space<vmem>>, vector<8x64xf32>
    %c0_2 = arith.constant 0 : index
    %c0_3 = arith.constant 0 : index
    %c0_4 = arith.constant 0 : index
    %4 = vector.load %arg9[%c0_2, %c0_3, %c0_4] : memref<1x64x192xf32, #tpu.memory_space<vmem>>, vector<1x64x192xf32>
    %5 = vector.shape_cast %4 : vector<1x64x192xf32> to vector<64x192xf32>
    %cst = arith.constant dense<0.000000e+00> : vector<8x192xf32>
    %6 = tpu.matmul %3, %5, %cst {dimension_numbers = #tpu.dot_dimension_numbers<[1], [0], [0], [1], [0, 0, 1, 1], [], []>} : vector<8x64xf32>, vector<64x192xf32>, vector<8x192xf32> -> vector<8x192xf32>
    %c0_5 = arith.constant 0 : index
    %c0_6 = arith.constant 0 : index
    %c0_7 = arith.constant 0 : index
    %7 = vector.load %arg10[%c0_5, %c0_6, %c0_7] : memref<1x1x192xf32, #tpu.memory_space<vmem>>, vector<1x1x192xf32>
    %8 = vector.shape_cast %7 : vector<1x1x192xf32> to vector<1x192xf32>
    %9 = vector.broadcast %8 : vector<1x192xf32> to vector<8x192xf32>
    %10 = arith.addf %6, %9 : vector<8x192xf32>
    %11 = vector.extract_strided_slice %10 {offsets = [0, 0], sizes = [8, 16], strides = [1, 1]} : vector<8x192xf32> to vector<8x16xf32>
    %12 = vector.extract_strided_slice %10 {offsets = [0, 64], sizes = [8, 16], strides = [1, 1]} : vector<8x192xf32> to vector<8x16xf32>
    %13 = vector.extract_strided_slice %10 {offsets = [0, 128], sizes = [8, 16], strides = [1, 1]} : vector<8x192xf32> to vector<8x16xf32>
    %cst_8 = arith.constant dense<0.000000e+00> : vector<8x8xf32>
    %14 = tpu.matmul %11, %12, %cst_8 {dimension_numbers = #tpu.dot_dimension_numbers<[1], [1], [0], [0], [0, 0, 1, 0], [], []>} : vector<8x16xf32>, vector<8x16xf32>, vector<8x8xf32> -> vector<8x8xf32>
    %cst_9 = arith.constant 2.500000e-01 : f32
    %15 = vector.broadcast %cst_9 : f32 to vector<8x8xf32>
    %16 = arith.mulf %14, %15 : vector<8x8xf32>
    %cst_10 = arith.constant dense<0xFF800000> : vector<8xf32>
    %17 = vector.multi_reduction <maximumf>, %16, %cst_10 [1] : vector<8x8xf32> to vector<8xf32>
    %18 = vector.shape_cast %17 : vector<8xf32> to vector<8x1xf32>
    %19 = vector.broadcast %18 : vector<8x1xf32> to vector<8x8xf32>
    %20 = arith.subf %16, %19 : vector<8x8xf32>
    %21 = math.exp %20 : vector<8x8xf32>
    %cst_11 = arith.constant dense<0.000000e+00> : vector<8xf32>
    %22 = vector.multi_reduction <add>, %21, %cst_11 [1] : vector<8x8xf32> to vector<8xf32>
    %23 = vector.shape_cast %22 : vector<8xf32> to vector<8x1xf32>
    %24 = tpu.reciprocal %23 {approx = true} : vector<8x1xf32> -> vector<8x1xf32>
    %25 = vector.broadcast %24 : vector<8x1xf32> to vector<8x8xf32>
    %26 = arith.mulf %21, %25 : vector<8x8xf32>
    %cst_12 = arith.constant dense<0.000000e+00> : vector<8x16xf32>
    %27 = tpu.matmul %26, %13, %cst_12 {dimension_numbers = #tpu.dot_dimension_numbers<[1], [0], [0], [1], [0, 0, 1, 1], [], []>} : vector<8x8xf32>, vector<8x16xf32>, vector<8x16xf32> -> vector<8x16xf32>
    %28 = vector.extract_strided_slice %10 {offsets = [0, 16], sizes = [8, 16], strides = [1, 1]} : vector<8x192xf32> to vector<8x16xf32>
    %29 = vector.extract_strided_slice %10 {offsets = [0, 80], sizes = [8, 16], strides = [1, 1]} : vector<8x192xf32> to vector<8x16xf32>
    %30 = vector.extract_strided_slice %10 {offsets = [0, 144], sizes = [8, 16], strides = [1, 1]} : vector<8x192xf32> to vector<8x16xf32>
    %cst_13 = arith.constant dense<0.000000e+00> : vector<8x8xf32>
    %31 = tpu.matmul %28, %29, %cst_13 {dimension_numbers = #tpu.dot_dimension_numbers<[1], [1], [0], [0], [0, 0, 1, 0], [], []>} : vector<8x16xf32>, vector<8x16xf32>, vector<8x8xf32> -> vector<8x8xf32>
    %cst_14 = arith.constant 2.500000e-01 : f32
    %32 = vector.broadcast %cst_14 : f32 to vector<8x8xf32>
    %33 = arith.mulf %31, %32 : vector<8x8xf32>
    %cst_15 = arith.constant dense<0xFF800000> : vector<8xf32>
    %34 = vector.multi_reduction <maximumf>, %33, %cst_15 [1] : vector<8x8xf32> to vector<8xf32>
    %35 = vector.shape_cast %34 : vector<8xf32> to vector<8x1xf32>
    %36 = vector.broadcast %35 : vector<8x1xf32> to vector<8x8xf32>
    %37 = arith.subf %33, %36 : vector<8x8xf32>
    %38 = math.exp %37 : vector<8x8xf32>
    %cst_16 = arith.constant dense<0.000000e+00> : vector<8xf32>
    %39 = vector.multi_reduction <add>, %38, %cst_16 [1] : vector<8x8xf32> to vector<8xf32>
    %40 = vector.shape_cast %39 : vector<8xf32> to vector<8x1xf32>
    %41 = tpu.reciprocal %40 {approx = true} : vector<8x1xf32> -> vector<8x1xf32>
    %42 = vector.broadcast %41 : vector<8x1xf32> to vector<8x8xf32>
    %43 = arith.mulf %38, %42 : vector<8x8xf32>
    %cst_17 = arith.constant dense<0.000000e+00> : vector<8x16xf32>
    %44 = tpu.matmul %43, %30, %cst_17 {dimension_numbers = #tpu.dot_dimension_numbers<[1], [0], [0], [1], [0, 0, 1, 1], [], []>} : vector<8x8xf32>, vector<8x16xf32>, vector<8x16xf32> -> vector<8x16xf32>
    %45 = vector.extract_strided_slice %10 {offsets = [0, 32], sizes = [8, 16], strides = [1, 1]} : vector<8x192xf32> to vector<8x16xf32>
    %46 = vector.extract_strided_slice %10 {offsets = [0, 96], sizes = [8, 16], strides = [1, 1]} : vector<8x192xf32> to vector<8x16xf32>
    %47 = vector.extract_strided_slice %10 {offsets = [0, 160], sizes = [8, 16], strides = [1, 1]} : vector<8x192xf32> to vector<8x16xf32>
    %cst_18 = arith.constant dense<0.000000e+00> : vector<8x8xf32>
    %48 = tpu.matmul %45, %46, %cst_18 {dimension_numbers = #tpu.dot_dimension_numbers<[1], [1], [0], [0], [0, 0, 1, 0], [], []>} : vector<8x16xf32>, vector<8x16xf32>, vector<8x8xf32> -> vector<8x8xf32>
    %cst_19 = arith.constant 2.500000e-01 : f32
    %49 = vector.broadcast %cst_19 : f32 to vector<8x8xf32>
    %50 = arith.mulf %48, %49 : vector<8x8xf32>
    %cst_20 = arith.constant dense<0xFF800000> : vector<8xf32>
    %51 = vector.multi_reduction <maximumf>, %50, %cst_20 [1] : vector<8x8xf32> to vector<8xf32>
    %52 = vector.shape_cast %51 : vector<8xf32> to vector<8x1xf32>
    %53 = vector.broadcast %52 : vector<8x1xf32> to vector<8x8xf32>
    %54 = arith.subf %50, %53 : vector<8x8xf32>
    %55 = math.exp %54 : vector<8x8xf32>
    %cst_21 = arith.constant dense<0.000000e+00> : vector<8xf32>
    %56 = vector.multi_reduction <add>, %55, %cst_21 [1] : vector<8x8xf32> to vector<8xf32>
    %57 = vector.shape_cast %56 : vector<8xf32> to vector<8x1xf32>
    %58 = tpu.reciprocal %57 {approx = true} : vector<8x1xf32> -> vector<8x1xf32>
    %59 = vector.broadcast %58 : vector<8x1xf32> to vector<8x8xf32>
    %60 = arith.mulf %55, %59 : vector<8x8xf32>
    %cst_22 = arith.constant dense<0.000000e+00> : vector<8x16xf32>
    %61 = tpu.matmul %60, %47, %cst_22 {dimension_numbers = #tpu.dot_dimension_numbers<[1], [0], [0], [1], [0, 0, 1, 1], [], []>} : vector<8x8xf32>, vector<8x16xf32>, vector<8x16xf32> -> vector<8x16xf32>
    %62 = vector.extract_strided_slice %10 {offsets = [0, 48], sizes = [8, 16], strides = [1, 1]} : vector<8x192xf32> to vector<8x16xf32>
    %63 = vector.extract_strided_slice %10 {offsets = [0, 112], sizes = [8, 16], strides = [1, 1]} : vector<8x192xf32> to vector<8x16xf32>
    %64 = vector.extract_strided_slice %10 {offsets = [0, 176], sizes = [8, 16], strides = [1, 1]} : vector<8x192xf32> to vector<8x16xf32>
    %cst_23 = arith.constant dense<0.000000e+00> : vector<8x8xf32>
    %65 = tpu.matmul %62, %63, %cst_23 {dimension_numbers = #tpu.dot_dimension_numbers<[1], [1], [0], [0], [0, 0, 1, 0], [], []>} : vector<8x16xf32>, vector<8x16xf32>, vector<8x8xf32> -> vector<8x8xf32>
    %cst_24 = arith.constant 2.500000e-01 : f32
    %66 = vector.broadcast %cst_24 : f32 to vector<8x8xf32>
    %67 = arith.mulf %65, %66 : vector<8x8xf32>
    %cst_25 = arith.constant dense<0xFF800000> : vector<8xf32>
    %68 = vector.multi_reduction <maximumf>, %67, %cst_25 [1] : vector<8x8xf32> to vector<8xf32>
    %69 = vector.shape_cast %68 : vector<8xf32> to vector<8x1xf32>
    %70 = vector.broadcast %69 : vector<8x1xf32> to vector<8x8xf32>
    %71 = arith.subf %67, %70 : vector<8x8xf32>
    %72 = math.exp %71 : vector<8x8xf32>
    %cst_26 = arith.constant dense<0.000000e+00> : vector<8xf32>
    %73 = vector.multi_reduction <add>, %72, %cst_26 [1] : vector<8x8xf32> to vector<8xf32>
    %74 = vector.shape_cast %73 : vector<8xf32> to vector<8x1xf32>
    %75 = tpu.reciprocal %74 {approx = true} : vector<8x1xf32> -> vector<8x1xf32>
    %76 = vector.broadcast %75 : vector<8x1xf32> to vector<8x8xf32>
    %77 = arith.mulf %72, %76 : vector<8x8xf32>
    %cst_27 = arith.constant dense<0.000000e+00> : vector<8x16xf32>
    %78 = tpu.matmul %77, %64, %cst_27 {dimension_numbers = #tpu.dot_dimension_numbers<[1], [0], [0], [1], [0, 0, 1, 1], [], []>} : vector<8x8xf32>, vector<8x16xf32>, vector<8x16xf32> -> vector<8x16xf32>
    %79 = tpu.concatenate %27, %44, %61, %78 in 1 : vector<8x16xf32>, vector<8x16xf32>, vector<8x16xf32>, vector<8x16xf32> -> vector<8x64xf32>
    %c0_28 = arith.constant 0 : index
    %c0_29 = arith.constant 0 : index
    %c0_30 = arith.constant 0 : index
    %80 = vector.load %arg11[%c0_28, %c0_29, %c0_30] : memref<1x64x64xf32, #tpu.memory_space<vmem>>, vector<1x64x64xf32>
    %81 = vector.shape_cast %80 : vector<1x64x64xf32> to vector<64x64xf32>
    %cst_31 = arith.constant dense<0.000000e+00> : vector<8x64xf32>
    %82 = tpu.matmul %79, %81, %cst_31 {dimension_numbers = #tpu.dot_dimension_numbers<[1], [0], [0], [1], [0, 0, 1, 1], [], []>} : vector<8x64xf32>, vector<64x64xf32>, vector<8x64xf32> -> vector<8x64xf32>
    %c0_32 = arith.constant 0 : index
    %c0_33 = arith.constant 0 : index
    %c0_34 = arith.constant 0 : index
    %83 = vector.load %arg12[%c0_32, %c0_33, %c0_34] : memref<1x1x64xf32, #tpu.memory_space<vmem>>, vector<1x1x64xf32>
    %84 = vector.shape_cast %83 : vector<1x1x64xf32> to vector<1x64xf32>
    %85 = vector.broadcast %84 : vector<1x64xf32> to vector<8x64xf32>
    %86 = arith.addf %82, %85 : vector<8x64xf32>
    %87 = arith.addf %3, %86 : vector<8x64xf32>
    %c0_35 = arith.constant 0 : index
    %c0_36 = arith.constant 0 : index
    %c0_37 = arith.constant 0 : index
    %88 = vector.load %arg17[%c0_35, %c0_36, %c0_37] : memref<1x1x64xf32, #tpu.memory_space<vmem>>, vector<1x1x64xf32>
    %89 = vector.shape_cast %88 : vector<1x1x64xf32> to vector<1x64xf32>
    %c0_38 = arith.constant 0 : index
    %c0_39 = arith.constant 0 : index
    %c0_40 = arith.constant 0 : index
    %90 = vector.load %arg18[%c0_38, %c0_39, %c0_40] : memref<1x1x64xf32, #tpu.memory_space<vmem>>, vector<1x1x64xf32>
    %91 = vector.shape_cast %90 : vector<1x1x64xf32> to vector<1x64xf32>
    %cst_41 = arith.constant dense<0.000000e+00> : vector<8xf32>
    %92 = vector.multi_reduction <add>, %87, %cst_41 [1] : vector<8x64xf32> to vector<8xf32>
    %93 = vector.shape_cast %92 : vector<8xf32> to vector<8x1xf32>
    %cst_42 = arith.constant 6.400000e+01 : f32
    %94 = vector.broadcast %cst_42 : f32 to vector<8x1xf32>
    %95 = arith.divf %93, %94 : vector<8x1xf32>
    %96 = vector.broadcast %95 : vector<8x1xf32> to vector<8x64xf32>
    %97 = arith.subf %87, %96 : vector<8x64xf32>
    %98 = arith.mulf %97, %97 : vector<8x64xf32>
    %cst_43 = arith.constant dense<0.000000e+00> : vector<8xf32>
    %99 = vector.multi_reduction <add>, %98, %cst_43 [1] : vector<8x64xf32> to vector<8xf32>
    %100 = vector.shape_cast %99 : vector<8xf32> to vector<8x1xf32>
    %cst_44 = arith.constant 6.400000e+01 : f32
    %101 = vector.broadcast %cst_44 : f32 to vector<8x1xf32>
    %102 = arith.divf %100, %101 : vector<8x1xf32>
    %103 = vector.broadcast %95 : vector<8x1xf32> to vector<8x64xf32>
    %104 = arith.subf %87, %103 : vector<8x64xf32>
    %cst_45 = arith.constant 9.99999974E-6 : f32
    %105 = vector.broadcast %cst_45 : f32 to vector<8x1xf32>
    %106 = arith.addf %102, %105 : vector<8x1xf32>
    %107 = math.rsqrt %106 : vector<8x1xf32>
    %108 = vector.broadcast %107 : vector<8x1xf32> to vector<8x64xf32>
    %109 = arith.mulf %104, %108 : vector<8x64xf32>
    %110 = vector.broadcast %89 : vector<1x64xf32> to vector<8x64xf32>
    %111 = arith.mulf %109, %110 : vector<8x64xf32>
    %112 = vector.broadcast %91 : vector<1x64xf32> to vector<8x64xf32>
    %113 = arith.addf %111, %112 : vector<8x64xf32>
    %c0_46 = arith.constant 0 : index
    %c0_47 = arith.constant 0 : index
    %c0_48 = arith.constant 0 : index
    %114 = vector.load %arg13[%c0_46, %c0_47, %c0_48] : memref<1x64x128xf32, #tpu.memory_space<vmem>>, vector<1x64x128xf32>
    %115 = vector.shape_cast %114 : vector<1x64x128xf32> to vector<64x128xf32>
    %cst_49 = arith.constant dense<0.000000e+00> : vector<8x128xf32>
    %116 = tpu.matmul %113, %115, %cst_49 {dimension_numbers = #tpu.dot_dimension_numbers<[1], [0], [0], [1], [0, 0, 1, 1], [], []>} : vector<8x64xf32>, vector<64x128xf32>, vector<8x128xf32> -> vector<8x128xf32>
    %c0_50 = arith.constant 0 : index
    %c0_51 = arith.constant 0 : index
    %c0_52 = arith.constant 0 : index
    %117 = vector.load %arg14[%c0_50, %c0_51, %c0_52] : memref<1x1x128xf32, #tpu.memory_space<vmem>>, vector<1x1x128xf32>
    %118 = vector.shape_cast %117 : vector<1x1x128xf32> to vector<1x128xf32>
    %119 = vector.broadcast %118 : vector<1x128xf32> to vector<8x128xf32>
    %120 = arith.addf %116, %119 : vector<8x128xf32>
    %cst_53 = arith.constant 0.000000e+00 : f32
    %121 = vector.broadcast %cst_53 : f32 to vector<8x128xf32>
    %122 = arith.maximumf %120, %121 : vector<8x128xf32>
    %c0_54 = arith.constant 0 : index
    %c0_55 = arith.constant 0 : index
    %c0_56 = arith.constant 0 : index
    %123 = vector.load %arg15[%c0_54, %c0_55, %c0_56] : memref<1x128x64xf32, #tpu.memory_space<vmem>>, vector<1x128x64xf32>
    %124 = vector.shape_cast %123 : vector<1x128x64xf32> to vector<128x64xf32>
    %cst_57 = arith.constant dense<0.000000e+00> : vector<8x64xf32>
    %125 = tpu.matmul %122, %124, %cst_57 {dimension_numbers = #tpu.dot_dimension_numbers<[1], [0], [0], [1], [0, 0, 1, 1], [], []>} : vector<8x128xf32>, vector<128x64xf32>, vector<8x64xf32> -> vector<8x64xf32>
    %c0_58 = arith.constant 0 : index
    %c0_59 = arith.constant 0 : index
    %c0_60 = arith.constant 0 : index
    %126 = vector.load %arg16[%c0_58, %c0_59, %c0_60] : memref<1x1x64xf32, #tpu.memory_space<vmem>>, vector<1x1x64xf32>
    %127 = vector.shape_cast %126 : vector<1x1x64xf32> to vector<1x64xf32>
    %128 = vector.broadcast %127 : vector<1x64xf32> to vector<8x64xf32>
    %129 = arith.addf %125, %128 : vector<8x64xf32>
    %130 = arith.addf %113, %129 : vector<8x64xf32>
    %c0_61 = arith.constant 0 : index
    %c0_62 = arith.constant 0 : index
    %c0_63 = arith.constant 0 : index
    %131 = vector.load %arg19[%c0_61, %c0_62, %c0_63] : memref<1x1x64xf32, #tpu.memory_space<vmem>>, vector<1x1x64xf32>
    %132 = vector.shape_cast %131 : vector<1x1x64xf32> to vector<1x64xf32>
    %c0_64 = arith.constant 0 : index
    %c0_65 = arith.constant 0 : index
    %c0_66 = arith.constant 0 : index
    %133 = vector.load %arg20[%c0_64, %c0_65, %c0_66] : memref<1x1x64xf32, #tpu.memory_space<vmem>>, vector<1x1x64xf32>
    %134 = vector.shape_cast %133 : vector<1x1x64xf32> to vector<1x64xf32>
    %cst_67 = arith.constant dense<0.000000e+00> : vector<8xf32>
    %135 = vector.multi_reduction <add>, %130, %cst_67 [1] : vector<8x64xf32> to vector<8xf32>
    %136 = vector.shape_cast %135 : vector<8xf32> to vector<8x1xf32>
    %cst_68 = arith.constant 6.400000e+01 : f32
    %137 = vector.broadcast %cst_68 : f32 to vector<8x1xf32>
    %138 = arith.divf %136, %137 : vector<8x1xf32>
    %139 = vector.broadcast %138 : vector<8x1xf32> to vector<8x64xf32>
    %140 = arith.subf %130, %139 : vector<8x64xf32>
    %141 = arith.mulf %140, %140 : vector<8x64xf32>
    %cst_69 = arith.constant dense<0.000000e+00> : vector<8xf32>
    %142 = vector.multi_reduction <add>, %141, %cst_69 [1] : vector<8x64xf32> to vector<8xf32>
    %143 = vector.shape_cast %142 : vector<8xf32> to vector<8x1xf32>
    %cst_70 = arith.constant 6.400000e+01 : f32
    %144 = vector.broadcast %cst_70 : f32 to vector<8x1xf32>
    %145 = arith.divf %143, %144 : vector<8x1xf32>
    %146 = vector.broadcast %138 : vector<8x1xf32> to vector<8x64xf32>
    %147 = arith.subf %130, %146 : vector<8x64xf32>
    %cst_71 = arith.constant 9.99999974E-6 : f32
    %148 = vector.broadcast %cst_71 : f32 to vector<8x1xf32>
    %149 = arith.addf %145, %148 : vector<8x1xf32>
    %150 = math.rsqrt %149 : vector<8x1xf32>
    %151 = vector.broadcast %150 : vector<8x1xf32> to vector<8x64xf32>
    %152 = arith.mulf %147, %151 : vector<8x64xf32>
    %153 = vector.broadcast %132 : vector<1x64xf32> to vector<8x64xf32>
    %154 = arith.mulf %152, %153 : vector<8x64xf32>
    %155 = vector.broadcast %134 : vector<1x64xf32> to vector<8x64xf32>
    %156 = arith.addf %154, %155 : vector<8x64xf32>
    %c0_72 = arith.constant 0 : index
    %c0_73 = arith.constant 0 : index
    %157 = vector.load %arg24[%c0_72, %c0_73] : memref<8x64xf32, #tpu.memory_space<vmem>>, vector<8x64xf32>
    tpu.vector_store %arg24[%c0_72, %c0_73], %156 {strides = array<i32>} : memref<8x64xf32, #tpu.memory_space<vmem>>, vector<8x64xf32>,
    %c2_i32 = arith.constant 2 : i32
    %158 = arith.cmpi eq, %arg0, %c2_i32 : i32
    %159 = arith.extui %158 : i1 to i32
    %c0_i32_74 = arith.constant 0 : i32
    %160 = arith.cmpi ne, %159, %c0_i32_74 : i32
    scf.if %160 {
      %c0_75 = arith.constant 0 : index
      %c0_76 = arith.constant 0 : index
      %161 = vector.load %arg21[%c0_75, %c0_76] : memref<64x128xf32, #tpu.memory_space<vmem>>, vector<64x128xf32>
      %cst_77 = arith.constant dense<0.000000e+00> : vector<8x128xf32>
      %162 = tpu.matmul %156, %161, %cst_77 {dimension_numbers = #tpu.dot_dimension_numbers<[1], [0], [0], [1], [0, 0, 1, 1], [], []>} : vector<8x64xf32>, vector<64x128xf32>, vector<8x128xf32> -> vector<8x128xf32>
      %c0_78 = arith.constant 0 : index
      %c0_79 = arith.constant 0 : index
      %163 = vector.load %arg22[%c0_78, %c0_79] : memref<1x128xf32, #tpu.memory_space<vmem>>, vector<1x128xf32>
      %164 = vector.broadcast %163 : vector<1x128xf32> to vector<8x128xf32>
      %165 = arith.addf %162, %164 : vector<8x128xf32>
      %c0_80 = arith.constant 0 : index
      %c0_81 = arith.constant 0 : index
      %166 = vector.load %arg23[%c0_80, %c0_81] : memref<8x128xf32, #tpu.memory_space<vmem>>, vector<8x128xf32>
      tpu.vector_store %arg23[%c0_80, %c0_81], %165 {strides = array<i32>} : memref<8x128xf32, #tpu.memory_space<vmem>>, vector<8x128xf32>,
    } else {
    }
    return
  }
  func.func @transform_0(%arg0: i32) -> (i32, i32) {
    %c0_i32 = arith.constant 0 : i32
    %c0_i32_0 = arith.constant 0 : i32
    %c0_i32_1 = arith.constant 0 : i32
    return %c0_i32, %c0_i32_0 : i32, i32
  }
  func.func @transform_1(%arg0: i32) -> (i32, i32) {
    %c0_i32 = arith.constant 0 : i32
    %c0_i32_0 = arith.constant 0 : i32
    %c0_i32_1 = arith.constant 0 : i32
    return %c0_i32, %c0_i32_0 : i32, i32
  }
  func.func @transform_2(%arg0: i32) -> (i32, i32) {
    %c0_i32 = arith.constant 0 : i32
    %c0_i32_0 = arith.constant 0 : i32
    %c0_i32_1 = arith.constant 0 : i32
    return %c0_i32, %c0_i32_0 : i32, i32
  }
  func.func @transform_3(%arg0: i32) -> (i32, i32) {
    %c0_i32 = arith.constant 0 : i32
    %c0_i32_0 = arith.constant 0 : i32
    %c0_i32_1 = arith.constant 0 : i32
    return %c0_i32, %c0_i32_0 : i32, i32
  }
  func.func @transform_4(%arg0: i32) -> (i32, i32) {
    %c0_i32 = arith.constant 0 : i32
    %c0_i32_0 = arith.constant 0 : i32
    %c0_i32_1 = arith.constant 0 : i32
    return %c0_i32, %c0_i32_0 : i32, i32
  }
  func.func @transform_5(%arg0: i32) -> (i32, i32) {
    %c0_i32 = arith.constant 0 : i32
    %c0_i32_0 = arith.constant 0 : i32
    %c0_i32_1 = arith.constant 0 : i32
    return %c0_i32, %c0_i32_0 : i32, i32
  }
  func.func @transform_6(%arg0: i32) -> (i32, i32) {
    %c0_i32 = arith.constant 0 : i32
    %c0_i32_0 = arith.constant 0 : i32
    %c0_i32_1 = arith.constant 0 : i32
    return %c0_i32, %c0_i32_0 : i32, i32
  }
  func.func @transform_7(%arg0: i32) -> (i32, i32) {
    %c0_i32 = arith.constant 0 : i32
    %c0_i32_0 = arith.constant 0 : i32
    %c0_i32_1 = arith.constant 0 : i32
    return %c0_i32, %c0_i32_0 : i32, i32
  }
  func.func @transform_8(%arg0: i32) -> (i32, i32, i32) {
    %c0_i32 = arith.constant 0 : i32
    %c0_i32_0 = arith.constant 0 : i32
    %c0_i32_1 = arith.constant 0 : i32
    return %arg0, %c0_i32, %c0_i32_0 : i32, i32, i32
  }
  func.func @transform_9(%arg0: i32) -> (i32, i32, i32) {
    %c0_i32 = arith.constant 0 : i32
    %c0_i32_0 = arith.constant 0 : i32
    %c0_i32_1 = arith.constant 0 : i32
    return %arg0, %c0_i32, %c0_i32_0 : i32, i32, i32
  }
  func.func @transform_10(%arg0: i32) -> (i32, i32, i32) {
    %c0_i32 = arith.constant 0 : i32
    %c0_i32_0 = arith.constant 0 : i32
    %c0_i32_1 = arith.constant 0 : i32
    return %arg0, %c0_i32, %c0_i32_0 : i32, i32, i32
  }
  func.func @transform_11(%arg0: i32) -> (i32, i32, i32) {
    %c0_i32 = arith.constant 0 : i32
    %c0_i32_0 = arith.constant 0 : i32
    %c0_i32_1 = arith.constant 0 : i32
    return %arg0, %c0_i32, %c0_i32_0 : i32, i32, i32
  }
  func.func @transform_12(%arg0: i32) -> (i32, i32, i32) {
    %c0_i32 = arith.constant 0 : i32
    %c0_i32_0 = arith.constant 0 : i32
    %c0_i32_1 = arith.constant 0 : i32
    return %arg0, %c0_i32, %c0_i32_0 : i32, i32, i32
  }
  func.func @transform_13(%arg0: i32) -> (i32, i32, i32) {
    %c0_i32 = arith.constant 0 : i32
    %c0_i32_0 = arith.constant 0 : i32
    %c0_i32_1 = arith.constant 0 : i32
    return %arg0, %c0_i32, %c0_i32_0 : i32, i32, i32
  }
  func.func @transform_14(%arg0: i32) -> (i32, i32, i32) {
    %c0_i32 = arith.constant 0 : i32
    %c0_i32_0 = arith.constant 0 : i32
    %c0_i32_1 = arith.constant 0 : i32
    return %arg0, %c0_i32, %c0_i32_0 : i32, i32, i32
  }
  func.func @transform_15(%arg0: i32) -> (i32, i32, i32) {
    %c0_i32 = arith.constant 0 : i32
    %c0_i32_0 = arith.constant 0 : i32
    %c0_i32_1 = arith.constant 0 : i32
    return %arg0, %c0_i32, %c0_i32_0 : i32, i32, i32
  }
  func.func @transform_16(%arg0: i32) -> (i32, i32, i32) {
    %c0_i32 = arith.constant 0 : i32
    %c0_i32_0 = arith.constant 0 : i32
    %c0_i32_1 = arith.constant 0 : i32
    return %arg0, %c0_i32, %c0_i32_0 : i32, i32, i32
  }
  func.func @transform_17(%arg0: i32) -> (i32, i32, i32) {
    %c0_i32 = arith.constant 0 : i32
    %c0_i32_0 = arith.constant 0 : i32
    %c0_i32_1 = arith.constant 0 : i32
    return %arg0, %c0_i32, %c0_i32_0 : i32, i32, i32
  }
  func.func @transform_18(%arg0: i32) -> (i32, i32, i32) {
    %c0_i32 = arith.constant 0 : i32
    %c0_i32_0 = arith.constant 0 : i32
    %c0_i32_1 = arith.constant 0 : i32
    return %arg0, %c0_i32, %c0_i32_0 : i32, i32, i32
  }
  func.func @transform_19(%arg0: i32) -> (i32, i32, i32) {
    %c0_i32 = arith.constant 0 : i32
    %c0_i32_0 = arith.constant 0 : i32
    %c0_i32_1 = arith.constant 0 : i32
    return %arg0, %c0_i32, %c0_i32_0 : i32, i32, i32
  }
  func.func @transform_20(%arg0: i32) -> (i32, i32) {
    %c0_i32 = arith.constant 0 : i32
    %c0_i32_0 = arith.constant 0 : i32
    %c0_i32_1 = arith.constant 0 : i32
    return %c0_i32, %c0_i32_0 : i32, i32
  }
  func.func @transform_21(%arg0: i32) -> (i32, i32) {
    %c0_i32 = arith.constant 0 : i32
    %c0_i32_0 = arith.constant 0 : i32
    %c0_i32_1 = arith.constant 0 : i32
    return %c0_i32, %c0_i32_0 : i32, i32
  }
  func.func @transform_22(%arg0: i32) -> (i32, i32) {
    %c0_i32 = arith.constant 0 : i32
    %c0_i32_0 = arith.constant 0 : i32
    %c0_i32_1 = arith.constant 0 : i32
    return %c0_i32, %c0_i32_0 : i32, i32
  }
}

module attributes {stable_mosaic.version = 11 : i64} {
  func.func @_svr_transformer_kernel(%arg0: i32, %arg1: memref<8x256xbf16, #tpu.memory_space<vmem>>, %arg2: memref<8x16xf32, #tpu.memory_space<vmem>>, %arg3: memref<8x16xf32, #tpu.memory_space<vmem>>, %arg4: memref<16x256xbf16, #tpu.memory_space<vmem>>, %arg5: memref<256x64xbf16, #tpu.memory_space<vmem>>, %arg6: memref<256x64xbf16, #tpu.memory_space<vmem>>, %arg7: memref<1x64xf32, #tpu.memory_space<vmem>>, %arg8: memref<16x64xf32, #tpu.memory_space<vmem>>, %arg9: memref<1x64x192xf32, #tpu.memory_space<vmem>>, %arg10: memref<1x1x192xf32, #tpu.memory_space<vmem>>, %arg11: memref<1x64x64xf32, #tpu.memory_space<vmem>>, %arg12: memref<1x1x64xf32, #tpu.memory_space<vmem>>, %arg13: memref<1x64x128xf32, #tpu.memory_space<vmem>>, %arg14: memref<1x1x128xf32, #tpu.memory_space<vmem>>, %arg15: memref<1x128x64xf32, #tpu.memory_space<vmem>>, %arg16: memref<1x1x64xf32, #tpu.memory_space<vmem>>, %arg17: memref<1x1x64xf32, #tpu.memory_space<vmem>>, %arg18: memref<1x1x64xf32, #tpu.memory_space<vmem>>, %arg19: memref<1x1x64xf32, #tpu.memory_space<vmem>>, %arg20: memref<1x1x64xf32, #tpu.memory_space<vmem>>, %arg21: memref<64x128xf32, #tpu.memory_space<vmem>>, %arg22: memref<1x128xf32, #tpu.memory_space<vmem>>, %arg23: memref<8x128xf32, #tpu.memory_space<vmem>>, %arg24: memref<4x8x8xf32, #tpu.memory_space<vmem>>, %arg25: memref<8x64xf32, #tpu.memory_space<vmem>>) attributes {dimension_semantics = [#tpu.dimension_semantics<arbitrary>], iteration_bounds = array<i64: 3>, scalar_prefetch = 0 : i64, scratch_operands = 1 : i64, tpu.core_type = #tpu.core_type<tc>, window_params = [{pipeline_mode = #tpu.pipeline_mode<synchronous>, transform_indices = @transform_0, window_bounds = array<i64: 8, 256>}, {pipeline_mode = #tpu.pipeline_mode<synchronous>, transform_indices = @transform_1, window_bounds = array<i64: 8, 16>}, {pipeline_mode = #tpu.pipeline_mode<synchronous>, transform_indices = @transform_2, window_bounds = array<i64: 8, 16>}, {pipeline_mode = #tpu.pipeline_mode<synchronous>, transform_indices = @transform_3, window_bounds = array<i64: 16, 256>}, {pipeline_mode = #tpu.pipeline_mode<synchronous>, transform_indices = @transform_4, window_bounds = array<i64: 256, 64>}, {pipeline_mode = #tpu.pipeline_mode<synchronous>, transform_indices = @transform_5, window_bounds = array<i64: 256, 64>}, {pipeline_mode = #tpu.pipeline_mode<synchronous>, transform_indices = @transform_6, window_bounds = array<i64: 1, 64>}, {pipeline_mode = #tpu.pipeline_mode<synchronous>, transform_indices = @transform_7, window_bounds = array<i64: 16, 64>}, {transform_indices = @transform_8, window_bounds = array<i64: 1, 64, 192>}, {transform_indices = @transform_9, window_bounds = array<i64: 1, 1, 192>}, {transform_indices = @transform_10, window_bounds = array<i64: 1, 64, 64>}, {transform_indices = @transform_11, window_bounds = array<i64: 1, 1, 64>}, {transform_indices = @transform_12, window_bounds = array<i64: 1, 64, 128>}, {transform_indices = @transform_13, window_bounds = array<i64: 1, 1, 128>}, {transform_indices = @transform_14, window_bounds = array<i64: 1, 128, 64>}, {transform_indices = @transform_15, window_bounds = array<i64: 1, 1, 64>}, {transform_indices = @transform_16, window_bounds = array<i64: 1, 1, 64>}, {transform_indices = @transform_17, window_bounds = array<i64: 1, 1, 64>}, {transform_indices = @transform_18, window_bounds = array<i64: 1, 1, 64>}, {transform_indices = @transform_19, window_bounds = array<i64: 1, 1, 64>}, {pipeline_mode = #tpu.pipeline_mode<synchronous>, transform_indices = @transform_20, window_bounds = array<i64: 64, 128>}, {pipeline_mode = #tpu.pipeline_mode<synchronous>, transform_indices = @transform_21, window_bounds = array<i64: 1, 128>}, {pipeline_mode = #tpu.pipeline_mode<synchronous>, transform_indices = @transform_22, window_bounds = array<i64: 8, 128>}, {pipeline_mode = #tpu.pipeline_mode<synchronous>, transform_indices = @transform_23, window_bounds = array<i64: 4, 8, 8>}]} {
    %c0_i32 = arith.constant 0 : i32
    %0 = arith.cmpi eq, %arg0, %c0_i32 : i32
    %1 = arith.extui %0 : i1 to i32
    %c0_i32_0 = arith.constant 0 : i32
    %2 = arith.cmpi ne, %1, %c0_i32_0 : i32
    scf.if %2 {
      %c0_83 = arith.constant 0 : index
      %c0_84 = arith.constant 0 : index
      %173 = vector.load %arg1[%c0_83, %c0_84] : memref<8x256xbf16, #tpu.memory_space<vmem>>, vector<8x256xbf16>
      %174 = arith.extf %173 : vector<8x256xbf16> to vector<8x256xf32>
      %c0_85 = arith.constant 0 : index
      %c0_86 = arith.constant 0 : index
      %175 = vector.load %arg6[%c0_85, %c0_86] : memref<256x64xbf16, #tpu.memory_space<vmem>>, vector<256x64xbf16>
      %176 = arith.extf %175 : vector<256x64xbf16> to vector<256x64xf32>
      %cst_87 = arith.constant dense<0.000000e+00> : vector<8x64xf32>
      %177 = tpu.matmul %174, %176, %cst_87 {dimension_numbers = #tpu.dot_dimension_numbers<[1], [0], [0], [1], [0, 0, 1, 1], [], []>} : vector<8x256xf32>, vector<256x64xf32>, vector<8x64xf32> -> vector<8x64xf32>
      %c0_88 = arith.constant 0 : index
      %c0_89 = arith.constant 0 : index
      %178 = vector.load %arg3[%c0_88, %c0_89] : memref<8x16xf32, #tpu.memory_space<vmem>>, vector<8x16xf32>
      %c0_90 = arith.constant 0 : index
      %c0_91 = arith.constant 0 : index
      %179 = vector.load %arg4[%c0_90, %c0_91] : memref<16x256xbf16, #tpu.memory_space<vmem>>, vector<16x256xbf16>
      %180 = arith.extf %179 : vector<16x256xbf16> to vector<16x256xf32>
      %cst_92 = arith.constant dense<0.000000e+00> : vector<8x256xf32>
      %181 = tpu.matmul %178, %180, %cst_92 {dimension_numbers = #tpu.dot_dimension_numbers<[1], [0], [0], [1], [0, 0, 1, 1], [], []>} : vector<8x16xf32>, vector<16x256xf32>, vector<8x256xf32> -> vector<8x256xf32>
      %c0_93 = arith.constant 0 : index
      %c0_94 = arith.constant 0 : index
      %182 = vector.load %arg5[%c0_93, %c0_94] : memref<256x64xbf16, #tpu.memory_space<vmem>>, vector<256x64xbf16>
      %183 = arith.extf %182 : vector<256x64xbf16> to vector<256x64xf32>
      %cst_95 = arith.constant dense<0.000000e+00> : vector<8x64xf32>
      %184 = tpu.matmul %181, %183, %cst_95 {dimension_numbers = #tpu.dot_dimension_numbers<[1], [0], [0], [1], [0, 0, 1, 1], [], []>} : vector<8x256xf32>, vector<256x64xf32>, vector<8x64xf32> -> vector<8x64xf32>
      %185 = arith.addf %177, %184 : vector<8x64xf32>
      %c0_96 = arith.constant 0 : index
      %c0_97 = arith.constant 0 : index
      %186 = vector.load %arg2[%c0_96, %c0_97] : memref<8x16xf32, #tpu.memory_space<vmem>>, vector<8x16xf32>
      %c0_98 = arith.constant 0 : index
      %c0_99 = arith.constant 0 : index
      %187 = vector.load %arg8[%c0_98, %c0_99] : memref<16x64xf32, #tpu.memory_space<vmem>>, vector<16x64xf32>
      %cst_100 = arith.constant dense<0.000000e+00> : vector<8x64xf32>
      %188 = tpu.matmul %186, %187, %cst_100 {dimension_numbers = #tpu.dot_dimension_numbers<[1], [0], [0], [1], [0, 0, 1, 1], [], []>} : vector<8x16xf32>, vector<16x64xf32>, vector<8x64xf32> -> vector<8x64xf32>
      %189 = arith.addf %185, %188 : vector<8x64xf32>
      %c0_101 = arith.constant 0 : index
      %c0_102 = arith.constant 0 : index
      %190 = vector.load %arg7[%c0_101, %c0_102] : memref<1x64xf32, #tpu.memory_space<vmem>>, vector<1x64xf32>
      %191 = vector.broadcast %190 : vector<1x64xf32> to vector<8x64xf32>
      %192 = arith.addf %189, %191 : vector<8x64xf32>
      %c0_103 = arith.constant 0 : index
      %c0_104 = arith.constant 0 : index
      %193 = vector.load %arg25[%c0_103, %c0_104] : memref<8x64xf32, #tpu.memory_space<vmem>>, vector<8x64xf32>
      tpu.vector_store %arg25[%c0_103, %c0_104], %192 {strides = array<i32>} : memref<8x64xf32, #tpu.memory_space<vmem>>, vector<8x64xf32>,
    } else {
    }
    %c0 = arith.constant 0 : index
    %c0_1 = arith.constant 0 : index
    %3 = vector.load %arg25[%c0, %c0_1] : memref<8x64xf32, #tpu.memory_space<vmem>>, vector<8x64xf32>
    %c0_2 = arith.constant 0 : index
    %c0_3 = arith.constant 0 : index
    %c0_4 = arith.constant 0 : index
    %4 = vector.load %arg9[%c0_2, %c0_3, %c0_4] : memref<1x64x192xf32, #tpu.memory_space<vmem>>, vector<1x64x192xf32>
    %5 = vector.shape_cast %4 : vector<1x64x192xf32> to vector<64x192xf32>
    %cst = arith.constant dense<0.000000e+00> : vector<8x192xf32>
    %6 = tpu.matmul %3, %5, %cst {dimension_numbers = #tpu.dot_dimension_numbers<[1], [0], [0], [1], [0, 0, 1, 1], [], []>} : vector<8x64xf32>, vector<64x192xf32>, vector<8x192xf32> -> vector<8x192xf32>
    %c0_5 = arith.constant 0 : index
    %c0_6 = arith.constant 0 : index
    %c0_7 = arith.constant 0 : index
    %7 = vector.load %arg10[%c0_5, %c0_6, %c0_7] : memref<1x1x192xf32, #tpu.memory_space<vmem>>, vector<1x1x192xf32>
    %8 = vector.shape_cast %7 : vector<1x1x192xf32> to vector<1x192xf32>
    %9 = vector.broadcast %8 : vector<1x192xf32> to vector<8x192xf32>
    %10 = arith.addf %6, %9 : vector<8x192xf32>
    %11 = vector.extract_strided_slice %10 {offsets = [0, 0], sizes = [8, 16], strides = [1, 1]} : vector<8x192xf32> to vector<8x16xf32>
    %12 = vector.extract_strided_slice %10 {offsets = [0, 64], sizes = [8, 16], strides = [1, 1]} : vector<8x192xf32> to vector<8x16xf32>
    %13 = vector.extract_strided_slice %10 {offsets = [0, 128], sizes = [8, 16], strides = [1, 1]} : vector<8x192xf32> to vector<8x16xf32>
    %cst_8 = arith.constant dense<0.000000e+00> : vector<8x8xf32>
    %14 = tpu.matmul %11, %12, %cst_8 {dimension_numbers = #tpu.dot_dimension_numbers<[1], [1], [0], [0], [0, 0, 1, 0], [], []>} : vector<8x16xf32>, vector<8x16xf32>, vector<8x8xf32> -> vector<8x8xf32>
    %cst_9 = arith.constant 2.500000e-01 : f32
    %15 = vector.broadcast %cst_9 : f32 to vector<8x8xf32>
    %16 = arith.mulf %14, %15 : vector<8x8xf32>
    %cst_10 = arith.constant dense<0xFF800000> : vector<8xf32>
    %17 = vector.multi_reduction <maximumf>, %16, %cst_10 [1] : vector<8x8xf32> to vector<8xf32>
    %18 = vector.shape_cast %17 : vector<8xf32> to vector<8x1xf32>
    %19 = vector.broadcast %18 : vector<8x1xf32> to vector<8x8xf32>
    %20 = arith.subf %16, %19 : vector<8x8xf32>
    %21 = math.exp %20 : vector<8x8xf32>
    %cst_11 = arith.constant dense<0.000000e+00> : vector<8xf32>
    %22 = vector.multi_reduction <add>, %21, %cst_11 [1] : vector<8x8xf32> to vector<8xf32>
    %23 = vector.shape_cast %22 : vector<8xf32> to vector<8x1xf32>
    %24 = tpu.reciprocal %23 {approx = true} : vector<8x1xf32> -> vector<8x1xf32>
    %25 = vector.broadcast %24 : vector<8x1xf32> to vector<8x8xf32>
    %26 = arith.mulf %21, %25 : vector<8x8xf32>
    %c2_i32 = arith.constant 2 : i32
    %27 = arith.cmpi eq, %arg0, %c2_i32 : i32
    %28 = arith.extui %27 : i1 to i32
    %c0_i32_12 = arith.constant 0 : i32
    %29 = arith.cmpi ne, %28, %c0_i32_12 : i32
    scf.if %29 {
      %c0_83 = arith.constant 0 : index
      %c0_84 = arith.constant 0 : index
      %c0_85 = arith.constant 0 : index
      %173 = vector.load %arg24[%c0_83, %c0_84, %c0_85] : memref<4x8x8xf32, #tpu.memory_space<vmem>>, vector<1x8x8xf32>
      %174 = vector.shape_cast %173 : vector<1x8x8xf32> to vector<8x8xf32>
      %175 = vector.shape_cast %26 : vector<8x8xf32> to vector<1x8x8xf32>
      tpu.vector_store %arg24[%c0_83, %c0_84, %c0_85], %175 {strides = array<i32>} : memref<4x8x8xf32, #tpu.memory_space<vmem>>, vector<1x8x8xf32>,
    } else {
    }
    %cst_13 = arith.constant dense<0.000000e+00> : vector<8x16xf32>
    %30 = tpu.matmul %26, %13, %cst_13 {dimension_numbers = #tpu.dot_dimension_numbers<[1], [0], [0], [1], [0, 0, 1, 1], [], []>} : vector<8x8xf32>, vector<8x16xf32>, vector<8x16xf32> -> vector<8x16xf32>
    %31 = vector.extract_strided_slice %10 {offsets = [0, 16], sizes = [8, 16], strides = [1, 1]} : vector<8x192xf32> to vector<8x16xf32>
    %32 = vector.extract_strided_slice %10 {offsets = [0, 80], sizes = [8, 16], strides = [1, 1]} : vector<8x192xf32> to vector<8x16xf32>
    %33 = vector.extract_strided_slice %10 {offsets = [0, 144], sizes = [8, 16], strides = [1, 1]} : vector<8x192xf32> to vector<8x16xf32>
    %cst_14 = arith.constant dense<0.000000e+00> : vector<8x8xf32>
    %34 = tpu.matmul %31, %32, %cst_14 {dimension_numbers = #tpu.dot_dimension_numbers<[1], [1], [0], [0], [0, 0, 1, 0], [], []>} : vector<8x16xf32>, vector<8x16xf32>, vector<8x8xf32> -> vector<8x8xf32>
    %cst_15 = arith.constant 2.500000e-01 : f32
    %35 = vector.broadcast %cst_15 : f32 to vector<8x8xf32>
    %36 = arith.mulf %34, %35 : vector<8x8xf32>
    %cst_16 = arith.constant dense<0xFF800000> : vector<8xf32>
    %37 = vector.multi_reduction <maximumf>, %36, %cst_16 [1] : vector<8x8xf32> to vector<8xf32>
    %38 = vector.shape_cast %37 : vector<8xf32> to vector<8x1xf32>
    %39 = vector.broadcast %38 : vector<8x1xf32> to vector<8x8xf32>
    %40 = arith.subf %36, %39 : vector<8x8xf32>
    %41 = math.exp %40 : vector<8x8xf32>
    %cst_17 = arith.constant dense<0.000000e+00> : vector<8xf32>
    %42 = vector.multi_reduction <add>, %41, %cst_17 [1] : vector<8x8xf32> to vector<8xf32>
    %43 = vector.shape_cast %42 : vector<8xf32> to vector<8x1xf32>
    %44 = tpu.reciprocal %43 {approx = true} : vector<8x1xf32> -> vector<8x1xf32>
    %45 = vector.broadcast %44 : vector<8x1xf32> to vector<8x8xf32>
    %46 = arith.mulf %41, %45 : vector<8x8xf32>
    %c2_i32_18 = arith.constant 2 : i32
    %47 = arith.cmpi eq, %arg0, %c2_i32_18 : i32
    %48 = arith.extui %47 : i1 to i32
    %c0_i32_19 = arith.constant 0 : i32
    %49 = arith.cmpi ne, %48, %c0_i32_19 : i32
    scf.if %49 {
      %c1 = arith.constant 1 : index
      %c0_83 = arith.constant 0 : index
      %c0_84 = arith.constant 0 : index
      %173 = vector.load %arg24[%c1, %c0_83, %c0_84] : memref<4x8x8xf32, #tpu.memory_space<vmem>>, vector<1x8x8xf32>
      %174 = vector.shape_cast %173 : vector<1x8x8xf32> to vector<8x8xf32>
      %175 = vector.shape_cast %46 : vector<8x8xf32> to vector<1x8x8xf32>
      tpu.vector_store %arg24[%c1, %c0_83, %c0_84], %175 {strides = array<i32>} : memref<4x8x8xf32, #tpu.memory_space<vmem>>, vector<1x8x8xf32>,
    } else {
    }
    %cst_20 = arith.constant dense<0.000000e+00> : vector<8x16xf32>
    %50 = tpu.matmul %46, %33, %cst_20 {dimension_numbers = #tpu.dot_dimension_numbers<[1], [0], [0], [1], [0, 0, 1, 1], [], []>} : vector<8x8xf32>, vector<8x16xf32>, vector<8x16xf32> -> vector<8x16xf32>
    %51 = vector.extract_strided_slice %10 {offsets = [0, 32], sizes = [8, 16], strides = [1, 1]} : vector<8x192xf32> to vector<8x16xf32>
    %52 = vector.extract_strided_slice %10 {offsets = [0, 96], sizes = [8, 16], strides = [1, 1]} : vector<8x192xf32> to vector<8x16xf32>
    %53 = vector.extract_strided_slice %10 {offsets = [0, 160], sizes = [8, 16], strides = [1, 1]} : vector<8x192xf32> to vector<8x16xf32>
    %cst_21 = arith.constant dense<0.000000e+00> : vector<8x8xf32>
    %54 = tpu.matmul %51, %52, %cst_21 {dimension_numbers = #tpu.dot_dimension_numbers<[1], [1], [0], [0], [0, 0, 1, 0], [], []>} : vector<8x16xf32>, vector<8x16xf32>, vector<8x8xf32> -> vector<8x8xf32>
    %cst_22 = arith.constant 2.500000e-01 : f32
    %55 = vector.broadcast %cst_22 : f32 to vector<8x8xf32>
    %56 = arith.mulf %54, %55 : vector<8x8xf32>
    %cst_23 = arith.constant dense<0xFF800000> : vector<8xf32>
    %57 = vector.multi_reduction <maximumf>, %56, %cst_23 [1] : vector<8x8xf32> to vector<8xf32>
    %58 = vector.shape_cast %57 : vector<8xf32> to vector<8x1xf32>
    %59 = vector.broadcast %58 : vector<8x1xf32> to vector<8x8xf32>
    %60 = arith.subf %56, %59 : vector<8x8xf32>
    %61 = math.exp %60 : vector<8x8xf32>
    %cst_24 = arith.constant dense<0.000000e+00> : vector<8xf32>
    %62 = vector.multi_reduction <add>, %61, %cst_24 [1] : vector<8x8xf32> to vector<8xf32>
    %63 = vector.shape_cast %62 : vector<8xf32> to vector<8x1xf32>
    %64 = tpu.reciprocal %63 {approx = true} : vector<8x1xf32> -> vector<8x1xf32>
    %65 = vector.broadcast %64 : vector<8x1xf32> to vector<8x8xf32>
    %66 = arith.mulf %61, %65 : vector<8x8xf32>
    %c2_i32_25 = arith.constant 2 : i32
    %67 = arith.cmpi eq, %arg0, %c2_i32_25 : i32
    %68 = arith.extui %67 : i1 to i32
    %c0_i32_26 = arith.constant 0 : i32
    %69 = arith.cmpi ne, %68, %c0_i32_26 : i32
    scf.if %69 {
      %c2 = arith.constant 2 : index
      %c0_83 = arith.constant 0 : index
      %c0_84 = arith.constant 0 : index
      %173 = vector.load %arg24[%c2, %c0_83, %c0_84] : memref<4x8x8xf32, #tpu.memory_space<vmem>>, vector<1x8x8xf32>
      %174 = vector.shape_cast %173 : vector<1x8x8xf32> to vector<8x8xf32>
      %175 = vector.shape_cast %66 : vector<8x8xf32> to vector<1x8x8xf32>
      tpu.vector_store %arg24[%c2, %c0_83, %c0_84], %175 {strides = array<i32>} : memref<4x8x8xf32, #tpu.memory_space<vmem>>, vector<1x8x8xf32>,
    } else {
    }
    %cst_27 = arith.constant dense<0.000000e+00> : vector<8x16xf32>
    %70 = tpu.matmul %66, %53, %cst_27 {dimension_numbers = #tpu.dot_dimension_numbers<[1], [0], [0], [1], [0, 0, 1, 1], [], []>} : vector<8x8xf32>, vector<8x16xf32>, vector<8x16xf32> -> vector<8x16xf32>
    %71 = vector.extract_strided_slice %10 {offsets = [0, 48], sizes = [8, 16], strides = [1, 1]} : vector<8x192xf32> to vector<8x16xf32>
    %72 = vector.extract_strided_slice %10 {offsets = [0, 112], sizes = [8, 16], strides = [1, 1]} : vector<8x192xf32> to vector<8x16xf32>
    %73 = vector.extract_strided_slice %10 {offsets = [0, 176], sizes = [8, 16], strides = [1, 1]} : vector<8x192xf32> to vector<8x16xf32>
    %cst_28 = arith.constant dense<0.000000e+00> : vector<8x8xf32>
    %74 = tpu.matmul %71, %72, %cst_28 {dimension_numbers = #tpu.dot_dimension_numbers<[1], [1], [0], [0], [0, 0, 1, 0], [], []>} : vector<8x16xf32>, vector<8x16xf32>, vector<8x8xf32> -> vector<8x8xf32>
    %cst_29 = arith.constant 2.500000e-01 : f32
    %75 = vector.broadcast %cst_29 : f32 to vector<8x8xf32>
    %76 = arith.mulf %74, %75 : vector<8x8xf32>
    %cst_30 = arith.constant dense<0xFF800000> : vector<8xf32>
    %77 = vector.multi_reduction <maximumf>, %76, %cst_30 [1] : vector<8x8xf32> to vector<8xf32>
    %78 = vector.shape_cast %77 : vector<8xf32> to vector<8x1xf32>
    %79 = vector.broadcast %78 : vector<8x1xf32> to vector<8x8xf32>
    %80 = arith.subf %76, %79 : vector<8x8xf32>
    %81 = math.exp %80 : vector<8x8xf32>
    %cst_31 = arith.constant dense<0.000000e+00> : vector<8xf32>
    %82 = vector.multi_reduction <add>, %81, %cst_31 [1] : vector<8x8xf32> to vector<8xf32>
    %83 = vector.shape_cast %82 : vector<8xf32> to vector<8x1xf32>
    %84 = tpu.reciprocal %83 {approx = true} : vector<8x1xf32> -> vector<8x1xf32>
    %85 = vector.broadcast %84 : vector<8x1xf32> to vector<8x8xf32>
    %86 = arith.mulf %81, %85 : vector<8x8xf32>
    %c2_i32_32 = arith.constant 2 : i32
    %87 = arith.cmpi eq, %arg0, %c2_i32_32 : i32
    %88 = arith.extui %87 : i1 to i32
    %c0_i32_33 = arith.constant 0 : i32
    %89 = arith.cmpi ne, %88, %c0_i32_33 : i32
    scf.if %89 {
      %c3 = arith.constant 3 : index
      %c0_83 = arith.constant 0 : index
      %c0_84 = arith.constant 0 : index
      %173 = vector.load %arg24[%c3, %c0_83, %c0_84] : memref<4x8x8xf32, #tpu.memory_space<vmem>>, vector<1x8x8xf32>
      %174 = vector.shape_cast %173 : vector<1x8x8xf32> to vector<8x8xf32>
      %175 = vector.shape_cast %86 : vector<8x8xf32> to vector<1x8x8xf32>
      tpu.vector_store %arg24[%c3, %c0_83, %c0_84], %175 {strides = array<i32>} : memref<4x8x8xf32, #tpu.memory_space<vmem>>, vector<1x8x8xf32>,
    } else {
    }
    %cst_34 = arith.constant dense<0.000000e+00> : vector<8x16xf32>
    %90 = tpu.matmul %86, %73, %cst_34 {dimension_numbers = #tpu.dot_dimension_numbers<[1], [0], [0], [1], [0, 0, 1, 1], [], []>} : vector<8x8xf32>, vector<8x16xf32>, vector<8x16xf32> -> vector<8x16xf32>
    %91 = tpu.concatenate %30, %50, %70, %90 in 1 : vector<8x16xf32>, vector<8x16xf32>, vector<8x16xf32>, vector<8x16xf32> -> vector<8x64xf32>
    %c0_35 = arith.constant 0 : index
    %c0_36 = arith.constant 0 : index
    %c0_37 = arith.constant 0 : index
    %92 = vector.load %arg11[%c0_35, %c0_36, %c0_37] : memref<1x64x64xf32, #tpu.memory_space<vmem>>, vector<1x64x64xf32>
    %93 = vector.shape_cast %92 : vector<1x64x64xf32> to vector<64x64xf32>
    %cst_38 = arith.constant dense<0.000000e+00> : vector<8x64xf32>
    %94 = tpu.matmul %91, %93, %cst_38 {dimension_numbers = #tpu.dot_dimension_numbers<[1], [0], [0], [1], [0, 0, 1, 1], [], []>} : vector<8x64xf32>, vector<64x64xf32>, vector<8x64xf32> -> vector<8x64xf32>
    %c0_39 = arith.constant 0 : index
    %c0_40 = arith.constant 0 : index
    %c0_41 = arith.constant 0 : index
    %95 = vector.load %arg12[%c0_39, %c0_40, %c0_41] : memref<1x1x64xf32, #tpu.memory_space<vmem>>, vector<1x1x64xf32>
    %96 = vector.shape_cast %95 : vector<1x1x64xf32> to vector<1x64xf32>
    %97 = vector.broadcast %96 : vector<1x64xf32> to vector<8x64xf32>
    %98 = arith.addf %94, %97 : vector<8x64xf32>
    %99 = arith.addf %3, %98 : vector<8x64xf32>
    %c0_42 = arith.constant 0 : index
    %c0_43 = arith.constant 0 : index
    %c0_44 = arith.constant 0 : index
    %100 = vector.load %arg17[%c0_42, %c0_43, %c0_44] : memref<1x1x64xf32, #tpu.memory_space<vmem>>, vector<1x1x64xf32>
    %101 = vector.shape_cast %100 : vector<1x1x64xf32> to vector<1x64xf32>
    %c0_45 = arith.constant 0 : index
    %c0_46 = arith.constant 0 : index
    %c0_47 = arith.constant 0 : index
    %102 = vector.load %arg18[%c0_45, %c0_46, %c0_47] : memref<1x1x64xf32, #tpu.memory_space<vmem>>, vector<1x1x64xf32>
    %103 = vector.shape_cast %102 : vector<1x1x64xf32> to vector<1x64xf32>
    %cst_48 = arith.constant dense<0.000000e+00> : vector<8xf32>
    %104 = vector.multi_reduction <add>, %99, %cst_48 [1] : vector<8x64xf32> to vector<8xf32>
    %105 = vector.shape_cast %104 : vector<8xf32> to vector<8x1xf32>
    %cst_49 = arith.constant 6.400000e+01 : f32
    %106 = vector.broadcast %cst_49 : f32 to vector<8x1xf32>
    %107 = arith.divf %105, %106 : vector<8x1xf32>
    %108 = vector.broadcast %107 : vector<8x1xf32> to vector<8x64xf32>
    %109 = arith.subf %99, %108 : vector<8x64xf32>
    %110 = arith.mulf %109, %109 : vector<8x64xf32>
    %cst_50 = arith.constant dense<0.000000e+00> : vector<8xf32>
    %111 = vector.multi_reduction <add>, %110, %cst_50 [1] : vector<8x64xf32> to vector<8xf32>
    %112 = vector.shape_cast %111 : vector<8xf32> to vector<8x1xf32>
    %cst_51 = arith.constant 6.400000e+01 : f32
    %113 = vector.broadcast %cst_51 : f32 to vector<8x1xf32>
    %114 = arith.divf %112, %113 : vector<8x1xf32>
    %115 = vector.broadcast %107 : vector<8x1xf32> to vector<8x64xf32>
    %116 = arith.subf %99, %115 : vector<8x64xf32>
    %cst_52 = arith.constant 9.99999974E-6 : f32
    %117 = vector.broadcast %cst_52 : f32 to vector<8x1xf32>
    %118 = arith.addf %114, %117 : vector<8x1xf32>
    %119 = math.rsqrt %118 : vector<8x1xf32>
    %120 = vector.broadcast %119 : vector<8x1xf32> to vector<8x64xf32>
    %121 = arith.mulf %116, %120 : vector<8x64xf32>
    %122 = vector.broadcast %101 : vector<1x64xf32> to vector<8x64xf32>
    %123 = arith.mulf %121, %122 : vector<8x64xf32>
    %124 = vector.broadcast %103 : vector<1x64xf32> to vector<8x64xf32>
    %125 = arith.addf %123, %124 : vector<8x64xf32>
    %c0_53 = arith.constant 0 : index
    %c0_54 = arith.constant 0 : index
    %c0_55 = arith.constant 0 : index
    %126 = vector.load %arg13[%c0_53, %c0_54, %c0_55] : memref<1x64x128xf32, #tpu.memory_space<vmem>>, vector<1x64x128xf32>
    %127 = vector.shape_cast %126 : vector<1x64x128xf32> to vector<64x128xf32>
    %cst_56 = arith.constant dense<0.000000e+00> : vector<8x128xf32>
    %128 = tpu.matmul %125, %127, %cst_56 {dimension_numbers = #tpu.dot_dimension_numbers<[1], [0], [0], [1], [0, 0, 1, 1], [], []>} : vector<8x64xf32>, vector<64x128xf32>, vector<8x128xf32> -> vector<8x128xf32>
    %c0_57 = arith.constant 0 : index
    %c0_58 = arith.constant 0 : index
    %c0_59 = arith.constant 0 : index
    %129 = vector.load %arg14[%c0_57, %c0_58, %c0_59] : memref<1x1x128xf32, #tpu.memory_space<vmem>>, vector<1x1x128xf32>
    %130 = vector.shape_cast %129 : vector<1x1x128xf32> to vector<1x128xf32>
    %131 = vector.broadcast %130 : vector<1x128xf32> to vector<8x128xf32>
    %132 = arith.addf %128, %131 : vector<8x128xf32>
    %cst_60 = arith.constant 0.000000e+00 : f32
    %133 = vector.broadcast %cst_60 : f32 to vector<8x128xf32>
    %134 = arith.maximumf %132, %133 : vector<8x128xf32>
    %c0_61 = arith.constant 0 : index
    %c0_62 = arith.constant 0 : index
    %c0_63 = arith.constant 0 : index
    %135 = vector.load %arg15[%c0_61, %c0_62, %c0_63] : memref<1x128x64xf32, #tpu.memory_space<vmem>>, vector<1x128x64xf32>
    %136 = vector.shape_cast %135 : vector<1x128x64xf32> to vector<128x64xf32>
    %cst_64 = arith.constant dense<0.000000e+00> : vector<8x64xf32>
    %137 = tpu.matmul %134, %136, %cst_64 {dimension_numbers = #tpu.dot_dimension_numbers<[1], [0], [0], [1], [0, 0, 1, 1], [], []>} : vector<8x128xf32>, vector<128x64xf32>, vector<8x64xf32> -> vector<8x64xf32>
    %c0_65 = arith.constant 0 : index
    %c0_66 = arith.constant 0 : index
    %c0_67 = arith.constant 0 : index
    %138 = vector.load %arg16[%c0_65, %c0_66, %c0_67] : memref<1x1x64xf32, #tpu.memory_space<vmem>>, vector<1x1x64xf32>
    %139 = vector.shape_cast %138 : vector<1x1x64xf32> to vector<1x64xf32>
    %140 = vector.broadcast %139 : vector<1x64xf32> to vector<8x64xf32>
    %141 = arith.addf %137, %140 : vector<8x64xf32>
    %142 = arith.addf %125, %141 : vector<8x64xf32>
    %c0_68 = arith.constant 0 : index
    %c0_69 = arith.constant 0 : index
    %c0_70 = arith.constant 0 : index
    %143 = vector.load %arg19[%c0_68, %c0_69, %c0_70] : memref<1x1x64xf32, #tpu.memory_space<vmem>>, vector<1x1x64xf32>
    %144 = vector.shape_cast %143 : vector<1x1x64xf32> to vector<1x64xf32>
    %c0_71 = arith.constant 0 : index
    %c0_72 = arith.constant 0 : index
    %c0_73 = arith.constant 0 : index
    %145 = vector.load %arg20[%c0_71, %c0_72, %c0_73] : memref<1x1x64xf32, #tpu.memory_space<vmem>>, vector<1x1x64xf32>
    %146 = vector.shape_cast %145 : vector<1x1x64xf32> to vector<1x64xf32>
    %cst_74 = arith.constant dense<0.000000e+00> : vector<8xf32>
    %147 = vector.multi_reduction <add>, %142, %cst_74 [1] : vector<8x64xf32> to vector<8xf32>
    %148 = vector.shape_cast %147 : vector<8xf32> to vector<8x1xf32>
    %cst_75 = arith.constant 6.400000e+01 : f32
    %149 = vector.broadcast %cst_75 : f32 to vector<8x1xf32>
    %150 = arith.divf %148, %149 : vector<8x1xf32>
    %151 = vector.broadcast %150 : vector<8x1xf32> to vector<8x64xf32>
    %152 = arith.subf %142, %151 : vector<8x64xf32>
    %153 = arith.mulf %152, %152 : vector<8x64xf32>
    %cst_76 = arith.constant dense<0.000000e+00> : vector<8xf32>
    %154 = vector.multi_reduction <add>, %153, %cst_76 [1] : vector<8x64xf32> to vector<8xf32>
    %155 = vector.shape_cast %154 : vector<8xf32> to vector<8x1xf32>
    %cst_77 = arith.constant 6.400000e+01 : f32
    %156 = vector.broadcast %cst_77 : f32 to vector<8x1xf32>
    %157 = arith.divf %155, %156 : vector<8x1xf32>
    %158 = vector.broadcast %150 : vector<8x1xf32> to vector<8x64xf32>
    %159 = arith.subf %142, %158 : vector<8x64xf32>
    %cst_78 = arith.constant 9.99999974E-6 : f32
    %160 = vector.broadcast %cst_78 : f32 to vector<8x1xf32>
    %161 = arith.addf %157, %160 : vector<8x1xf32>
    %162 = math.rsqrt %161 : vector<8x1xf32>
    %163 = vector.broadcast %162 : vector<8x1xf32> to vector<8x64xf32>
    %164 = arith.mulf %159, %163 : vector<8x64xf32>
    %165 = vector.broadcast %144 : vector<1x64xf32> to vector<8x64xf32>
    %166 = arith.mulf %164, %165 : vector<8x64xf32>
    %167 = vector.broadcast %146 : vector<1x64xf32> to vector<8x64xf32>
    %168 = arith.addf %166, %167 : vector<8x64xf32>
    %c0_79 = arith.constant 0 : index
    %c0_80 = arith.constant 0 : index
    %169 = vector.load %arg25[%c0_79, %c0_80] : memref<8x64xf32, #tpu.memory_space<vmem>>, vector<8x64xf32>
    tpu.vector_store %arg25[%c0_79, %c0_80], %168 {strides = array<i32>} : memref<8x64xf32, #tpu.memory_space<vmem>>, vector<8x64xf32>,
    %c2_i32_81 = arith.constant 2 : i32
    %170 = arith.cmpi eq, %arg0, %c2_i32_81 : i32
    %171 = arith.extui %170 : i1 to i32
    %c0_i32_82 = arith.constant 0 : i32
    %172 = arith.cmpi ne, %171, %c0_i32_82 : i32
    scf.if %172 {
      %c0_83 = arith.constant 0 : index
      %c0_84 = arith.constant 0 : index
      %173 = vector.load %arg21[%c0_83, %c0_84] : memref<64x128xf32, #tpu.memory_space<vmem>>, vector<64x128xf32>
      %cst_85 = arith.constant dense<0.000000e+00> : vector<8x128xf32>
      %174 = tpu.matmul %168, %173, %cst_85 {dimension_numbers = #tpu.dot_dimension_numbers<[1], [0], [0], [1], [0, 0, 1, 1], [], []>} : vector<8x64xf32>, vector<64x128xf32>, vector<8x128xf32> -> vector<8x128xf32>
      %c0_86 = arith.constant 0 : index
      %c0_87 = arith.constant 0 : index
      %175 = vector.load %arg22[%c0_86, %c0_87] : memref<1x128xf32, #tpu.memory_space<vmem>>, vector<1x128xf32>
      %176 = vector.broadcast %175 : vector<1x128xf32> to vector<8x128xf32>
      %177 = arith.addf %174, %176 : vector<8x128xf32>
      %c0_88 = arith.constant 0 : index
      %c0_89 = arith.constant 0 : index
      %178 = vector.load %arg23[%c0_88, %c0_89] : memref<8x128xf32, #tpu.memory_space<vmem>>, vector<8x128xf32>
      tpu.vector_store %arg23[%c0_88, %c0_89], %177 {strides = array<i32>} : memref<8x128xf32, #tpu.memory_space<vmem>>, vector<8x128xf32>,
    } else {
    }
    return
  }
  func.func @transform_0(%arg0: i32) -> (i32, i32) {
    %c0_i32 = arith.constant 0 : i32
    %c0_i32_0 = arith.constant 0 : i32
    %c0_i32_1 = arith.constant 0 : i32
    return %c0_i32, %c0_i32_0 : i32, i32
  }
  func.func @transform_1(%arg0: i32) -> (i32, i32) {
    %c0_i32 = arith.constant 0 : i32
    %c0_i32_0 = arith.constant 0 : i32
    %c0_i32_1 = arith.constant 0 : i32
    return %c0_i32, %c0_i32_0 : i32, i32
  }
  func.func @transform_2(%arg0: i32) -> (i32, i32) {
    %c0_i32 = arith.constant 0 : i32
    %c0_i32_0 = arith.constant 0 : i32
    %c0_i32_1 = arith.constant 0 : i32
    return %c0_i32, %c0_i32_0 : i32, i32
  }
  func.func @transform_3(%arg0: i32) -> (i32, i32) {
    %c0_i32 = arith.constant 0 : i32
    %c0_i32_0 = arith.constant 0 : i32
    %c0_i32_1 = arith.constant 0 : i32
    return %c0_i32, %c0_i32_0 : i32, i32
  }
  func.func @transform_4(%arg0: i32) -> (i32, i32) {
    %c0_i32 = arith.constant 0 : i32
    %c0_i32_0 = arith.constant 0 : i32
    %c0_i32_1 = arith.constant 0 : i32
    return %c0_i32, %c0_i32_0 : i32, i32
  }
  func.func @transform_5(%arg0: i32) -> (i32, i32) {
    %c0_i32 = arith.constant 0 : i32
    %c0_i32_0 = arith.constant 0 : i32
    %c0_i32_1 = arith.constant 0 : i32
    return %c0_i32, %c0_i32_0 : i32, i32
  }
  func.func @transform_6(%arg0: i32) -> (i32, i32) {
    %c0_i32 = arith.constant 0 : i32
    %c0_i32_0 = arith.constant 0 : i32
    %c0_i32_1 = arith.constant 0 : i32
    return %c0_i32, %c0_i32_0 : i32, i32
  }
  func.func @transform_7(%arg0: i32) -> (i32, i32) {
    %c0_i32 = arith.constant 0 : i32
    %c0_i32_0 = arith.constant 0 : i32
    %c0_i32_1 = arith.constant 0 : i32
    return %c0_i32, %c0_i32_0 : i32, i32
  }
  func.func @transform_8(%arg0: i32) -> (i32, i32, i32) {
    %c0_i32 = arith.constant 0 : i32
    %c0_i32_0 = arith.constant 0 : i32
    %c0_i32_1 = arith.constant 0 : i32
    return %arg0, %c0_i32, %c0_i32_0 : i32, i32, i32
  }
  func.func @transform_9(%arg0: i32) -> (i32, i32, i32) {
    %c0_i32 = arith.constant 0 : i32
    %c0_i32_0 = arith.constant 0 : i32
    %c0_i32_1 = arith.constant 0 : i32
    return %arg0, %c0_i32, %c0_i32_0 : i32, i32, i32
  }
  func.func @transform_10(%arg0: i32) -> (i32, i32, i32) {
    %c0_i32 = arith.constant 0 : i32
    %c0_i32_0 = arith.constant 0 : i32
    %c0_i32_1 = arith.constant 0 : i32
    return %arg0, %c0_i32, %c0_i32_0 : i32, i32, i32
  }
  func.func @transform_11(%arg0: i32) -> (i32, i32, i32) {
    %c0_i32 = arith.constant 0 : i32
    %c0_i32_0 = arith.constant 0 : i32
    %c0_i32_1 = arith.constant 0 : i32
    return %arg0, %c0_i32, %c0_i32_0 : i32, i32, i32
  }
  func.func @transform_12(%arg0: i32) -> (i32, i32, i32) {
    %c0_i32 = arith.constant 0 : i32
    %c0_i32_0 = arith.constant 0 : i32
    %c0_i32_1 = arith.constant 0 : i32
    return %arg0, %c0_i32, %c0_i32_0 : i32, i32, i32
  }
  func.func @transform_13(%arg0: i32) -> (i32, i32, i32) {
    %c0_i32 = arith.constant 0 : i32
    %c0_i32_0 = arith.constant 0 : i32
    %c0_i32_1 = arith.constant 0 : i32
    return %arg0, %c0_i32, %c0_i32_0 : i32, i32, i32
  }
  func.func @transform_14(%arg0: i32) -> (i32, i32, i32) {
    %c0_i32 = arith.constant 0 : i32
    %c0_i32_0 = arith.constant 0 : i32
    %c0_i32_1 = arith.constant 0 : i32
    return %arg0, %c0_i32, %c0_i32_0 : i32, i32, i32
  }
  func.func @transform_15(%arg0: i32) -> (i32, i32, i32) {
    %c0_i32 = arith.constant 0 : i32
    %c0_i32_0 = arith.constant 0 : i32
    %c0_i32_1 = arith.constant 0 : i32
    return %arg0, %c0_i32, %c0_i32_0 : i32, i32, i32
  }
  func.func @transform_16(%arg0: i32) -> (i32, i32, i32) {
    %c0_i32 = arith.constant 0 : i32
    %c0_i32_0 = arith.constant 0 : i32
    %c0_i32_1 = arith.constant 0 : i32
    return %arg0, %c0_i32, %c0_i32_0 : i32, i32, i32
  }
  func.func @transform_17(%arg0: i32) -> (i32, i32, i32) {
    %c0_i32 = arith.constant 0 : i32
    %c0_i32_0 = arith.constant 0 : i32
    %c0_i32_1 = arith.constant 0 : i32
    return %arg0, %c0_i32, %c0_i32_0 : i32, i32, i32
  }
  func.func @transform_18(%arg0: i32) -> (i32, i32, i32) {
    %c0_i32 = arith.constant 0 : i32
    %c0_i32_0 = arith.constant 0 : i32
    %c0_i32_1 = arith.constant 0 : i32
    return %arg0, %c0_i32, %c0_i32_0 : i32, i32, i32
  }
  func.func @transform_19(%arg0: i32) -> (i32, i32, i32) {
    %c0_i32 = arith.constant 0 : i32
    %c0_i32_0 = arith.constant 0 : i32
    %c0_i32_1 = arith.constant 0 : i32
    return %arg0, %c0_i32, %c0_i32_0 : i32, i32, i32
  }
  func.func @transform_20(%arg0: i32) -> (i32, i32) {
    %c0_i32 = arith.constant 0 : i32
    %c0_i32_0 = arith.constant 0 : i32
    %c0_i32_1 = arith.constant 0 : i32
    return %c0_i32, %c0_i32_0 : i32, i32
  }
  func.func @transform_21(%arg0: i32) -> (i32, i32) {
    %c0_i32 = arith.constant 0 : i32
    %c0_i32_0 = arith.constant 0 : i32
    %c0_i32_1 = arith.constant 0 : i32
    return %c0_i32, %c0_i32_0 : i32, i32
  }
  func.func @transform_22(%arg0: i32) -> (i32, i32) {
    %c0_i32 = arith.constant 0 : i32
    %c0_i32_0 = arith.constant 0 : i32
    %c0_i32_1 = arith.constant 0 : i32
    return %c0_i32, %c0_i32_0 : i32, i32
  }
  func.func @transform_23(%arg0: i32) -> (i32, i32, i32) {
    %c0_i32 = arith.constant 0 : i32
    %c0_i32_0 = arith.constant 0 : i32
    %c0_i32_1 = arith.constant 0 : i32
    %c0_i32_2 = arith.constant 0 : i32
    return %c0_i32, %c0_i32_0, %c0_i32_1 : i32, i32, i32
  }
}

</mosaic_0001>

<bundles_post_ra>
// kernel: _svort_forward.9
= control target key start
LH: loop header
LB: loop body
LE: loop exit
PB: predicated region body
PF: predicated region fallthrough
CT: control target
= control target key end

     0   :  { %s525_s15 = smov 0   ;;  %s527_s16 = smov 0   ;;  %s596_s0 = inlined_call_operand.vmem [shape: f32[16,8], index: 0, kind: input, shape index: {}]   ;;  %s597_s1 = inlined_call_operand.vmem [shape: f32[8,16], index: 1, kind: input, shape index: {}]   ;;  %s598_s2 = inlined_call_operand.vmem [shape: bf16[8,256], index: 2, kind: input, shape index: {}]   ;;  %s599_s3 = inlined_call_operand.vmem [shape: f32[8,1], index: 3, kind: input, shape index: {}]   ;;  %s600_s4 = inlined_call_operand.vmem [shape: f32[16,256], index: 4, kind: output, shape index: {}]  }
   0x1   :  { %s529_s17 = smov 0  }
   0x2 LB: > { %s538_s18 = sadd.s32 4294967295, %s497_s17   ;;  %s540_s19 = sadd.s32 1, %s497_s17   ;;  %s497_s17 = sphi %s529_s17, %s604_s17   ;;  %s493_s16 = sphi %s527_s16, %s603_s16   ;;  %s489_s15 = sphi %s525_s15, %s602_s15  }
   0x3   : > { %s107_s20 = ssub.s32 %s497_s17, %s540_s19  ;;  %s110_s21 = sadd.s32 1, %s493_s16 }
   0x4   : > { %p108_p0 = scmp.eq.s32.totalorder %s107_s20, 0  ;;  %p120_p1 = scmp.ne.s32.totalorder %s493_s16, %s489_s15 }
   0x5   : > { %p121_p2 = scmp.eq.s32.totalorder %s538_s18, 1  ;;  %p434_p3 = scmp.ge.s32.totalorder %s497_s17, 1 }
   0x6   : > { %s548_s22 = scalar_select %p108_p0, %s493_s16, %s110_s21  }
   0x7   : > { %p550_p4 = por %p121_p2, %p120_p1  ;;  %p161_p5 = scmp.lt.s32.totalorder %s497_s17, 3 }
   0x9   : > { %p162_p6 = pnand %p434_p3, %p161_p5 }
   0xa   : > { %p185_p7 = scmp.lt.s32.totalorder (!%p162_p6), %s538_s18, 1  ;;  %s182_s11 = sand.u32 (!%p162_p6), 1, %s489_s15  }
   0xb   : > { %165 = sbr.rel (%p162_p6) target bundleno = 729 (0x2d9), region = 36  ;;  %s435_s12 = sshll.u32 (!%p162_p6), %s182_s11, 4 }
   0xc   : > { %s184_s13 = scalar_lea.vmem (!%p162_p6), [#allocation2], %s435_s12 }
  0x10   : > { %s186_s24 = scalar_select %p185_p7, %s538_s18, 1  ;;  %v191_v2 = vld [vmem:[%s596_s0] sm:$0xff]  ;;  %vm193_vm0 = vcmask 64512   ;;  %v192_v3 = vld [vmem:[%s596_s0 + $0x8] sm:$0xff]  ;;  %v499_v5 = vmov 0   ;;  %vm225_vm1 = vcmask 130048  }
  0x11   : > { %v224_v4 = vld [vmem:[%s599_s3] sm:$0xff]  ;;  %474 = vset.pattern.permute.xlu0 %v499_v5  ;;  %s446_s14 = sshll.u32 (%p550_p4), %s538_s18, 3 }
  0x12   : > { %s436_s25 = sshll.u32 %s186_s24, 2  ;;  %252 = vperm.xlu0 %474, %v224_v4   ;;  %v223_v8 = vld [vmem:[%s597_s1] sm:$0xff]  ;;  %s342_s15 = scalar_lea.vmem (%p550_p4), %s600_s4, %s446_s14 }
  0x13   : > { %s188_s28 = scalar_lea.vmem %s598_s2, %s436_s25 }
  0x14   : > { %v189_v0 = vld [vmem:[%s188_s28] sm:$0xf] }
  0x15   : > { %v190_v1 = vunpack.c.l.bf16 %v189_v0 }
  0x17   : > { %215 = vmatpush.msra.mxu0 %v190_v1 }
  0x18   : > { %437 = vmatmul.msk.f32.vlgmr.msra.gmra.mxu0 %vm193_vm0, %v191_v2 }
  0x20   : > { %438 = vmatmul.msk.f32.gmra.mxu0 %vm193_vm0, %v192_v3 }
  0x84   : > { %v253_v10 = vpop.permute.xlu0 %252 }
  0x95   : > { %v217_v6 = vpop.f32.mrf.mxu0 }
  0x9d   : > { %v220_v7 = vpop.f32.mrf.mxu0 }
  0x9e   : > { %243 = vmatpush.msra.mxu3 %v220_v7 }
  0xa0   : > { %244 = vmatpush.msra.mxu3 %v217_v6 }
  0xa1   : > { %439 = vmatmul.msk.f32.vlgmr.msra.gmra.mxu3 %vm225_vm1, %v223_v8 }
 0x124   : > { %v246_v9 = vpop.f32.mrf.mxu3 }
 0x125   : > { %v249_v11 = vsub.f32 %v190_v1, %v246_v9 }
 0x127   : > { %v255_v12 = vmul.f32 %v253_v10, %v249_v11 }
 0x129   : > { %271 = vmatpush.msra.mxu2 %v255_v12 }
 0x12a   : > { %440 = vmatmul.msk.f32.vlgmr.msra.gmra.mxu2 %vm193_vm0, %v191_v2 }
 0x132   : > { %441 = vmatmul.msk.f32.gmra.mxu2 %vm193_vm0, %v192_v3 }
 0x1ad   : > { %v273_v13 = vpop.f32.mrf.mxu2 }
 0x1ae   : > { %v279_v15 = vmul.f32 0.5, %v273_v13 }
 0x1b0   : > { %v281_v18 = vadd.f32 %v279_v15, %v217_v6 }
 0x1b5   : > { %v276_v14 = vpop.f32.mrf.mxu2 }
 0x1b6   : > { %v280_v16 = vmul.f32 0.5, %v276_v14 }
 0x1b8   : > { %v282_v17 = vadd.f32 %v280_v16, %v220_v7 }
 0x1ba   : > { %297 = vmatpush.msrb.mxu3 %v282_v17 }
 0x1bc   : > { %298 = vmatpush.msrb.mxu3 %v281_v18 }
 0x1bd   : > { %442 = vmatmul.msk.f32.vlgmr.msrb.gmra.mxu3 %vm225_vm1, %v223_v8 }
 0x240   : > { %v300_v19 = vpop.f32.mrf.mxu3 }
 0x241   : > { %v303_v20 = vsub.f32 %v190_v1, %v300_v19 }
 0x243   : > { %v304_v21 = vmul.f32 %v303_v20, %v253_v10 }
 0x245   : > { %320 = vmatpush.msra.mxu1 %v304_v21 }
 0x246   : > { %443 = vmatmul.msk.f32.vlgmr.msra.gmra.mxu1 %vm193_vm0, %v191_v2 }
 0x24e   : > { %444 = vmatmul.msk.f32.gmra.mxu1 %vm193_vm0, %v192_v3 }
 0x2c3   : > { %v322_v22 = vpop.f32.mrf.mxu1 }
 0x2c4   : > { %v328_v23 = vmul.f32 0.5, %v322_v22 }
 0x2c6   : > { %v330_v24 = vadd.f32 %v328_v23, %v281_v18 }
 0x2c8   : > { %332 = vst [vmem:[%s184_s13] sm:$0xff] %v330_v24 }
 0x2cb   : > { %v325_v25 = vpop.f32.mrf.mxu1 }
 0x2cc   : > { %v329_v26 = vmul.f32 0.5, %v325_v25  ;;  %340 = sbr.rel (!%p550_p4) target bundleno = 729 (0x2d9), region = 40 }
 0x2ce   : > { %v331_v27 = vadd.f32 %v329_v26, %v282_v17 }
 0x2cf   : > { %v373_v28 = vld [vmem:[%s184_s13] sm:$0xff] (%p550_p4) }
 0x2d0   : > { %333 = vst [vmem:[%s184_s13 + $0x8] sm:$0xff] %v331_v27 }
 0x2d1   : > { %374 = vst [vmem:[%s342_s15] sm:$0xff] %v373_v28 }
 0x2d7   : > { %v375_v29 = vld [vmem:[%s184_s13 + $0x8] sm:$0xff] }
 0x2d8   : > { %376 = vst [vmem:[%s342_s15 + $0x10] sm:$0xff] %v375_v29 }
 0x2d9 PF: > { %p11_p8 = scmp.ge.s32.totalorder %s540_s19, 4   ;;  %s602_s15 = smov %s493_s16 }
 0x2da   : > { %s603_s16 = smov %s548_s22  ;;  %s604_s17 = smov %s540_s19 }
 0x2db   :  { %13 = sbr.rel (!%p11_p8) target bundleno = 2 (0x2), region = 104 }

// kernel: _svort_forward.8
= control target key start
LH: loop header
LB: loop body
LE: loop exit
PB: predicated region body
PF: predicated region fallthrough
CT: control target
= control target key end

     0   :  { %s2213_s0 = inlined_call_operand.vmem [shape: bf16[8,256], index: 0, kind: input, shape index: {}]   ;;  %s2214_s1 = inlined_call_operand.vmem [shape: f32[8,16], index: 1, kind: input, shape index: {}]   ;;  %s2215_s2 = inlined_call_operand.vmem [shape: bf16[256,64], index: 2, kind: input, shape index: {}]   ;;  %s2216_s3 = inlined_call_operand.vmem [shape: f32[1,64], index: 3, kind: input, shape index: {}]   ;;  %s2217_s4 = inlined_call_operand.vmem [shape: f32[16,64], index: 4, kind: input, shape index: {}]   ;;  %s2218_s5 = inlined_call_operand.vmem [shape: f32[2,64,192], index: 5, kind: input, shape index: {}]   ;;  %s2219_s6 = inlined_call_operand.vmem [shape: f32[2,1,192], index: 6, kind: input, shape index: {}]   ;;  %s2220_s7 = inlined_call_operand.vmem [shape: f32[2,64,64], index: 7, kind: input, shape index: {}]   ;;  %s2221_s8 = inlined_call_operand.vmem [shape: f32[2,1,64], index: 8, kind: input, shape index: {}]   ;;  %s2222_s9 = inlined_call_operand.vmem [shape: f32[2,64,128], index: 9, kind: input, shape index: {}]   ;;  %s2223_s10 = inlined_call_operand.vmem [shape: f32[2,1,128], index: 10, kind: input, shape index: {}]   ;;  %s2224_s11 = inlined_call_operand.vmem [shape: f32[2,128,64], index: 11, kind: input, shape index: {}]   ;;  %s2225_s12 = inlined_call_operand.vmem [shape: f32[2,1,64], index: 12, kind: input, shape index: {}]   ;;  %s2226_s13 = inlined_call_operand.vmem [shape: f32[2,1,64], index: 13, kind: input, shape index: {}]   ;;  %s2227_s14 = inlined_call_operand.vmem [shape: f32[2,1,64], index: 14, kind: input, shape index: {}]   ;;  %s2228_s15 = inlined_call_operand.vmem [shape: f32[2,1,64], index: 15, kind: input, shape index: {}]   ;;  %s2229_s16 = inlined_call_operand.vmem [shape: f32[2,1,64], index: 16, kind: input, shape index: {}]   ;;  %s2230_s17 = inlined_call_operand.vmem [shape: f32[64,128], index: 17, kind: input, shape index: {}]   ;;  %s2231_s18 = inlined_call_operand.vmem [shape: f32[1,128], index: 18, kind: input, shape index: {}]   ;;  %s2232_s19 = inlined_call_operand.vmem [shape: f32[8,128], index: 19, kind: output, shape index: {}]  }
   0x1   :  { %2237 = sst [smem:[#allocation4_spill]] %s2213_s0  ;;  %s1900_s0 = smov 0  }
   0x2   :  { %2238 = sst [smem:[#allocation5_spill]] %s2214_s1 }
   0x3   :  { %2239 = sst [smem:[#allocation6_spill]] %s2215_s2 }
   0x4   :  { %2240 = sst [smem:[#allocation7_spill]] %s2216_s3 }
   0x5   :  { %2241 = sst [smem:[#allocation8_spill]] %s2217_s4 }
   0x6   :  { %2242 = sst [smem:[#allocation9_spill]] %s2218_s5 }
   0x7   :  { %2243 = sst [smem:[#allocation10_spill]] %s2219_s6 }
   0x8   :  { %2244 = sst [smem:[#allocation11_spill]] %s2220_s7 }
   0x9   :  { %2245 = sst [smem:[#allocation12_spill]] %s2222_s9 }
   0xa   :  { %2246 = sst [smem:[#allocation13_spill]] %s2230_s17 }
   0xb   :  { %2247 = sst [smem:[#allocation14_spill]] %s2231_s18 }
   0xc   :  { %2248 = sst [smem:[#allocation15_spill]] %s2232_s19 }
   0xd LB: > { %2249 = sst [smem:[#allocation3_spill]] %s1790_s0  ;;  %s1906_s30 = sadd.s32 4294967295, %s1790_s0   ;;  %s1790_s0 = sphi %s1900_s0, %s29_s0  }
   0xe   : > { %p1622_p0 = scmp.ge.s32.totalorder %s1790_s0, 1  ;;  %p627_p1 = scmp.lt.s32.totalorder %s1790_s0, 3 }
  0x10   : > { %p628_p2 = pnand %p1622_p0, %p627_p1 }
  0x11   : > { %p718_p3 = scmp.lt.s32.totalorder (!%p628_p2), %s1906_s30, 1  ;;  %s2250_s5 = sld [smem:[#allocation9_spill]] (!%p628_p2) }
  0x12   : > { %631 = sbr.rel (%p628_p2) target bundleno = 2623 (0xa3f), region = 96  ;;  %s2251_s6 = sld [smem:[#allocation10_spill]] (!%p628_p2) }
  0x13   : > { %s2252_s7 = sld [smem:[#allocation11_spill]] (!%p628_p2)  ;;  %p1632_p4 = scmp.ne.s32.totalorder (!%p628_p2), %s1906_s30, 0 }
  0x14   : > { %s2253_s9 = sld [smem:[#allocation12_spill]] (!%p628_p2) }
  0x17   : > { %s1912_s20 = scalar_select %p718_p3, %s1906_s30, 1 }
  0x18   : > { %s2254_s28 = sld [smem:[#allocation6_spill]] (!%p1632_p4) }
  0x19   : > { %s1654_s21 = sshll.u32 %s1912_s20, 7  ;;  %s1625_s1 = sshll.u32 %s1912_s20, 1 }
  0x1a   : > { %s1919_s23 = scalar_lea.vmem %s2250_s5, %s1654_s21  ;;  %s1924_s3 = scalar_lea.vmem %s2251_s6, %s1625_s1 }
  0x1b   : > { %s1655_s26 = sshll.u32 %s1912_s20, 6  ;;  %s1948_s6 = scalar_lea.vmem %s2224_s11, %s1654_s21 }
  0x1c   : > { %s1934_s18 = scalar_lea.vmem %s2252_s7, %s1655_s26  ;;  %s1939_s22 = scalar_lea.vmem %s2253_s9, %s1655_s26 }
  0x1d   : > { %s750_s19 = scalar_lea.vmem %s2225_s12, %s1912_s20  ;;  %s753_s7 = scalar_lea.vmem %s2226_s13, %s1912_s20 }
  0x1e   : > { %s756_s26 = scalar_lea.vmem %s2227_s14, %s1912_s20  ;;  %s759_s2 = scalar_lea.vmem %s2228_s15, %s1912_s20 }
  0x1f   : > { %766 = sbr.rel (%p1632_p4) target bundleno = 207 (0xcf), region = 100  ;;  %s2255_s4 = sld [smem:[#allocation8_spill]] (!%p1632_p4) }
  0x20   : > { %s2256_s24 = sld [smem:[#allocation5_spill]] (!%p1632_p4) }
  0x21   : > { %s2257_s27 = sld [smem:[#allocation4_spill]] (!%p1632_p4) }
  0x22   : > { %s2258_s17 = sld [smem:[#allocation7_spill]] (!%p1632_p4) }
  0x24   : > { %v1736_v0 = vld [vmem:[%s2254_s28 + $0x78] sm:$0xff]   ;;  %v1735_v2 = vld [vmem:[%s2254_s28 + $0x70] sm:$0xff]   ;;  %v1734_v10 = vld [vmem:[%s2254_s28 + $0x68] sm:$0xff]   ;;  %vm837_vm0 = vcmask 130048   ;;  %vm906_vm1 = vcmask 523264  }
  0x25   : > { %v1728_v1 = vld [vmem:[%s2254_s28 + $0x38] sm:$0xff]   ;;  %v1721_v3 = vunpack.c.h.bf16 %v1736_v0  ;;  %v1720_v4 = vunpack.c.l.bf16 %v1736_v0  ;;  %v1727_v6 = vld [vmem:[%s2254_s28 + $0x30] sm:$0xff]   ;;  %v1717_v8 = vunpack.c.h.bf16 %v1735_v2  ;;  %v1726_v11 = vld [vmem:[%s2254_s28 + $0x28] sm:$0xff]   ;;  %v1716_v12 = vunpack.c.l.bf16 %v1735_v2 }
  0x26   : > { %v1689_v5 = vunpack.c.h.bf16 %v1728_v1  ;;  %v1688_v7 = vunpack.c.l.bf16 %v1728_v1  ;;  %v1685_v9 = vunpack.c.h.bf16 %v1727_v6  ;;  %v1684_v13 = vunpack.c.l.bf16 %v1727_v6  ;;  %v836_v14 = vld [vmem:[%s2255_s4 + $0x8] sm:$0xff]  ;;  %v835_v15 = vld [vmem:[%s2255_s4] sm:$0xff]  ;;  %v1732_v25 = vld [vmem:[%s2254_s28 + $0x58] sm:$0xff]  }
  0x27   : > { %881 = vmatpush.msra.mxu2 %v1721_v3  ;;  %855 = vmatpush.msra.mxu0 %v836_v14  ;;  %v1713_v16 = vunpack.c.h.bf16 %v1734_v10  ;;  %v1681_v17 = vunpack.c.h.bf16 %v1726_v11  ;;  %v834_v18 = vld [vmem:[%s2256_s24] sm:$0xff]  ;;  %v1712_v21 = vunpack.c.l.bf16 %v1734_v10  ;;  %v1680_v22 = vunpack.c.l.bf16 %v1726_v11  ;;  %v1724_v26 = vld [vmem:[%s2254_s28 + $0x18] sm:$0xff]   ;;  %v1731_v31 = vld [vmem:[%s2254_s28 + $0x50] sm:$0xff]  }
  0x28   : > { %861 = vmatpush.msra.mxu1 %v1689_v5  ;;  %v1733_v19 = vld [vmem:[%s2254_s28 + $0x60] sm:$0xff]   ;;  %v1705_v29 = vunpack.c.h.bf16 %v1732_v25  ;;  %v1673_v30 = vunpack.c.h.bf16 %v1724_v26  ;;  %v1723_v32 = vld [vmem:[%s2254_s28 + $0x10] sm:$0xff]   ;;  %v1704_v33 = vunpack.c.l.bf16 %v1732_v25  ;;  %v1672_v34 = vunpack.c.l.bf16 %v1724_v26  ;;  %v1730_v37 = vld [vmem:[%s2254_s28 + $0x48] sm:$0xff]  }
  0x29   : > { %882 = vmatpush.msra.mxu2 %v1720_v4  ;;  %v1725_v20 = vld [vmem:[%s2254_s28 + $0x20] sm:$0xff]   ;;  %856 = vmatpush.msra.mxu0 %v835_v15  ;;  %v1709_v23 = vunpack.c.h.bf16 %v1733_v19  ;;  %v1708_v27 = vunpack.c.l.bf16 %v1733_v19  ;;  %v1701_v35 = vunpack.c.h.bf16 %v1731_v31  ;;  %v1669_v36 = vunpack.c.h.bf16 %v1723_v32  ;;  %v1722_v38 = vld [vmem:[%s2254_s28 + $0x8] sm:$0xff]  }
  0x2a   : > { %862 = vmatpush.msra.mxu1 %v1688_v7  ;;  %1633 = vmatmul.msk.f32.vlgmr.msra.gmra.mxu0 %vm837_vm0, %v834_v18  ;;  %v1677_v24 = vunpack.c.h.bf16 %v1725_v20  ;;  %v1676_v28 = vunpack.c.l.bf16 %v1725_v20  ;;  %v1700_v39 = vunpack.c.l.bf16 %v1731_v31  ;;  %v1668_v40 = vunpack.c.l.bf16 %v1723_v32  ;;  %v1729_v43 = vld [vmem:[%s2254_s28 + $0x40] sm:$0xff]  }
  0x2b   : > { %883 = vmatpush.msra.mxu2 %v1717_v8  ;;  %v1697_v41 = vunpack.c.h.bf16 %v1730_v37  ;;  %v1665_v42 = vunpack.c.h.bf16 %v1722_v38  ;;  %v1659_v44 = vld [vmem:[%s2254_s28] sm:$0xff]   ;;  %v1696_v45 = vunpack.c.l.bf16 %v1730_v37  ;;  %v1664_v46 = vunpack.c.l.bf16 %v1722_v38 }
  0x2c   : > { %863 = vmatpush.msra.mxu1 %v1685_v9  ;;  %v1693_v47 = vunpack.c.h.bf16 %v1729_v43  ;;  %v767_v48 = vld [vmem:[%s2257_s27] sm:$0xff]  ;;  %v1661_v49 = vunpack.c.h.bf16 %v1659_v44  ;;  %v1692_v50 = vunpack.c.l.bf16 %v1729_v43  ;;  %v1660_v51 = vunpack.c.l.bf16 %v1659_v44 }
  0x2d   : > { %884 = vmatpush.msra.mxu2 %v1716_v12  ;;  %v769_v52 = vunpack.c.h.bf16 %v767_v48  ;;  %v768_v53 = vunpack.c.l.bf16 %v767_v48  ;;  %v1753_v57 = vld [vmem:[%s2258_s17] ss:$0 sm:$0xff] }
  0x2e   : > { %864 = vmatpush.msra.mxu1 %v1684_v13 }
  0x2f   : > { %885 = vmatpush.msra.mxu2 %v1713_v16 }
  0x30   : > { %865 = vmatpush.msra.mxu1 %v1681_v17 }
  0x31   : > { %886 = vmatpush.msra.mxu2 %v1712_v21 }
  0x32   : > { %866 = vmatpush.msra.mxu1 %v1680_v22 }
  0x33   : > { %887 = vmatpush.msra.mxu2 %v1709_v23 }
  0x34   : > { %867 = vmatpush.msra.mxu1 %v1677_v24 }
  0x35   : > { %888 = vmatpush.msra.mxu2 %v1708_v27 }
  0x36   : > { %868 = vmatpush.msra.mxu1 %v1676_v28 }
  0x37   : > { %889 = vmatpush.msra.mxu2 %v1705_v29 }
  0x38   : > { %869 = vmatpush.msra.mxu1 %v1673_v30 }
  0x39   : > { %890 = vmatpush.msra.mxu2 %v1704_v33 }
  0x3a   : > { %870 = vmatpush.msra.mxu1 %v1672_v34 }
  0x3b   : > { %891 = vmatpush.msra.mxu2 %v1701_v35 }
  0x3c   : > { %871 = vmatpush.msra.mxu1 %v1669_v36 }
  0x3d   : > { %892 = vmatpush.msra.mxu2 %v1700_v39 }
  0x3e   : > { %872 = vmatpush.msra.mxu1 %v1668_v40 }
  0x3f   : > { %893 = vmatpush.msra.mxu2 %v1697_v41 }
  0x40   : > { %873 = vmatpush.msra.mxu1 %v1665_v42 }
  0x41   : > { %894 = vmatpush.msra.mxu2 %v1696_v45 }
  0x42   : > { %874 = vmatpush.msra.mxu1 %v1664_v46 }
  0x43   : > { %895 = vmatpush.msra.mxu2 %v1693_v47 }
  0x44   : > { %875 = vmatpush.msra.mxu1 %v1661_v49 }
  0x45   : > { %896 = vmatpush.msra.mxu2 %v1692_v50 }
  0x46   : > { %876 = vmatpush.msra.mxu1 %v1660_v51  ;;  %897 = vmatmul.f32.vlgmr.msra.gmra.mxu2 %v769_v52 }
  0x47   : > { %877 = vmatmul.f32.vlgmr.msra.gmra.mxu1 %v768_v53 }
  0xa7   : > { %v858_v54 = vpop.f32.mrf.mxu0 }
  0xc4   : > { %v878_v55 = vpop.f32.mrf.mxu1 }
  0xc5   : > { %v879_v56 = vadd.f32 %v878_v55, %v858_v54 }
  0xc9   : > { %v898_v58 = vpop.f32.mrf.mxu2 }
  0xca   : > { %v899_v59 = vadd.f32 %v898_v58, %v879_v56 }
  0xcc   : > { %v905_v60 = vadd.f32 %v1753_v57, %v899_v59 }
  0xce   : > { %907 = vst.msk [vmem:[#allocation2] sm:$0xff] %vm906_vm1, %v905_v60 }
  0xcf PF: > { %v923_v61 = vld [vmem:[%s1919_s23 + $0x70] sm:$0xff]  ;;  %v921_v62 = vld [vmem:[%s1919_s23 + $0x60] sm:$0xff]  ;;  %vm931_vm2 = vcmask 523264   ;;  %s1792_s9 = smov 112   ;;  %s1793_s1 = smov 64   ;;  %vm978_vm3 = vcmask 130048  }
  0xd0   : > { %943 = vmatpush.msra.mxu1 %v923_v61  ;;  %v919_v63 = vld [vmem:[%s1919_s23 + $0x50] sm:$0xff]  ;;  %v917_v0 = vld [vmem:[%s1919_s23 + $0x40] sm:$0xff]  ;;  %s1794_s21 = smov 32   ;;  %s1795_s5 = smov 96   ;;  %v924_v16 = vld [vmem:[%s1919_s23 + $0x78] sm:$0xff]  ;;  %vm1004_vm4 = vcmask 64512  }
  0xd1   : > { %v915_v1 = vld [vmem:[%s1919_s23 + $0x30] sm:$0xff]  ;;  %v913_v2 = vld [vmem:[%s1919_s23 + $0x20] sm:$0xff]  ;;  %s1796_s24 = smov 16   ;;  %v922_v17 = vld [vmem:[%s1919_s23 + $0x68] sm:$0xff]  ;;  %s1798_s25 = smov 48   ;;  %vm1251_vm5 = vcmask 261120  }
  0xd2   : > { %944 = vmatpush.msra.mxu1 %v921_v62  ;;  %v911_v3 = vld [vmem:[%s1919_s23 + $0x10] sm:$0xff]  ;;  %v909_v4 = vld [vmem:[%s1919_s23] sm:$0xff]  ;;  %v920_v18 = vld [vmem:[%s1919_s23 + $0x58] sm:$0xff]  ;;  %vm1253_vm6 = vcmask 392192   ;;  %s2259_s29 = scalar_lea.vmem %s2221_s8, %s1912_s20  ;;  %p1650_p5 = scmp.ne.s32.totalorder %s1906_s30, 1 }
  0xd3   : > { %v2047_v6 = vld [vmem:[%s1924_s3] sm:$0x3]  ;;  %s1797_s3 = smov 80   ;;  %v918_v19 = vld [vmem:[%s1919_s23 + $0x48] sm:$0xff]  ;;  %v916_v26 = vld [vmem:[%s1919_s23 + $0x38] sm:$0xff]  ;;  %s2262_s27 = sld [smem:[#allocation13_spill]] (!%p1650_p5) }
  0xd4   : > { %945 = vmatpush.msra.mxu1 %v919_v63  ;;  %v927_v7 = vperm.slane %v2047_v6, 0  ;;  %v914_v27 = vld [vmem:[%s1919_s23 + $0x28] sm:$0xff]  ;;  %v912_v28 = vld [vmem:[%s1919_s23 + $0x18] sm:$0xff]  ;;  %v928_v35 = vperm.slane %v2047_v6, 1 }
  0xd5   : > { %v2042_v5 = vld [vmem:[#allocation2] sm:$0xff]  ;;  %v910_v29 = vld [vmem:[%s1919_s23 + $0x8] sm:$0xff]  ;;  %s2264_s23 = sld [smem:[#allocation15_spill]] (!%p1650_p5) }
  0xd6   : > { %946 = vmatpush.msra.mxu1 %v917_v0 }
  0xd8   : > { %947 = vmatpush.msra.mxu1 %v915_v1 }
  0xda   : > { %948 = vmatpush.msra.mxu1 %v913_v2 }
  0xdc   : > { %949 = vmatpush.msra.mxu1 %v911_v3 }
  0xde   : > { %950 = vmatpush.msra.mxu1 %v909_v4 }
  0xdf   : > { %1634 = vmatmul.msk.f32.vlgmr.msra.gmra.mxu1 %vm931_vm2, %v2042_v5 }
  0xe0   : > { %963 = vmatpush.msrb.mxu1 %v924_v16  ;;  %v1260_v16 = vld [vmem:[%s1934_s18 + $0x28] sm:$0xff] }
  0xe2   : > { %964 = vmatpush.msrb.mxu1 %v922_v17 }
  0xe4   : > { %965 = vmatpush.msrb.mxu1 %v920_v18 }
  0xe6   : > { %966 = vmatpush.msrb.mxu1 %v918_v19  ;;  %v1259_v19 = vld [vmem:[%s1934_s18 + $0x20] sm:$0xff] }
  0xe8   : > { %967 = vmatpush.msrb.mxu1 %v916_v26 }
  0xea   : > { %968 = vmatpush.msrb.mxu1 %v914_v27 }
  0xec   : > { %969 = vmatpush.msrb.mxu1 %v912_v28 }
  0xee   : > { %970 = vmatpush.msrb.mxu1 %v910_v29 }
  0xef   : > { %1635 = vmatmul.msk.f32.vlgmr.msrb.gmra.mxu1 %vm931_vm2, %v2042_v5 }
 0x15c   : > { %v952_v8 = vpop.f32.mrf.mxu1 }
 0x15d   : > { %v953_v9 = vadd.f32 %v952_v8, %v927_v7 }
 0x15f   : > { %1039 = vrot.lane.b32.xlu2 %v953_v9, %s1792_s9  ;;  %976 = vrot.lane.b32.xlu0 %v953_v9, %s1793_s1  ;;  %s2260_s1 = scalar_lea.vmem %s2223_s10, %s1912_s20 }
 0x167   : > { %1108 = vrot.lane.b32.xlu2 %v953_v9, %s1794_s21 }
 0x16c   : > { %v972_v36 = vpop.f32.mrf.mxu1 }
 0x16d   : > { %v973_v37 = vadd.f32 %v972_v36, %v928_v35  ;;  %v1799_v35 = vmov 64.0  }
 0x16f   : > { %1106 = vrot.lane.b32.xlu2 %v953_v9, %s1795_s5  ;;  %1034 = vmatpush.msra.mxu3 %v973_v37 }
 0x177   : > { %1174 = vrot.lane.b32.xlu2 %v953_v9, %s1796_s24 }
 0x17f   : > { %1172 = vrot.lane.b32.xlu2 %v953_v9, %s1797_s3 }
 0x1b9   : > { %v1040_v10 = vpop.permute.xlu2 %1039 }
 0x1c1   : > { %v1109_v11 = vpop.permute.xlu2 %1108 }
 0x1c9   : > { %v1107_v12 = vpop.permute.xlu2 %1106 }
 0x1d1   : > { %v1175_v13 = vpop.permute.xlu2 %1174  ;;  %v977_v14 = vpop.permute.xlu0 %976 }
 0x1d2   : > { %1636 = vmatpush.xpose.msk.msra.mxu2 %vm978_vm3, %v977_v14  ;;  %1645 = vmatpush.xpose.msk.msra.mxu0 %vm978_vm3, %v1175_v13  ;;  %v1262_v14 = vld [vmem:[%s1934_s18 + $0x38] sm:$0xff] }
 0x1d5   : > { %1637 = vmatmul.msk.f32.vlgmr.msra.gmra.mxu2 %vm978_vm3, %v953_v9 }
 0x1d9   : > { %v1173_v15 = vpop.permute.xlu2 %1172 }
 0x1da   : > { %1646 = vmatmul.msk.f32.vlgmr.msra.gmra.mxu0 %vm978_vm3, %v1173_v15  ;;  %v1261_v15 = vld [vmem:[%s1934_s18 + $0x30] sm:$0xff] }
 0x257   : > { %v1197_v23 = vpop.f32.mrf.mxu0 }
 0x258   : > { %v1000_v20 = vpop.f32.mrf.mxu2  ;;  %v1200_v24 = vmul.f32 0.25, %v1197_v23  ;;  %v1255_v23 = vld [vmem:[%s1934_s18] sm:$0xff] }
 0x259   : > { %v1003_v21 = vmul.f32 0.25, %v1000_v20  ;;  %v1258_v20 = vld [vmem:[%s1934_s18 + $0x18] sm:$0xff] }
 0x25a   : > { %v1201_v25 = vsel %vm1004_vm4, %v1200_v24, -inf }
 0x25b   : > { %v1005_v22 = vsel %vm1004_vm4, %v1003_v21, -inf }
 0x25c   : > { %1006 = vmax.xlane.f32.xlu0 %v1005_v22  ;;  %v1256_v22 = vld [vmem:[%s1934_s18 + $0x8] sm:$0xff] }
 0x264   : > { %1202 = vmax.xlane.f32.xlu0 %v1201_v25 }
 0x2cf   : > { %v1007_v30 = vpop.xlane.xlu0 %1006 }
 0x2d0   : > { %v1008_v31 = vsub.f32 %v1003_v21, %v1007_v30  ;;  %v1257_v21 = vld [vmem:[%s1934_s18 + $0x10] sm:$0xff]  ;;  %v1754_v30 = vld [vmem:[%s2259_s29] ss:$0 sm:$0xff] }
 0x2d2   : > { %v1009_v32 = vmul.f32 1.442695, %v1008_v31 }
 0x2d4   : > { %1761 = vpow2.f32 %v1009_v32 }
 0x2d7   : > { %v1203_v42 = vpop.xlane.xlu0 %1202 }
 0x2d8   : > { %v1204_v44 = vsub.f32 %v1200_v24, %v1203_v42 }
 0x2da   : > { %v1762_v33 = vpop.eup %1761  ;;  %v1205_v45 = vmul.f32 1.442695, %v1204_v44 }
 0x2db   : > { %v1011_v34 = vsel %vm1004_vm4, %v1762_v33, 0.0 }
 0x2dc   : > { %1012 = vadd.xlane.f32.xlu1 %v1011_v34 }
 0x2f5   : > { %1041 = vrot.lane.b32.xlu1 %v953_v9, %s1798_s25 }
 0x34f   : > { %v1013_v38 = vpop.xlane.xlu1 %1012 }
 0x350   : > { %1763 = vrcp.f32 %v1013_v38 }
 0x351   : > { %1765 = vpow2.f32 %v1205_v45 }
 0x356   : > { %v1764_v39 = vpop.eup %1763 }
 0x357   : > { %v1015_v40 = vmul.f32 %v1764_v39, %v1762_v33  ;;  %v1766_v49 = vpop.eup %1765 }
 0x358   : > { %v1207_v53 = vsel %vm1004_vm4, %v1766_v49, 0.0 }
 0x359   : > { %1638 = vmatmul.msk.f32.vlgmr.msra.gmra.mxu3 %vm1004_vm4, %v1015_v40 }
 0x367   : > { %v1042_v41 = vpop.permute.xlu1 %1041 }
 0x368   : > { %1639 = vmatpush.xpose.msk.msrb.mxu3 %vm978_vm3, %v1042_v41 }
 0x36b   : > { %1640 = vmatmul.msk.f32.vlgmr.msrb.gmra.mxu3 %vm978_vm3, %v1040_v10 }
 0x36c   : > { %1642 = vmatpush.xpose.msk.msra.mxu3 %vm978_vm3, %v1109_v11 }
 0x370   : > { %1278 = vmatpush.msrb.mxu3 %v1262_v14 }
 0x372   : > { %1279 = vmatpush.msrb.mxu3 %v1261_v15 }
 0x373   : > { %1643 = vmatmul.msk.f32.vlgmr.msra.gmra.mxu3 %vm978_vm3, %v1107_v12 }
 0x374   : > { %1280 = vmatpush.msrb.mxu3 %v1260_v16  ;;  %v1756_v16 = vld [vmem:[%s756_s26] ss:$0 sm:$0xff] }
 0x376   : > { %1281 = vmatpush.msrb.mxu3 %v1259_v19  ;;  %v1368_v19 = vld [vmem:[%s1948_s6 + $0x10] sm:$0xff] }
 0x378   : > { %1282 = vmatpush.msrb.mxu3 %v1258_v20  ;;  %v1367_v20 = vld [vmem:[%s1948_s6 + $0x8] sm:$0xff] }
 0x37a   : > { %1283 = vmatpush.msrb.mxu3 %v1257_v21  ;;  %v1366_v21 = vld [vmem:[%s1948_s6] sm:$0xff] }
 0x37c   : > { %1284 = vmatpush.msrb.mxu3 %v1256_v22  ;;  %v1757_v22 = vld [vmem:[%s2260_s1] ss:$0 sm:$0xff] }
 0x37e   : > { %1285 = vmatpush.msrb.mxu3 %v1255_v23 }
 0x3dc   : > { %v2079_v43 = vpop.f32.mrf.mxu3 }
 0x3ee   : > { %v1064_v46 = vpop.f32.mrf.mxu3 }
 0x3ef   : > { %v1067_v47 = vmul.f32 0.25, %v1064_v46  ;;  %v1337_v46 = vld [vmem:[%s1939_s22 + $0x38] sm:$0xff] }
 0x3f1   : > { %v1068_v48 = vsel %vm1004_vm4, %v1067_v47, -inf }
 0x3f2   : > { %1069 = vmax.xlane.f32.xlu1 %v1068_v48  ;;  %v1335_v48 = vld [vmem:[%s1939_s22 + $0x28] sm:$0xff] }
 0x3f6   : > { %v1131_v50 = vpop.f32.mrf.mxu3 }
 0x3f7   : > { %v1134_v51 = vmul.f32 0.25, %v1131_v50  ;;  %v1333_v50 = vld [vmem:[%s1939_s22 + $0x18] sm:$0xff] }
 0x3f9   : > { %v1135_v52 = vsel %vm1004_vm4, %v1134_v51, -inf }
 0x3fa   : > { %1136 = vmax.xlane.f32.xlu2 %v1135_v52  ;;  %1208 = vadd.xlane.f32.xlu1 %v1207_v53  ;;  %v1331_v52 = vld [vmem:[%s1939_s22 + $0x8] sm:$0xff]  ;;  %v1330_v53 = vld [vmem:[%s1939_s22] sm:$0xff] }
 0x412   : > { %1146 = vrot.lane.b32.xlu2 %v973_v37, %s1795_s5 }
 0x413   : > { %1212 = vrot.lane.b32.xlu1 %v973_v37, %s1797_s3  ;;  %s2261_s3 = scalar_lea.vmem %s2229_s16, %s1912_s20 }
 0x465   : > { %v1070_v54 = vpop.xlane.xlu1 %1069 }
 0x466   : > { %v1071_v55 = vsub.f32 %v1067_v47, %v1070_v54  ;;  %v1336_v47 = vld [vmem:[%s1939_s22 + $0x30] sm:$0xff]  ;;  %v1381_v54 = vld [vmem:[%s1948_s6 + $0x78] sm:$0xff] }
 0x467   : > { %1386 = vmatpush.msrb.mxu0 %v1381_v54 }
 0x468   : > { %v1072_v56 = vmul.f32 1.442695, %v1071_v55  ;;  %v1380_v55 = vld [vmem:[%s1948_s6 + $0x70] sm:$0xff] }
 0x469   : > { %1387 = vmatpush.msrb.mxu0 %v1380_v55 }
 0x46a   : > { %1767 = vpow2.f32 %v1072_v56  ;;  %v1379_v56 = vld [vmem:[%s1948_s6 + $0x68] sm:$0xff] }
 0x46b   : > { %1388 = vmatpush.msrb.mxu0 %v1379_v56 }
 0x46d   : > { %v1137_v57 = vpop.xlane.xlu2 %1136  ;;  %v1209_v63 = vpop.xlane.xlu1 %1208 }
 0x46e   : > { %v1138_v58 = vsub.f32 %v1134_v51, %v1137_v57  ;;  %v1332_v51 = vld [vmem:[%s1939_s22 + $0x10] sm:$0xff] }
 0x470   : > { %v1768_v59 = vpop.eup %1767  ;;  %v1139_v60 = vmul.f32 1.442695, %v1138_v58 }
 0x471   : > { %v1074_v61 = vsel %vm1004_vm4, %v1768_v59, 0.0 }
 0x472   : > { %1769 = vpow2.f32 %v1139_v60  ;;  %1075 = vadd.xlane.f32.xlu0 %v1074_v61  ;;  %v1377_v61 = vld [vmem:[%s1948_s6 + $0x58] sm:$0xff] }
 0x473   : > { %1771 = vrcp.f32 %v1209_v63  ;;  %v1375_v63 = vld [vmem:[%s1948_s6 + $0x48] sm:$0xff] }
 0x475   : > { %v1147_v10 = vpop.permute.xlu2 %1146 }
 0x478   : > { %v1770_v62 = vpop.eup %1769 }
 0x479   : > { %v1141_v0 = vsel %vm1004_vm4, %v1770_v62, 0.0  ;;  %v1772_v1 = vpop.eup %1771 }
 0x47a   : > { %1142 = vadd.xlane.f32.xlu0 %v1141_v0  ;;  %v1211_v2 = vmul.f32 %v1772_v1, %v1766_v49  ;;  %v1334_v49 = vld [vmem:[%s1939_s22 + $0x20] sm:$0xff] }
 0x47b   : > { %v1374_v0 = vld [vmem:[%s1948_s6 + $0x40] sm:$0xff] }
 0x485   : > { %v1213_v3 = vpop.permute.xlu1 %1212 }
 0x486   : > { %1233 = vmatpush.msra.mxu1 %v1213_v3 }
 0x487   : > { %1647 = vmatmul.msk.f32.vlgmr.msra.gmra.mxu1 %vm1004_vm4, %v1211_v2  ;;  %v1373_v2 = vld [vmem:[%s1948_s6 + $0x38] sm:$0xff] }
 0x48e   : > { %1080 = vrot.lane.b32.xlu0 %v973_v37, %s1792_s9 }
 0x4e5   : > { %v1076_v4 = vpop.xlane.xlu0 %1075 }
 0x4e6   : > { %1773 = vrcp.f32 %v1076_v4  ;;  %v1372_v4 = vld [vmem:[%s1948_s6 + $0x30] sm:$0xff] }
 0x4ec   : > { %v1774_v7 = vpop.eup %1773 }
 0x4ed   : > { %v1143_v6 = vpop.xlane.xlu0 %1142  ;;  %v1078_v9 = vmul.f32 %v1774_v7, %v1768_v59  ;;  %v1378_v59 = vld [vmem:[%s1948_s6 + $0x60] sm:$0xff]  ;;  %v1371_v7 = vld [vmem:[%s1948_s6 + $0x28] sm:$0xff] }
 0x4ee   : > { %1775 = vrcp.f32 %v1143_v6  ;;  %1389 = vmatpush.msrb.mxu0 %v1378_v59 }
 0x4ef   : > { %1777 = vrcp.f32 %v1799_v35 }
 0x4f0   : > { %1390 = vmatpush.msrb.mxu0 %v1377_v61 }
 0x4f4   : > { %v1776_v12 = vpop.eup %1775 }
 0x4f5   : > { %v1145_v13 = vmul.f32 %v1776_v12, %v1770_v62  ;;  %v1778_v36 = vpop.eup %1777  ;;  %v1376_v62 = vld [vmem:[%s1948_s6 + $0x50] sm:$0xff] }
 0x4f6   : > { %v1297_v37 = vmul.f32 64.0, %v1778_v36  ;;  %vm1301_vm7 = vweird.f32 %v1778_v36  ;;  %1391 = vmatpush.msrb.mxu0 %v1376_v62 }
 0x4f8   : > { %v1298_v38 = vsub.f32 1.0, %v1297_v37  ;;  %1392 = vmatpush.msrb.mxu0 %v1375_v63 }
 0x4fa   : > { %v1299_v39 = vmul.f32 %v1778_v36, %v1298_v38  ;;  %1393 = vmatpush.msrb.mxu0 %v1374_v0 }
 0x4fc   : > { %v1300_v40 = vadd.f32 %v1778_v36, %v1299_v39  ;;  %1394 = vmatpush.msrb.mxu0 %v1373_v2 }
 0x4fe   : > { %v2113_v41 = vsel %vm1301_vm7, %v1778_v36, %v1300_v40  ;;  %1395 = vmatpush.msrb.mxu0 %v1372_v4 }
 0x500   : > { %v1081_v8 = vpop.permute.xlu0 %1080  ;;  %1396 = vmatpush.msrb.mxu0 %v1371_v7 }
 0x501   : > { %1101 = vmatpush.msrb.mxu2 %v1081_v8 }
 0x502   : > { %1641 = vmatmul.msk.f32.vlgmr.msrb.gmra.mxu2 %vm1004_vm4, %v1078_v9  ;;  %v1370_v9 = vld [vmem:[%s1948_s6 + $0x20] sm:$0xff] }
 0x503   : > { %1167 = vmatpush.msra.mxu2 %v1147_v10  ;;  %1397 = vmatpush.msrb.mxu0 %v1370_v9 }
 0x504   : > { %v1235_v11 = vpop.f32.mrf.mxu1 }
 0x505   : > { %1247 = vrot.lane.b32.xlu2 %v1235_v11, %s1798_s25  ;;  %1353 = vmatpush.msrb.mxu2 %v1337_v46  ;;  %v1369_v11 = vld [vmem:[%s1948_s6 + $0x18] sm:$0xff] }
 0x506   : > { %1398 = vmatpush.msrb.mxu0 %v1369_v11 }
 0x507   : > { %1354 = vmatpush.msrb.mxu2 %v1336_v47 }
 0x508   : > { %1399 = vmatpush.msrb.mxu0 %v1368_v19 }
 0x509   : > { %1355 = vmatpush.msrb.mxu2 %v1335_v48 }
 0x50a   : > { %1644 = vmatmul.msk.f32.vlgmr.msra.gmra.mxu2 %vm1004_vm4, %v1145_v13  ;;  %v1755_v13 = vld [vmem:[%s753_s7] ss:$0 sm:$0xff]  ;;  %1400 = vmatpush.msrb.mxu0 %v1367_v20 }
 0x50b   : > { %1356 = vmatpush.msrb.mxu2 %v1334_v49 }
 0x50c   : > { %1401 = vmatpush.msrb.mxu0 %v1366_v21 }
 0x50d   : > { %1357 = vmatpush.msrb.mxu2 %v1333_v50 }
 0x50f   : > { %1358 = vmatpush.msrb.mxu2 %v1332_v51 }
 0x511   : > { %1359 = vmatpush.msrb.mxu2 %v1331_v52 }
 0x513   : > { %1360 = vmatpush.msrb.mxu2 %v1330_v53 }
 0x55f   : > { %v1248_v27 = vpop.permute.xlu2 %1247 }
 0x585   : > { %v1103_v17 = vpop.f32.mrf.mxu2 }
 0x586   : > { %1239 = vrot.lane.b32.xlu0 %v1103_v17, %s1796_s24  ;;  %s2263_s24 = sld [smem:[#allocation14_spill]] (!%p1650_p5) }
 0x58d   : > { %v1169_v18 = vpop.f32.mrf.mxu2 }
 0x58e   : > { %1243 = vrot.lane.b32.xlu0 %v1169_v18, %s1794_s21 }
 0x5f8   : > { %v1240_v24 = vpop.permute.xlu0 %1239 }
 0x5f9   : > { %v1250_v25 = vsel %vm978_vm3, %v2079_v43, %v1240_v24 }
 0x600   : > { %v1244_v26 = vpop.permute.xlu0 %1243 }
 0x601   : > { %v1252_v28 = vsel %vm1251_vm5, %v1250_v25, %v1244_v26  ;;  %v1758_v26 = vld [vmem:[%s750_s19] ss:$0 sm:$0xff] }
 0x602   : > { %v1254_v29 = vsel %vm1253_vm6, %v1252_v28, %v1248_v27 }
 0x603   : > { %1648 = vmatmul.msk.f32.vlgmr.msrb.gmra.mxu3 %vm931_vm2, %v1254_v29 }
 0x686   : > { %v1287_v31 = vpop.f32.mrf.mxu3 }
 0x687   : > { %v1288_v32 = vadd.f32 %v1754_v30, %v1287_v31 }
 0x689   : > { %v1290_v33 = vadd.f32 %v1288_v32, %v2042_v5 }
 0x68b   : > { %v1293_v34 = vsel %vm931_vm2, %v1290_v33, 0.0 }
 0x68c   : > { %1294 = vadd.xlane.f32.xlu1 %v1293_v34 }
 0x6ff   : > { %v1295_v42 = vpop.xlane.xlu1 %1294 }
 0x700   : > { %v1303_v5 = vmul.f32 %v2113_v41, %v1295_v42 }
 0x702   : > { %v1304_v43 = vsub.f32 %v1290_v33, %v1303_v5 }
 0x704   : > { %v1305_v44 = vmul.f32 %v1304_v43, %v1304_v43 }
 0x706   : > { %v1306_v45 = vsel %vm931_vm2, %v1305_v44, 0.0 }
 0x707   : > { %1307 = vadd.xlane.f32.xlu0 %v1306_v45  ;;  %v1759_v45 = vld [vmem:[%s759_s2] ss:$0 sm:$0xff] }
 0x77a   : > { %v1308_v57 = vpop.xlane.xlu0 %1307 }
 0x77b   : > { %v1309_v58 = vmul.f32 %v1308_v57, %v2113_v41 }
 0x77d   : > { %v1310_v60 = vadd.f32 1e-05, %v1309_v58 }
 0x77f   : > { %1779 = vrsqrt.f32 %v1310_v60  ;;  %vm1317_vm9 = vweird.f32 %v1310_v60 }
 0x785   : > { %v1780_v1 = vpop.eup %1779 }
 0x786   : > { %v1312_v3 = vmul.f32 %v1780_v1, %v1310_v60  ;;  %vm1318_vm8 = vweird.f32 %v1780_v1 }
 0x787   : > { %vm1319_vm10 = vmor %vm1317_vm9, %vm1318_vm8 }
 0x788   : > { %v1313_v6 = vmul.f32 %v1780_v1, %v1312_v3 }
 0x78a   : > { %v1314_v8 = vmul.f32 0.5, %v1313_v6 }
 0x78c   : > { %v1315_v10 = vsub.f32 1.5, %v1314_v8 }
 0x78e   : > { %v1316_v12 = vmul.f32 %v1780_v1, %v1315_v10 }
 0x790   : > { %v1320_v14 = vsel %vm1319_vm10, %v1780_v1, %v1316_v12 }
 0x791   : > { %v1321_v15 = vmul.f32 %v1320_v14, %v1304_v43 }
 0x793   : > { %v1325_v17 = vmul.f32 %v1755_v13, %v1321_v15 }
 0x795   : > { %v1329_v18 = vadd.f32 %v1756_v16, %v1325_v17 }
 0x797   : > { %1649 = vmatmul.msk.f32.vlgmr.msrb.gmra.mxu2 %vm931_vm2, %v1329_v18 }
 0x81a   : > { %v1362_v23 = vpop.f32.mrf.mxu2 }
 0x81b   : > { %v1363_v24 = vadd.f32 %v1757_v22, %v1362_v23 }
 0x81d   : > { %v1365_v25 = vmax.f32 %v1363_v24, 0.0 }
 0x81f   : > { %1402 = vmatmul.f32.vlgmr.msrb.gmra.mxu0 %v1365_v25 }
 0x89c   : > { %v1403_v27 = vpop.f32.mrf.mxu0 }
 0x89d   : > { %v1404_v28 = vadd.f32 %v1758_v26, %v1403_v27 }
 0x89f   : > { %v1406_v29 = vadd.f32 %v1404_v28, %v1329_v18 }
 0x8a1   : > { %v1409_v30 = vsel %vm931_vm2, %v1406_v29, 0.0 }
 0x8a2   : > { %1410 = vadd.xlane.f32.xlu2 %v1409_v30 }
 0x915   : > { %v1411_v31 = vpop.xlane.xlu2 %1410 }
 0x916   : > { %v1412_v32 = vmul.f32 %v1411_v31, %v2113_v41 }
 0x918   : > { %v1413_v33 = vsub.f32 %v1406_v29, %v1412_v32 }
 0x91a   : > { %v1414_v34 = vmul.f32 %v1413_v33, %v1413_v33 }
 0x91c   : > { %v1415_v35 = vsel %vm931_vm2, %v1414_v34, 0.0 }
 0x91d   : > { %1416 = vadd.xlane.f32.xlu1 %v1415_v35 }
 0x990   : > { %v1417_v36 = vpop.xlane.xlu1 %1416 }
 0x991   : > { %v1418_v37 = vmul.f32 %v1417_v36, %v2113_v41  ;;  %v1760_v41 = vld [vmem:[%s2261_s3] ss:$0 sm:$0xff] }
 0x993   : > { %v1419_v38 = vadd.f32 1e-05, %v1418_v37 }
 0x995   : > { %1781 = vrsqrt.f32 %v1419_v38  ;;  %vm1426_vm12 = vweird.f32 %v1419_v38 }
 0x99b   : > { %v1782_v39 = vpop.eup %1781 }
 0x99c   : > { %v1421_v40 = vmul.f32 %v1782_v39, %v1419_v38  ;;  %vm1427_vm11 = vweird.f32 %v1782_v39 }
 0x99d   : > { %vm1428_vm13 = vmor %vm1426_vm12, %vm1427_vm11 }
 0x99e   : > { %v1422_v42 = vmul.f32 %v1782_v39, %v1421_v40 }
 0x9a0   : > { %v1423_v5 = vmul.f32 0.5, %v1422_v42 }
 0x9a2   : > { %v1424_v43 = vsub.f32 1.5, %v1423_v5 }
 0x9a4   : > { %v1425_v44 = vmul.f32 %v1782_v39, %v1424_v43 }
 0x9a6   : > { %v1429_v46 = vsel %vm1428_vm13, %v1782_v39, %v1425_v44 }
 0x9a7   : > { %v1430_v47 = vmul.f32 %v1429_v46, %v1413_v33 }
 0x9a9   : > { %v1434_v48 = vmul.f32 %v1759_v45, %v1430_v47  ;;  %1443 = sbr.rel (%p1650_p5) target bundleno = 2623 (0xa3f), region = 104 }
 0x9ab   : > { %v1438_v49 = vadd.f32 %v1760_v41, %v1434_v48 }
 0x9ad   : > { %1439 = vst.msk [vmem:[#allocation2] sm:$0xff] %vm931_vm2, %v1438_v49 }
 0x9ae   : > { %v1451_v50 = vld [vmem:[%s2262_s27 + $0x38] sm:$0xff]  ;;  %v1450_v51 = vld [vmem:[%s2262_s27 + $0x30] sm:$0xff]  ;;  %v1449_v52 = vld [vmem:[%s2262_s27 + $0x28] sm:$0xff] }
 0x9af   : > { %1467 = vmatpush.msra.mxu0 %v1451_v50  ;;  %v1448_v53 = vld [vmem:[%s2262_s27 + $0x20] sm:$0xff]  ;;  %v1447_v54 = vld [vmem:[%s2262_s27 + $0x18] sm:$0xff]  ;;  %v1446_v55 = vld [vmem:[%s2262_s27 + $0x10] sm:$0xff] }
 0x9b0   : > { %v1445_v56 = vld [vmem:[%s2262_s27 + $0x8] sm:$0xff]  ;;  %v1444_v57 = vld [vmem:[%s2262_s27] sm:$0xff] }
 0x9b1   : > { %1468 = vmatpush.msra.mxu0 %v1450_v51  ;;  %v1783_v58 = vld [vmem:[%s2263_s24] ss:$0 sm:$0xff] }
 0x9b3   : > { %1469 = vmatpush.msra.mxu0 %v1449_v52 }
 0x9b5   : > { %1470 = vmatpush.msra.mxu0 %v1448_v53 }
 0x9b7   : > { %1471 = vmatpush.msra.mxu0 %v1447_v54 }
 0x9b9   : > { %1472 = vmatpush.msra.mxu0 %v1446_v55 }
 0x9bb   : > { %1473 = vmatpush.msra.mxu0 %v1445_v56 }
 0x9bd   : > { %1474 = vmatpush.msra.mxu0 %v1444_v57 }
 0x9be   : > { %1651 = vmatmul.msk.f32.vlgmr.msra.gmra.mxu0 %vm931_vm2, %v1438_v49 }
 0xa3b   : > { %v1476_v59 = vpop.f32.mrf.mxu0 }
 0xa3c   : > { %v1477_v60 = vadd.f32 %v1783_v58, %v1476_v59 }
 0xa3e   : > { %1479 = vst [vmem:[%s2264_s23] sm:$0xff] %v1477_v60 }
 0xa3f PF: > { %s2265_s2 = sld [smem:[#allocation3_spill]] }
 0xa45   : > { %s29_s0 = sadd.s32 1, %s2265_s2  }
 0xa46   : > { %p26_p6 = scmp.ge.s32.totalorder %s29_s0, 4  }
 0xa48   :  { %28 = sbr.rel (!%p26_p6) target bundleno = 13 (0xd), region = 163 }

// kernel: _svort_forward.10
= control target key start
LH: loop header
LB: loop body
LE: loop exit
PB: predicated region body
PF: predicated region fallthrough
CT: control target
= control target key end

     0   :  { %s2605_s0 = inlined_call_operand.vmem [shape: bf16[8,256], index: 0, kind: input, shape index: {}]   ;;  %s2606_s1 = inlined_call_operand.vmem [shape: f32[8,16], index: 1, kind: input, shape index: {}]   ;;  %s2607_s2 = inlined_call_operand.vmem [shape: f32[8,16], index: 2, kind: input, shape index: {}]   ;;  %s2608_s3 = inlined_call_operand.vmem [shape: bf16[16,256], index: 3, kind: input, shape index: {}]   ;;  %s2609_s4 = inlined_call_operand.vmem [shape: bf16[256,64], index: 4, kind: input, shape index: {}]   ;;  %s2610_s5 = inlined_call_operand.vmem [shape: bf16[256,64], index: 5, kind: input, shape index: {}]   ;;  %s2611_s6 = inlined_call_operand.vmem [shape: f32[1,64], index: 6, kind: input, shape index: {}]   ;;  %s2612_s7 = inlined_call_operand.vmem [shape: f32[16,64], index: 7, kind: input, shape index: {}]   ;;  %s2613_s8 = inlined_call_operand.vmem [shape: f32[3,64,192], index: 8, kind: input, shape index: {}]   ;;  %s2614_s9 = inlined_call_operand.vmem [shape: f32[3,1,192], index: 9, kind: input, shape index: {}]   ;;  %s2615_s10 = inlined_call_operand.vmem [shape: f32[3,64,64], index: 10, kind: input, shape index: {}]   ;;  %s2616_s11 = inlined_call_operand.vmem [shape: f32[3,1,64], index: 11, kind: input, shape index: {}]   ;;  %s2617_s12 = inlined_call_operand.vmem [shape: f32[3,64,128], index: 12, kind: input, shape index: {}]   ;;  %s2618_s13 = inlined_call_operand.vmem [shape: f32[3,1,128], index: 13, kind: input, shape index: {}]   ;;  %s2619_s14 = inlined_call_operand.vmem [shape: f32[3,128,64], index: 14, kind: input, shape index: {}]   ;;  %s2620_s15 = inlined_call_operand.vmem [shape: f32[3,1,64], index: 15, kind: input, shape index: {}]   ;;  %s2621_s16 = inlined_call_operand.vmem [shape: f32[3,1,64], index: 16, kind: input, shape index: {}]   ;;  %s2622_s17 = inlined_call_operand.vmem [shape: f32[3,1,64], index: 17, kind: input, shape index: {}]   ;;  %s2623_s18 = inlined_call_operand.vmem [shape: f32[3,1,64], index: 18, kind: input, shape index: {}]   ;;  %s2624_s19 = inlined_call_operand.vmem [shape: f32[3,1,64], index: 19, kind: input, shape index: {}]   ;;  %s2625_s20 = inlined_call_operand.vmem [shape: f32[64,128], index: 20, kind: input, shape index: {}]   ;;  %s2626_s21 = inlined_call_operand.vmem [shape: f32[1,128], index: 21, kind: input, shape index: {}]   ;;  %s2627_s22 = inlined_call_operand.vmem [shape: f32[8,128], index: 22, kind: output, shape index: {}]  }
   0x1   :  { %2634 = sst [smem:[#allocation4_spill]] %s2605_s0 }
   0x2   :  { %2635 = sst [smem:[#allocation5_spill]] %s2606_s1 }
   0x3   :  { %2636 = sst [smem:[#allocation6_spill]] %s2607_s2 }
   0x4   :  { %2637 = sst [smem:[#allocation7_spill]] %s2608_s3  ;;  %s2232_s3 = smov 0  }
   0x5   :  { %2638 = sst [smem:[#allocation8_spill]] %s2609_s4 }
   0x6   :  { %2639 = sst [smem:[#allocation9_spill]] %s2610_s5 }
   0x7   :  { %2640 = sst [smem:[#allocation10_spill]] %s2611_s6 }
   0x8   :  { %2641 = sst [smem:[#allocation11_spill]] %s2612_s7 }
   0x9   :  { %2642 = sst [smem:[#allocation12_spill]] %s2613_s8 }
   0xa   :  { %2643 = sst [smem:[#allocation13_spill]] %s2614_s9 }
   0xb   :  { %2644 = sst [smem:[#allocation14_spill]] %s2615_s10 }
   0xc   :  { %2645 = sst [smem:[#allocation15_spill]] %s2617_s12 }
   0xd   :  { %2646 = sst [smem:[#allocation16_spill]] %s2625_s20 }
   0xe   :  { %2647 = sst [smem:[#allocation17_spill]] %s2626_s21 }
   0xf   :  { %2648 = sst [smem:[#allocation18_spill]] %s2627_s22 }
  0x10 LB: > { %2649 = sst [smem:[#allocation3_spill]] %s2107_s3  ;;  %s2238_s28 = sadd.s32 4294967295, %s2107_s3   ;;  %s2107_s3 = sphi %s2232_s3, %s32_s3  }
  0x11   : > { %p1858_p0 = scmp.ge.s32.totalorder %s2107_s3, 1  ;;  %p702_p1 = scmp.lt.s32.totalorder %s2107_s3, 4 }
  0x13   : > { %p703_p2 = pnand %p1858_p0, %p702_p1 }
  0x14   : > { %p799_p3 = scmp.lt.s32.totalorder (!%p703_p2), %s2238_s28, 2  ;;  %s2650_s8 = sld [smem:[#allocation12_spill]] (!%p703_p2) }
  0x15   : > { %706 = sbr.rel (%p703_p2) target bundleno = 2731 (0xaab), region = 108  ;;  %s2651_s9 = sld [smem:[#allocation13_spill]] (!%p703_p2) }
  0x16   : > { %s2652_s10 = sld [smem:[#allocation14_spill]] (!%p703_p2)  ;;  %p1868_p4 = scmp.ne.s32.totalorder (!%p703_p2), %s2238_s28, 0 }
  0x17   : > { %s2653_s12 = sld [smem:[#allocation15_spill]] (!%p703_p2) }
  0x1a   : > { %s2244_s29 = scalar_select %p799_p3, %s2238_s28, 2 }
  0x1b   : > { %s2654_s2 = sld [smem:[#allocation7_spill]] (!%p1868_p4) }
  0x1c   : > { %s1892_s30 = sshll.u32 %s2244_s29, 7  ;;  %s1861_s4 = sshll.u32 %s2244_s29, 1 }
  0x1d   : > { %s2251_s1 = scalar_lea.vmem %s2650_s8, %s1892_s30  ;;  %s2256_s6 = scalar_lea.vmem %s2651_s9, %s1861_s4 }
  0x1e   : > { %s1893_s25 = sshll.u32 %s2244_s29, 6  ;;  %s2280_s9 = scalar_lea.vmem %s2619_s14, %s1892_s30 }
  0x1f   : > { %s2266_s21 = scalar_lea.vmem %s2652_s10, %s1893_s25  ;;  %s2271_s0 = scalar_lea.vmem %s2653_s12, %s1893_s25 }
  0x20   : > { %s834_s10 = scalar_lea.vmem %s2621_s16, %s2244_s29  ;;  %s837_s25 = scalar_lea.vmem %s2622_s17, %s2244_s29 }
  0x21   : > { %847 = sbr.rel (%p1868_p4) target bundleno = 315 (0x13b), region = 112  ;;  %s2655_s20 = sld [smem:[#allocation8_spill]] (!%p1868_p4) }
  0x22   : > { %s2656_s12 = sld [smem:[#allocation6_spill]] (!%p1868_p4) }
  0x23   : > { %s2657_s8 = sld [smem:[#allocation9_spill]] (!%p1868_p4) }
  0x24   : > { %s2658_s4 = sld [smem:[#allocation11_spill]] (!%p1868_p4) }
  0x25   : > { %s2659_s5 = sld [smem:[#allocation4_spill]] (!%p1868_p4) }
  0x26   : > { %v917_v0 = vld [vmem:[%s2654_s2 + $0x8] sm:$0xff]  ;;  %v916_v1 = vld [vmem:[%s2654_s2] sm:$0xff]  ;;  %vm922_vm0 = vcmask 130048   ;;  %s2660_s24 = sld [smem:[#allocation5_spill]]  ;;  %vm1142_vm1 = vcmask 523264  }
  0x27   : > { %v920_v2 = vunpack.c.l.bf16 %v917_v0  ;;  %v921_v3 = vunpack.c.h.bf16 %v917_v0  ;;  %v918_v4 = vunpack.c.l.bf16 %v916_v1  ;;  %v919_v5 = vunpack.c.h.bf16 %v916_v1  ;;  %v2045_v6 = vld [vmem:[%s2655_s20 + $0x38] sm:$0xff]   ;;  %v2044_v10 = vld [vmem:[%s2655_s20 + $0x30] sm:$0xff]   ;;  %v2043_v23 = vld [vmem:[%s2655_s20 + $0x28] sm:$0xff]   ;;  %s2661_s23 = sld [smem:[#allocation10_spill]] }
  0x28   : > { %v2053_v7 = vld [vmem:[%s2655_s20 + $0x78] sm:$0xff]   ;;  %v1991_v8 = vunpack.c.h.bf16 %v2045_v6  ;;  %v2052_v11 = vld [vmem:[%s2655_s20 + $0x70] sm:$0xff]   ;;  %v915_v12 = vld [vmem:[%s2656_s12] sm:$0xff]  ;;  %v1990_v13 = vunpack.c.l.bf16 %v2045_v6  ;;  %v1987_v18 = vunpack.c.h.bf16 %v2044_v10  ;;  %v1986_v27 = vunpack.c.l.bf16 %v2044_v10 }
  0x29   : > { %v2023_v9 = vunpack.c.h.bf16 %v2053_v7  ;;  %940 = vmatpush.msra.mxu0 %v920_v2  ;;  %960 = vmatpush.msra.mxu1 %v921_v3  ;;  %v2022_v14 = vunpack.c.l.bf16 %v2053_v7  ;;  %v2030_v15 = vld [vmem:[%s2657_s8 + $0x38] sm:$0xff]   ;;  %v2019_v19 = vunpack.c.h.bf16 %v2052_v11  ;;  %v2029_v21 = vld [vmem:[%s2657_s8 + $0x30] sm:$0xff]   ;;  %v2051_v24 = vld [vmem:[%s2655_s20 + $0x68] sm:$0xff]   ;;  %v2018_v28 = vunpack.c.l.bf16 %v2052_v11 }
  0x2a   : > { %v2038_v16 = vld [vmem:[%s2657_s8 + $0x78] sm:$0xff]   ;;  %1030 = vmatpush.msra.mxu2 %v1991_v8  ;;  %v1927_v17 = vunpack.c.h.bf16 %v2030_v15  ;;  %v2037_v22 = vld [vmem:[%s2657_s8 + $0x70] sm:$0xff]   ;;  %v1926_v25 = vunpack.c.l.bf16 %v2030_v15  ;;  %v1923_v29 = vunpack.c.h.bf16 %v2029_v21  ;;  %v1983_v31 = vunpack.c.h.bf16 %v2043_v23  ;;  %v2028_v33 = vld [vmem:[%s2657_s8 + $0x28] sm:$0xff]  }
  0x2b   : > { %1050 = vmatpush.msra.mxu3 %v2023_v9  ;;  %941 = vmatpush.msra.mxu0 %v918_v4  ;;  %v1959_v20 = vunpack.c.h.bf16 %v2038_v16  ;;  %v1958_v26 = vunpack.c.l.bf16 %v2038_v16  ;;  %v1955_v30 = vunpack.c.h.bf16 %v2037_v22  ;;  %v2015_v32 = vunpack.c.h.bf16 %v2051_v24  ;;  %v2036_v34 = vld [vmem:[%s2657_s8 + $0x68] sm:$0xff]   ;;  %v2042_v35 = vld [vmem:[%s2655_s20 + $0x20] sm:$0xff]   ;;  %v2041_v47 = vld [vmem:[%s2655_s20 + $0x18] sm:$0xff]  }
  0x2c   : > { %961 = vmatpush.msra.mxu1 %v919_v5  ;;  %1869 = vmatmul.msk.f32.vlgmr.msra.gmra.mxu0 %vm922_vm0, %v915_v12  ;;  %v2050_v36 = vld [vmem:[%s2655_s20 + $0x60] sm:$0xff]   ;;  %v1922_v37 = vunpack.c.l.bf16 %v2029_v21  ;;  %v1954_v38 = vunpack.c.l.bf16 %v2037_v22  ;;  %v1982_v39 = vunpack.c.l.bf16 %v2043_v23  ;;  %v2014_v40 = vunpack.c.l.bf16 %v2051_v24  ;;  %v2049_v48 = vld [vmem:[%s2655_s20 + $0x58] sm:$0xff]   ;;  %v2040_v59 = vld [vmem:[%s2655_s20 + $0x10] sm:$0xff]  }
  0x2d   : > { %1870 = vmatmul.msk.f32.vlgmr.msra.gmra.mxu1 %vm922_vm0, %v915_v12  ;;  %1031 = vmatpush.msra.mxu2 %v1990_v13  ;;  %v1919_v41 = vunpack.c.h.bf16 %v2028_v33  ;;  %v1951_v42 = vunpack.c.h.bf16 %v2036_v34  ;;  %v1979_v43 = vunpack.c.h.bf16 %v2042_v35  ;;  %v2011_v44 = vunpack.c.h.bf16 %v2050_v36  ;;  %v2027_v45 = vld [vmem:[%s2657_s8 + $0x20] sm:$0xff]   ;;  %v2026_v57 = vld [vmem:[%s2657_s8 + $0x18] sm:$0xff]   ;;  %v2048_v60 = vld [vmem:[%s2655_s20 + $0x50] sm:$0xff]  }
  0x2e   : > { %1051 = vmatpush.msra.mxu3 %v2022_v14  ;;  %1070 = vmatpush.msrb.mxu0 %v1927_v17  ;;  %v2035_v46 = vld [vmem:[%s2657_s8 + $0x60] sm:$0xff]   ;;  %v1918_v49 = vunpack.c.l.bf16 %v2028_v33  ;;  %v1950_v50 = vunpack.c.l.bf16 %v2036_v34  ;;  %v1978_v51 = vunpack.c.l.bf16 %v2042_v35  ;;  %v2010_v52 = vunpack.c.l.bf16 %v2050_v36  ;;  %v2034_v58 = vld [vmem:[%s2657_s8 + $0x58] sm:$0xff]   ;;  %v2025_v5 = vld [vmem:[%s2657_s8 + $0x10] sm:$0xff]  }
  0x2f   : > { %1090 = vmatpush.msrb.mxu1 %v1959_v20  ;;  %1032 = vmatpush.msra.mxu2 %v1987_v18  ;;  %v1915_v53 = vunpack.c.h.bf16 %v2027_v45  ;;  %v1947_v54 = vunpack.c.h.bf16 %v2035_v46  ;;  %v1975_v55 = vunpack.c.h.bf16 %v2041_v47  ;;  %v2007_v56 = vunpack.c.h.bf16 %v2049_v48  ;;  %v2039_v6 = vld [vmem:[%s2655_s20 + $0x8] sm:$0xff]   ;;  %v1961_v15 = vld [vmem:[%s2655_s20] sm:$0xff]   ;;  %v2033_v21 = vld [vmem:[%s2657_s8 + $0x50] sm:$0xff]  }
  0x30   : > { %1052 = vmatpush.msra.mxu3 %v2019_v19  ;;  %1071 = vmatpush.msrb.mxu0 %v1926_v25  ;;  %v1914_v61 = vunpack.c.l.bf16 %v2027_v45  ;;  %v1946_v62 = vunpack.c.l.bf16 %v2035_v46  ;;  %v1974_v63 = vunpack.c.l.bf16 %v2041_v47  ;;  %v2006_v0 = vunpack.c.l.bf16 %v2049_v48  ;;  %v2047_v7 = vld [vmem:[%s2655_s20 + $0x48] sm:$0xff]   ;;  %v2046_v16 = vld [vmem:[%s2655_s20 + $0x40] sm:$0xff]  }
  0x31   : > { %1091 = vmatpush.msrb.mxu1 %v1958_v26  ;;  %1033 = vmatpush.msra.mxu2 %v1986_v27  ;;  %v1911_v1 = vunpack.c.h.bf16 %v2026_v57  ;;  %v1943_v2 = vunpack.c.h.bf16 %v2034_v58  ;;  %v1971_v3 = vunpack.c.h.bf16 %v2040_v59  ;;  %v2003_v4 = vunpack.c.h.bf16 %v2048_v60  ;;  %v2024_v26 = vld [vmem:[%s2657_s8 + $0x8] sm:$0xff]   ;;  %v1897_v34 = vld [vmem:[%s2657_s8] sm:$0xff]  }
  0x32   : > { %1053 = vmatpush.msra.mxu3 %v2018_v28  ;;  %1072 = vmatpush.msrb.mxu0 %v1923_v29  ;;  %v1910_v8 = vunpack.c.l.bf16 %v2026_v57  ;;  %v1942_v9 = vunpack.c.l.bf16 %v2034_v58  ;;  %v1970_v10 = vunpack.c.l.bf16 %v2040_v59  ;;  %v2002_v11 = vunpack.c.l.bf16 %v2048_v60  ;;  %v1112_v29 = vld [vmem:[%s2658_s4 + $0x8] sm:$0xff]  ;;  %v2031_v35 = vld [vmem:[%s2657_s8 + $0x40] sm:$0xff]  }
  0x33   : > { %1092 = vmatpush.msrb.mxu1 %v1955_v30  ;;  %1034 = vmatpush.msra.mxu2 %v1983_v31  ;;  %v1907_v12 = vunpack.c.h.bf16 %v2025_v5  ;;  %v1967_v13 = vunpack.c.h.bf16 %v2039_v6  ;;  %v1999_v14 = vunpack.c.h.bf16 %v2047_v7  ;;  %v1966_v17 = vunpack.c.l.bf16 %v2039_v6  ;;  %v2032_v31 = vld [vmem:[%s2657_s8 + $0x48] sm:$0xff]   ;;  %v1110_v46 = vld [vmem:[%s2660_s24] sm:$0xff] }
  0x34   : > { %1054 = vmatpush.msra.mxu3 %v2015_v32  ;;  %1073 = vmatpush.msrb.mxu0 %v1922_v37  ;;  %v1998_v18 = vunpack.c.l.bf16 %v2047_v7  ;;  %v1963_v19 = vunpack.c.h.bf16 %v1961_v15  ;;  %v1995_v20 = vunpack.c.h.bf16 %v2046_v16  ;;  %v1962_v22 = vunpack.c.l.bf16 %v1961_v15  ;;  %v1111_v32 = vld [vmem:[%s2658_s4] sm:$0xff] }
  0x35   : > { %1093 = vmatpush.msrb.mxu1 %v1954_v38  ;;  %1035 = vmatpush.msra.mxu2 %v1982_v39  ;;  %v1994_v23 = vunpack.c.l.bf16 %v2046_v16  ;;  %v1906_v24 = vunpack.c.l.bf16 %v2025_v5  ;;  %v1939_v25 = vunpack.c.h.bf16 %v2033_v21  ;;  %v1903_v27 = vunpack.c.h.bf16 %v2024_v26  ;;  %v848_v38 = vld [vmem:[%s2659_s5] sm:$0xff] }
  0x36   : > { %1055 = vmatpush.msra.mxu3 %v2014_v40  ;;  %1074 = vmatpush.msrb.mxu0 %v1919_v41  ;;  %v1938_v28 = vunpack.c.l.bf16 %v2033_v21  ;;  %v1902_v30 = vunpack.c.l.bf16 %v2024_v26  ;;  %v1935_v33 = vunpack.c.h.bf16 %v2032_v31  ;;  %v1899_v36 = vunpack.c.h.bf16 %v1897_v34 }
  0x37   : > { %1094 = vmatpush.msrb.mxu1 %v1951_v42  ;;  %1036 = vmatpush.msra.mxu2 %v1979_v43  ;;  %v1934_v37 = vunpack.c.l.bf16 %v2032_v31  ;;  %v1898_v39 = vunpack.c.l.bf16 %v1897_v34  ;;  %v1931_v40 = vunpack.c.h.bf16 %v2031_v35  ;;  %v849_v41 = vunpack.c.l.bf16 %v848_v38 }
  0x38   : > { %1056 = vmatpush.msra.mxu3 %v2011_v44  ;;  %1075 = vmatpush.msrb.mxu0 %v1918_v49  ;;  %v1930_v42 = vunpack.c.l.bf16 %v2031_v35  ;;  %v850_v43 = vunpack.c.h.bf16 %v848_v38 }
  0x39   : > { %1095 = vmatpush.msrb.mxu1 %v1950_v50  ;;  %1037 = vmatpush.msra.mxu2 %v1978_v51 }
  0x3a   : > { %1057 = vmatpush.msra.mxu3 %v2010_v52  ;;  %1076 = vmatpush.msrb.mxu0 %v1915_v53 }
  0x3b   : > { %1096 = vmatpush.msrb.mxu1 %v1947_v54  ;;  %1038 = vmatpush.msra.mxu2 %v1975_v55  ;;  %v2070_v54 = vld [vmem:[%s2661_s23] ss:$0 sm:$0xff] }
  0x3c   : > { %1058 = vmatpush.msra.mxu3 %v2007_v56  ;;  %1077 = vmatpush.msrb.mxu0 %v1914_v61 }
  0x3d   : > { %1097 = vmatpush.msrb.mxu1 %v1946_v62  ;;  %1039 = vmatpush.msra.mxu2 %v1974_v63 }
  0x3e   : > { %1059 = vmatpush.msra.mxu3 %v2006_v0  ;;  %1078 = vmatpush.msrb.mxu0 %v1911_v1 }
  0x3f   : > { %1098 = vmatpush.msrb.mxu1 %v1943_v2  ;;  %1040 = vmatpush.msra.mxu2 %v1971_v3 }
  0x40   : > { %1060 = vmatpush.msra.mxu3 %v2003_v4  ;;  %1079 = vmatpush.msrb.mxu0 %v1910_v8 }
  0x41   : > { %1099 = vmatpush.msrb.mxu1 %v1942_v9  ;;  %1041 = vmatpush.msra.mxu2 %v1970_v10 }
  0x42   : > { %1061 = vmatpush.msra.mxu3 %v2002_v11  ;;  %1080 = vmatpush.msrb.mxu0 %v1907_v12 }
  0x43   : > { %1042 = vmatpush.msra.mxu2 %v1967_v13  ;;  %1100 = vmatpush.msrb.mxu1 %v1939_v25 }
  0x44   : > { %1062 = vmatpush.msra.mxu3 %v1999_v14  ;;  %1081 = vmatpush.msrb.mxu0 %v1906_v24 }
  0x45   : > { %1043 = vmatpush.msra.mxu2 %v1966_v17  ;;  %1101 = vmatpush.msrb.mxu1 %v1938_v28 }
  0x46   : > { %1063 = vmatpush.msra.mxu3 %v1998_v18  ;;  %1082 = vmatpush.msrb.mxu0 %v1903_v27 }
  0x47   : > { %1044 = vmatpush.msra.mxu2 %v1963_v19  ;;  %1102 = vmatpush.msrb.mxu1 %v1935_v33 }
  0x48   : > { %1064 = vmatpush.msra.mxu3 %v1995_v20  ;;  %1083 = vmatpush.msrb.mxu0 %v1902_v30 }
  0x49   : > { %1045 = vmatpush.msra.mxu2 %v1962_v22  ;;  %1103 = vmatpush.msrb.mxu1 %v1934_v37 }
  0x4a   : > { %1065 = vmatpush.msra.mxu3 %v1994_v23  ;;  %1084 = vmatpush.msrb.mxu0 %v1899_v36 }
  0x4b   : > { %1130 = vmatpush.msrb.mxu2 %v1112_v29  ;;  %1104 = vmatpush.msrb.mxu1 %v1931_v40 }
  0x4c   : > { %1085 = vmatpush.msrb.mxu0 %v1898_v39 }
  0x4d   : > { %1131 = vmatpush.msrb.mxu2 %v1111_v32  ;;  %1086 = vmatmul.f32.vlgmr.msrb.gmra.mxu0 %v849_v41 }
  0x4e   : > { %1105 = vmatpush.msrb.mxu1 %v1930_v42 }
  0x4f   : > { %1106 = vmatmul.f32.vlgmr.msrb.gmra.mxu1 %v850_v43 }
  0xa9   : > { %v943_v44 = vpop.f32.mrf.mxu0 }
  0xaa   : > { %v963_v45 = vpop.f32.mrf.mxu1  ;;  %1046 = vmatmul.f32.vlgmr.msra.gmra.mxu2 %v943_v44 }
  0xab   : > { %1066 = vmatmul.f32.vlgmr.msra.gmra.mxu3 %v963_v45 }
  0xb2   : > { %1871 = vmatmul.msk.f32.vlgmr.msrb.gmra.mxu2 %vm922_vm0, %v1110_v46 }
  0xca   : > { %v1087_v47 = vpop.f32.mrf.mxu0 }
  0xcc   : > { %v1107_v52 = vpop.f32.mrf.mxu1 }
 0x12d   : > { %v1047_v48 = vpop.f32.mrf.mxu2 }
 0x12e   : > { %v1067_v49 = vpop.f32.mrf.mxu3 }
 0x12f   : > { %v1068_v50 = vadd.f32 %v1067_v49, %v1047_v48 }
 0x131   : > { %v1088_v51 = vadd.f32 %v1087_v47, %v1068_v50 }
 0x133   : > { %v1108_v53 = vadd.f32 %v1107_v52, %v1088_v51 }
 0x135   : > { %v1133_v55 = vpop.f32.mrf.mxu2 }
 0x136   : > { %v1136_v56 = vadd.f32 %v1133_v55, %v1108_v53 }
 0x138   : > { %v1141_v57 = vadd.f32 %v2070_v54, %v1136_v56 }
 0x13a   : > { %1143 = vst.msk [vmem:[#allocation2] sm:$0xff] %vm1142_vm1, %v1141_v57 }
 0x13b PF: > { %v1159_v58 = vld [vmem:[%s2251_s1 + $0x70] sm:$0xff]  ;;  %v1157_v59 = vld [vmem:[%s2251_s1 + $0x60] sm:$0xff]  ;;  %vm1167_vm2 = vcmask 523264   ;;  %s2109_s3 = smov 112   ;;  %s2110_s12 = smov 64   ;;  %vm1214_vm3 = vcmask 130048  }
 0x13c   : > { %1179 = vmatpush.msra.mxu1 %v1159_v58  ;;  %v1155_v60 = vld [vmem:[%s2251_s1 + $0x50] sm:$0xff]  ;;  %v1153_v61 = vld [vmem:[%s2251_s1 + $0x40] sm:$0xff]  ;;  %s2111_s7 = smov 32   ;;  %s2112_s5 = smov 96   ;;  %v1160_v13 = vld [vmem:[%s2251_s1 + $0x78] sm:$0xff]  ;;  %vm1240_vm4 = vcmask 64512  }
 0x13d   : > { %v1151_v62 = vld [vmem:[%s2251_s1 + $0x30] sm:$0xff]  ;;  %v1149_v63 = vld [vmem:[%s2251_s1 + $0x20] sm:$0xff]  ;;  %s2113_s22 = smov 16   ;;  %v1158_v14 = vld [vmem:[%s2251_s1 + $0x68] sm:$0xff]  ;;  %s2115_s30 = smov 48   ;;  %vm1487_vm5 = vcmask 261120  }
 0x13e   : > { %1180 = vmatpush.msra.mxu1 %v1157_v59  ;;  %v1147_v0 = vld [vmem:[%s2251_s1 + $0x10] sm:$0xff]  ;;  %v1145_v1 = vld [vmem:[%s2251_s1] sm:$0xff]  ;;  %v1156_v15 = vld [vmem:[%s2251_s1 + $0x58] sm:$0xff]  ;;  %vm1489_vm6 = vcmask 392192   ;;  %s2662_s26 = scalar_lea.vmem %s2616_s11, %s2244_s29  ;;  %s2666_s24 = scalar_lea.vmem %s2624_s19, %s2244_s29 }
 0x13f   : > { %v2439_v3 = vld [vmem:[%s2256_s6] sm:$0x3]  ;;  %s2114_s6 = smov 80   ;;  %v1154_v16 = vld [vmem:[%s2251_s1 + $0x48] sm:$0xff]  ;;  %v1152_v23 = vld [vmem:[%s2251_s1 + $0x38] sm:$0xff]  ;;  %p1888_p5 = scmp.ne.s32.totalorder %s2238_s28, 2 }
 0x140   : > { %1181 = vmatpush.msra.mxu1 %v1155_v60  ;;  %v1163_v4 = vperm.slane %v2439_v3, 0  ;;  %v1150_v24 = vld [vmem:[%s2251_s1 + $0x28] sm:$0xff]  ;;  %v1148_v25 = vld [vmem:[%s2251_s1 + $0x18] sm:$0xff]  ;;  %v1164_v32 = vperm.slane %v2439_v3, 1  ;;  %s2669_s23 = sld [smem:[#allocation18_spill]] (!%p1888_p5) }
 0x141   : > { %v2434_v2 = vld [vmem:[#allocation2] sm:$0xff]  ;;  %v1146_v26 = vld [vmem:[%s2251_s1 + $0x8] sm:$0xff] }
 0x142   : > { %1182 = vmatpush.msra.mxu1 %v1153_v61 }
 0x144   : > { %1183 = vmatpush.msra.mxu1 %v1151_v62 }
 0x146   : > { %1184 = vmatpush.msra.mxu1 %v1149_v63 }
 0x148   : > { %1185 = vmatpush.msra.mxu1 %v1147_v0 }
 0x14a   : > { %1186 = vmatpush.msra.mxu1 %v1145_v1 }
 0x14b   : > { %1872 = vmatmul.msk.f32.vlgmr.msra.gmra.mxu1 %vm1167_vm2, %v2434_v2 }
 0x14c   : > { %1199 = vmatpush.msrb.mxu1 %v1160_v13  ;;  %v1496_v13 = vld [vmem:[%s2266_s21 + $0x28] sm:$0xff] }
 0x14e   : > { %1200 = vmatpush.msrb.mxu1 %v1158_v14 }
 0x150   : > { %1201 = vmatpush.msrb.mxu1 %v1156_v15 }
 0x152   : > { %1202 = vmatpush.msrb.mxu1 %v1154_v16  ;;  %v1495_v16 = vld [vmem:[%s2266_s21 + $0x20] sm:$0xff] }
 0x154   : > { %1203 = vmatpush.msrb.mxu1 %v1152_v23 }
 0x156   : > { %1204 = vmatpush.msrb.mxu1 %v1150_v24 }
 0x158   : > { %1205 = vmatpush.msrb.mxu1 %v1148_v25 }
 0x15a   : > { %1206 = vmatpush.msrb.mxu1 %v1146_v26 }
 0x15b   : > { %1873 = vmatmul.msk.f32.vlgmr.msrb.gmra.mxu1 %vm1167_vm2, %v2434_v2 }
 0x1c8   : > { %v1188_v5 = vpop.f32.mrf.mxu1 }
 0x1c9   : > { %v1189_v6 = vadd.f32 %v1188_v5, %v1163_v4 }
 0x1cb   : > { %1275 = vrot.lane.b32.xlu2 %v1189_v6, %s2109_s3  ;;  %1212 = vrot.lane.b32.xlu0 %v1189_v6, %s2110_s12  ;;  %s2663_s12 = scalar_lea.vmem %s2618_s13, %s2244_s29 }
 0x1d3   : > { %1344 = vrot.lane.b32.xlu2 %v1189_v6, %s2111_s7 }
 0x1d8   : > { %v1208_v33 = vpop.f32.mrf.mxu1 }
 0x1d9   : > { %v1209_v34 = vadd.f32 %v1208_v33, %v1164_v32  ;;  %v2116_v32 = vmov 64.0  }
 0x1db   : > { %1342 = vrot.lane.b32.xlu2 %v1189_v6, %s2112_s5  ;;  %1270 = vmatpush.msra.mxu3 %v1209_v34 }
 0x1e3   : > { %1410 = vrot.lane.b32.xlu2 %v1189_v6, %s2113_s22 }
 0x1eb   : > { %1408 = vrot.lane.b32.xlu2 %v1189_v6, %s2114_s6 }
 0x225   : > { %v1276_v7 = vpop.permute.xlu2 %1275 }
 0x22d   : > { %v1345_v8 = vpop.permute.xlu2 %1344 }
 0x235   : > { %v1343_v9 = vpop.permute.xlu2 %1342 }
 0x23d   : > { %v1411_v10 = vpop.permute.xlu2 %1410  ;;  %v1213_v11 = vpop.permute.xlu0 %1212 }
 0x23e   : > { %1874 = vmatpush.xpose.msk.msra.mxu2 %vm1214_vm3, %v1213_v11  ;;  %1883 = vmatpush.xpose.msk.msra.mxu0 %vm1214_vm3, %v1411_v10  ;;  %v1498_v11 = vld [vmem:[%s2266_s21 + $0x38] sm:$0xff] }
 0x241   : > { %1875 = vmatmul.msk.f32.vlgmr.msra.gmra.mxu2 %vm1214_vm3, %v1189_v6 }
 0x245   : > { %v1409_v12 = vpop.permute.xlu2 %1408 }
 0x246   : > { %1884 = vmatmul.msk.f32.vlgmr.msra.gmra.mxu0 %vm1214_vm3, %v1409_v12  ;;  %v1497_v12 = vld [vmem:[%s2266_s21 + $0x30] sm:$0xff] }
 0x2c3   : > { %v1433_v20 = vpop.f32.mrf.mxu0 }
 0x2c4   : > { %v1236_v17 = vpop.f32.mrf.mxu2  ;;  %v1436_v21 = vmul.f32 0.25, %v1433_v20  ;;  %v1491_v20 = vld [vmem:[%s2266_s21] sm:$0xff] }
 0x2c5   : > { %v1239_v18 = vmul.f32 0.25, %v1236_v17  ;;  %v1494_v17 = vld [vmem:[%s2266_s21 + $0x18] sm:$0xff] }
 0x2c6   : > { %v1437_v22 = vsel %vm1240_vm4, %v1436_v21, -inf }
 0x2c7   : > { %v1241_v19 = vsel %vm1240_vm4, %v1239_v18, -inf }
 0x2c8   : > { %1242 = vmax.xlane.f32.xlu0 %v1241_v19  ;;  %v1492_v19 = vld [vmem:[%s2266_s21 + $0x8] sm:$0xff] }
 0x2d0   : > { %1438 = vmax.xlane.f32.xlu0 %v1437_v22 }
 0x33b   : > { %v1243_v27 = vpop.xlane.xlu0 %1242 }
 0x33c   : > { %v1244_v28 = vsub.f32 %v1239_v18, %v1243_v27  ;;  %v1493_v18 = vld [vmem:[%s2266_s21 + $0x10] sm:$0xff]  ;;  %v2071_v27 = vld [vmem:[%s2662_s26] ss:$0 sm:$0xff]  ;;  %s2668_s26 = sld [smem:[#allocation17_spill]] (!%p1888_p5) }
 0x33e   : > { %v1245_v29 = vmul.f32 1.442695, %v1244_v28 }
 0x340   : > { %2078 = vpow2.f32 %v1245_v29 }
 0x343   : > { %v1439_v39 = vpop.xlane.xlu0 %1438 }
 0x344   : > { %v1440_v41 = vsub.f32 %v1436_v21, %v1439_v39 }
 0x346   : > { %v2079_v30 = vpop.eup %2078  ;;  %v1441_v42 = vmul.f32 1.442695, %v1440_v41 }
 0x347   : > { %v1247_v31 = vsel %vm1240_vm4, %v2079_v30, 0.0 }
 0x348   : > { %1248 = vadd.xlane.f32.xlu1 %v1247_v31 }
 0x361   : > { %1277 = vrot.lane.b32.xlu1 %v1189_v6, %s2115_s30 }
 0x3bb   : > { %v1249_v35 = vpop.xlane.xlu1 %1248 }
 0x3bc   : > { %2080 = vrcp.f32 %v1249_v35 }
 0x3bd   : > { %2082 = vpow2.f32 %v1441_v42 }
 0x3c2   : > { %v2081_v36 = vpop.eup %2080 }
 0x3c3   : > { %v1251_v37 = vmul.f32 %v2081_v36, %v2079_v30  ;;  %v2083_v46 = vpop.eup %2082 }
 0x3c4   : > { %v1443_v50 = vsel %vm1240_vm4, %v2083_v46, 0.0 }
 0x3c5   : > { %1876 = vmatmul.msk.f32.vlgmr.msra.gmra.mxu3 %vm1240_vm4, %v1251_v37 }
 0x3d3   : > { %v1278_v38 = vpop.permute.xlu1 %1277 }
 0x3d4   : > { %1877 = vmatpush.xpose.msk.msrb.mxu3 %vm1214_vm3, %v1278_v38 }
 0x3d7   : > { %1878 = vmatmul.msk.f32.vlgmr.msrb.gmra.mxu3 %vm1214_vm3, %v1276_v7 }
 0x3d8   : > { %1880 = vmatpush.xpose.msk.msra.mxu3 %vm1214_vm3, %v1345_v8 }
 0x3dc   : > { %1514 = vmatpush.msrb.mxu3 %v1498_v11 }
 0x3de   : > { %1515 = vmatpush.msrb.mxu3 %v1497_v12 }
 0x3df   : > { %1881 = vmatmul.msk.f32.vlgmr.msra.gmra.mxu3 %vm1214_vm3, %v1343_v9 }
 0x3e0   : > { %1516 = vmatpush.msrb.mxu3 %v1496_v13  ;;  %v2073_v13 = vld [vmem:[%s837_s25] ss:$0 sm:$0xff] }
 0x3e2   : > { %1517 = vmatpush.msrb.mxu3 %v1495_v16  ;;  %v1604_v16 = vld [vmem:[%s2280_s9 + $0x10] sm:$0xff] }
 0x3e4   : > { %1518 = vmatpush.msrb.mxu3 %v1494_v17  ;;  %v1603_v17 = vld [vmem:[%s2280_s9 + $0x8] sm:$0xff] }
 0x3e6   : > { %1519 = vmatpush.msrb.mxu3 %v1493_v18  ;;  %v1602_v18 = vld [vmem:[%s2280_s9] sm:$0xff] }
 0x3e8   : > { %1520 = vmatpush.msrb.mxu3 %v1492_v19  ;;  %v2074_v19 = vld [vmem:[%s2663_s12] ss:$0 sm:$0xff] }
 0x3ea   : > { %1521 = vmatpush.msrb.mxu3 %v1491_v20 }
 0x448   : > { %v2471_v40 = vpop.f32.mrf.mxu3 }
 0x45a   : > { %v1300_v43 = vpop.f32.mrf.mxu3 }
 0x45b   : > { %v1303_v44 = vmul.f32 0.25, %v1300_v43  ;;  %v1573_v43 = vld [vmem:[%s2271_s0 + $0x38] sm:$0xff] }
 0x45d   : > { %v1304_v45 = vsel %vm1240_vm4, %v1303_v44, -inf }
 0x45e   : > { %1305 = vmax.xlane.f32.xlu1 %v1304_v45  ;;  %v1571_v45 = vld [vmem:[%s2271_s0 + $0x28] sm:$0xff] }
 0x462   : > { %v1367_v47 = vpop.f32.mrf.mxu3 }
 0x463   : > { %v1370_v48 = vmul.f32 0.25, %v1367_v47  ;;  %v1569_v47 = vld [vmem:[%s2271_s0 + $0x18] sm:$0xff] }
 0x465   : > { %v1371_v49 = vsel %vm1240_vm4, %v1370_v48, -inf }
 0x466   : > { %1372 = vmax.xlane.f32.xlu2 %v1371_v49  ;;  %1444 = vadd.xlane.f32.xlu1 %v1443_v50  ;;  %v1567_v49 = vld [vmem:[%s2271_s0 + $0x8] sm:$0xff]  ;;  %v1566_v50 = vld [vmem:[%s2271_s0] sm:$0xff] }
 0x47e   : > { %1382 = vrot.lane.b32.xlu2 %v1209_v34, %s2112_s5  ;;  %s2664_s5 = scalar_lea.vmem %s2620_s15, %s2244_s29 }
 0x47f   : > { %1448 = vrot.lane.b32.xlu1 %v1209_v34, %s2114_s6  ;;  %s2665_s6 = scalar_lea.vmem %s2623_s18, %s2244_s29 }
 0x4d1   : > { %v1306_v51 = vpop.xlane.xlu1 %1305 }
 0x4d2   : > { %v1307_v52 = vsub.f32 %v1303_v44, %v1306_v51  ;;  %v1572_v44 = vld [vmem:[%s2271_s0 + $0x30] sm:$0xff]  ;;  %v1617_v51 = vld [vmem:[%s2280_s9 + $0x78] sm:$0xff] }
 0x4d3   : > { %1622 = vmatpush.msrb.mxu0 %v1617_v51 }
 0x4d4   : > { %v1308_v53 = vmul.f32 1.442695, %v1307_v52  ;;  %v1616_v52 = vld [vmem:[%s2280_s9 + $0x70] sm:$0xff] }
 0x4d5   : > { %1623 = vmatpush.msrb.mxu0 %v1616_v52 }
 0x4d6   : > { %2084 = vpow2.f32 %v1308_v53  ;;  %v1615_v53 = vld [vmem:[%s2280_s9 + $0x68] sm:$0xff] }
 0x4d7   : > { %1624 = vmatpush.msrb.mxu0 %v1615_v53 }
 0x4d9   : > { %v1373_v54 = vpop.xlane.xlu2 %1372  ;;  %v1445_v60 = vpop.xlane.xlu1 %1444 }
 0x4da   : > { %v1374_v55 = vsub.f32 %v1370_v48, %v1373_v54  ;;  %v1568_v48 = vld [vmem:[%s2271_s0 + $0x10] sm:$0xff] }
 0x4dc   : > { %v2085_v56 = vpop.eup %2084  ;;  %v1375_v57 = vmul.f32 1.442695, %v1374_v55 }
 0x4dd   : > { %v1310_v58 = vsel %vm1240_vm4, %v2085_v56, 0.0 }
 0x4de   : > { %2086 = vpow2.f32 %v1375_v57  ;;  %1311 = vadd.xlane.f32.xlu0 %v1310_v58  ;;  %v1613_v58 = vld [vmem:[%s2280_s9 + $0x58] sm:$0xff] }
 0x4df   : > { %2088 = vrcp.f32 %v1445_v60  ;;  %v1611_v60 = vld [vmem:[%s2280_s9 + $0x48] sm:$0xff] }
 0x4e1   : > { %v1383_v7 = vpop.permute.xlu2 %1382 }
 0x4e4   : > { %v2087_v59 = vpop.eup %2086 }
 0x4e5   : > { %v1377_v61 = vsel %vm1240_vm4, %v2087_v59, 0.0  ;;  %v2089_v62 = vpop.eup %2088 }
 0x4e6   : > { %1378 = vadd.xlane.f32.xlu0 %v1377_v61  ;;  %v1447_v63 = vmul.f32 %v2089_v62, %v2083_v46  ;;  %v1570_v46 = vld [vmem:[%s2271_s0 + $0x20] sm:$0xff]  ;;  %s2667_s0 = sld [smem:[#allocation16_spill]] (!%p1888_p5) }
 0x4e7   : > { %v1610_v61 = vld [vmem:[%s2280_s9 + $0x40] sm:$0xff] }
 0x4f1   : > { %v1449_v0 = vpop.permute.xlu1 %1448 }
 0x4f2   : > { %1469 = vmatpush.msra.mxu1 %v1449_v0 }
 0x4f3   : > { %1885 = vmatmul.msk.f32.vlgmr.msra.gmra.mxu1 %vm1240_vm4, %v1447_v63  ;;  %v1609_v63 = vld [vmem:[%s2280_s9 + $0x38] sm:$0xff] }
 0x4fa   : > { %1316 = vrot.lane.b32.xlu0 %v1209_v34, %s2109_s3 }
 0x551   : > { %v1312_v1 = vpop.xlane.xlu0 %1311 }
 0x552   : > { %2090 = vrcp.f32 %v1312_v1  ;;  %v1608_v1 = vld [vmem:[%s2280_s9 + $0x30] sm:$0xff] }
 0x558   : > { %v2091_v4 = vpop.eup %2090 }
 0x559   : > { %v1379_v3 = vpop.xlane.xlu0 %1378  ;;  %v1314_v6 = vmul.f32 %v2091_v4, %v2085_v56  ;;  %v1614_v56 = vld [vmem:[%s2280_s9 + $0x60] sm:$0xff]  ;;  %v1607_v4 = vld [vmem:[%s2280_s9 + $0x28] sm:$0xff] }
 0x55a   : > { %2092 = vrcp.f32 %v1379_v3  ;;  %1625 = vmatpush.msrb.mxu0 %v1614_v56 }
 0x55b   : > { %2094 = vrcp.f32 %v2116_v32 }
 0x55c   : > { %1626 = vmatpush.msrb.mxu0 %v1613_v58 }
 0x560   : > { %v2093_v9 = vpop.eup %2092 }
 0x561   : > { %v1381_v10 = vmul.f32 %v2093_v9, %v2087_v59  ;;  %v2095_v33 = vpop.eup %2094  ;;  %v1612_v59 = vld [vmem:[%s2280_s9 + $0x50] sm:$0xff] }
 0x562   : > { %v1533_v34 = vmul.f32 64.0, %v2095_v33  ;;  %vm1537_vm7 = vweird.f32 %v2095_v33  ;;  %1627 = vmatpush.msrb.mxu0 %v1612_v59 }
 0x564   : > { %v1534_v35 = vsub.f32 1.0, %v1533_v34  ;;  %1628 = vmatpush.msrb.mxu0 %v1611_v60 }
 0x566   : > { %v1535_v36 = vmul.f32 %v2095_v33, %v1534_v35  ;;  %1629 = vmatpush.msrb.mxu0 %v1610_v61 }
 0x568   : > { %v1536_v37 = vadd.f32 %v2095_v33, %v1535_v36  ;;  %1630 = vmatpush.msrb.mxu0 %v1609_v63 }
 0x56a   : > { %v2505_v38 = vsel %vm1537_vm7, %v2095_v33, %v1536_v37  ;;  %1631 = vmatpush.msrb.mxu0 %v1608_v1 }
 0x56c   : > { %v1317_v5 = vpop.permute.xlu0 %1316  ;;  %1632 = vmatpush.msrb.mxu0 %v1607_v4 }
 0x56d   : > { %1337 = vmatpush.msrb.mxu2 %v1317_v5 }
 0x56e   : > { %1879 = vmatmul.msk.f32.vlgmr.msrb.gmra.mxu2 %vm1240_vm4, %v1314_v6  ;;  %v1606_v6 = vld [vmem:[%s2280_s9 + $0x20] sm:$0xff] }
 0x56f   : > { %1403 = vmatpush.msra.mxu2 %v1383_v7  ;;  %1633 = vmatpush.msrb.mxu0 %v1606_v6 }
 0x570   : > { %v1471_v8 = vpop.f32.mrf.mxu1 }
 0x571   : > { %1483 = vrot.lane.b32.xlu2 %v1471_v8, %s2115_s30  ;;  %1589 = vmatpush.msrb.mxu2 %v1573_v43  ;;  %v1605_v8 = vld [vmem:[%s2280_s9 + $0x18] sm:$0xff] }
 0x572   : > { %1634 = vmatpush.msrb.mxu0 %v1605_v8 }
 0x573   : > { %1590 = vmatpush.msrb.mxu2 %v1572_v44 }
 0x574   : > { %1635 = vmatpush.msrb.mxu0 %v1604_v16 }
 0x575   : > { %1591 = vmatpush.msrb.mxu2 %v1571_v45 }
 0x576   : > { %1882 = vmatmul.msk.f32.vlgmr.msra.gmra.mxu2 %vm1240_vm4, %v1381_v10  ;;  %v2072_v10 = vld [vmem:[%s834_s10] ss:$0 sm:$0xff]  ;;  %1636 = vmatpush.msrb.mxu0 %v1603_v17 }
 0x577   : > { %1592 = vmatpush.msrb.mxu2 %v1570_v46 }
 0x578   : > { %1637 = vmatpush.msrb.mxu0 %v1602_v18 }
 0x579   : > { %1593 = vmatpush.msrb.mxu2 %v1569_v47 }
 0x57b   : > { %1594 = vmatpush.msrb.mxu2 %v1568_v48 }
 0x57d   : > { %1595 = vmatpush.msrb.mxu2 %v1567_v49 }
 0x57f   : > { %1596 = vmatpush.msrb.mxu2 %v1566_v50 }
 0x5cb   : > { %v1484_v24 = vpop.permute.xlu2 %1483 }
 0x5f1   : > { %v1339_v14 = vpop.f32.mrf.mxu2 }
 0x5f2   : > { %1475 = vrot.lane.b32.xlu0 %v1339_v14, %s2113_s22 }
 0x5f9   : > { %v1405_v15 = vpop.f32.mrf.mxu2 }
 0x5fa   : > { %1479 = vrot.lane.b32.xlu0 %v1405_v15, %s2111_s7 }
 0x664   : > { %v1476_v21 = vpop.permute.xlu0 %1475 }
 0x665   : > { %v1486_v22 = vsel %vm1214_vm3, %v2471_v40, %v1476_v21 }
 0x66c   : > { %v1480_v23 = vpop.permute.xlu0 %1479 }
 0x66d   : > { %v1488_v25 = vsel %vm1487_vm5, %v1486_v22, %v1480_v23  ;;  %v2075_v23 = vld [vmem:[%s2664_s5] ss:$0 sm:$0xff] }
 0x66e   : > { %v1490_v26 = vsel %vm1489_vm6, %v1488_v25, %v1484_v24 }
 0x66f   : > { %1886 = vmatmul.msk.f32.vlgmr.msrb.gmra.mxu3 %vm1167_vm2, %v1490_v26 }
 0x6f2   : > { %v1523_v28 = vpop.f32.mrf.mxu3 }
 0x6f3   : > { %v1524_v29 = vadd.f32 %v2071_v27, %v1523_v28 }
 0x6f5   : > { %v1526_v30 = vadd.f32 %v1524_v29, %v2434_v2 }
 0x6f7   : > { %v1529_v31 = vsel %vm1167_vm2, %v1526_v30, 0.0 }
 0x6f8   : > { %1530 = vadd.xlane.f32.xlu1 %v1529_v31 }
 0x76b   : > { %v1531_v39 = vpop.xlane.xlu1 %1530 }
 0x76c   : > { %v1539_v2 = vmul.f32 %v2505_v38, %v1531_v39 }
 0x76e   : > { %v1540_v40 = vsub.f32 %v1526_v30, %v1539_v2 }
 0x770   : > { %v1541_v41 = vmul.f32 %v1540_v40, %v1540_v40 }
 0x772   : > { %v1542_v42 = vsel %vm1167_vm2, %v1541_v41, 0.0 }
 0x773   : > { %1543 = vadd.xlane.f32.xlu0 %v1542_v42  ;;  %v2076_v42 = vld [vmem:[%s2665_s6] ss:$0 sm:$0xff] }
 0x7e6   : > { %v1544_v54 = vpop.xlane.xlu0 %1543 }
 0x7e7   : > { %v1545_v55 = vmul.f32 %v1544_v54, %v2505_v38 }
 0x7e9   : > { %v1546_v57 = vadd.f32 1e-05, %v1545_v55 }
 0x7eb   : > { %2096 = vrsqrt.f32 %v1546_v57  ;;  %vm1553_vm9 = vweird.f32 %v1546_v57 }
 0x7f1   : > { %v2097_v62 = vpop.eup %2096 }
 0x7f2   : > { %v1548_v0 = vmul.f32 %v2097_v62, %v1546_v57  ;;  %vm1554_vm8 = vweird.f32 %v2097_v62 }
 0x7f3   : > { %vm1555_vm10 = vmor %vm1553_vm9, %vm1554_vm8 }
 0x7f4   : > { %v1549_v3 = vmul.f32 %v2097_v62, %v1548_v0 }
 0x7f6   : > { %v1550_v5 = vmul.f32 0.5, %v1549_v3 }
 0x7f8   : > { %v1551_v7 = vsub.f32 1.5, %v1550_v5 }
 0x7fa   : > { %v1552_v9 = vmul.f32 %v2097_v62, %v1551_v7 }
 0x7fc   : > { %v1556_v11 = vsel %vm1555_vm10, %v2097_v62, %v1552_v9 }
 0x7fd   : > { %v1557_v12 = vmul.f32 %v1556_v11, %v1540_v40 }
 0x7ff   : > { %v1561_v14 = vmul.f32 %v2072_v10, %v1557_v12 }
 0x801   : > { %v1565_v15 = vadd.f32 %v2073_v13, %v1561_v14 }
 0x803   : > { %1887 = vmatmul.msk.f32.vlgmr.msrb.gmra.mxu2 %vm1167_vm2, %v1565_v15 }
 0x886   : > { %v1598_v20 = vpop.f32.mrf.mxu2 }
 0x887   : > { %v1599_v21 = vadd.f32 %v2074_v19, %v1598_v20 }
 0x889   : > { %v1601_v22 = vmax.f32 %v1599_v21, 0.0 }
 0x88b   : > { %1638 = vmatmul.f32.vlgmr.msrb.gmra.mxu0 %v1601_v22 }
 0x908   : > { %v1639_v24 = vpop.f32.mrf.mxu0 }
 0x909   : > { %v1640_v25 = vadd.f32 %v2075_v23, %v1639_v24 }
 0x90b   : > { %v1642_v26 = vadd.f32 %v1640_v25, %v1565_v15 }
 0x90d   : > { %v1645_v27 = vsel %vm1167_vm2, %v1642_v26, 0.0 }
 0x90e   : > { %1646 = vadd.xlane.f32.xlu2 %v1645_v27 }
 0x981   : > { %v1647_v28 = vpop.xlane.xlu2 %1646 }
 0x982   : > { %v1648_v29 = vmul.f32 %v1647_v28, %v2505_v38 }
 0x984   : > { %v1649_v30 = vsub.f32 %v1642_v26, %v1648_v29 }
 0x986   : > { %v1650_v31 = vmul.f32 %v1649_v30, %v1649_v30 }
 0x988   : > { %v1651_v32 = vsel %vm1167_vm2, %v1650_v31, 0.0 }
 0x989   : > { %1652 = vadd.xlane.f32.xlu1 %v1651_v32 }
 0x9fc   : > { %v1653_v33 = vpop.xlane.xlu1 %1652 }
 0x9fd   : > { %v1654_v34 = vmul.f32 %v1653_v33, %v2505_v38  ;;  %v2077_v38 = vld [vmem:[%s2666_s24] ss:$0 sm:$0xff] }
 0x9ff   : > { %v1655_v35 = vadd.f32 1e-05, %v1654_v34 }
 0xa01   : > { %2098 = vrsqrt.f32 %v1655_v35  ;;  %vm1662_vm12 = vweird.f32 %v1655_v35 }
 0xa07   : > { %v2099_v36 = vpop.eup %2098 }
 0xa08   : > { %v1657_v37 = vmul.f32 %v2099_v36, %v1655_v35  ;;  %vm1663_vm11 = vweird.f32 %v2099_v36 }
 0xa09   : > { %vm1664_vm13 = vmor %vm1662_vm12, %vm1663_vm11 }
 0xa0a   : > { %v1658_v39 = vmul.f32 %v2099_v36, %v1657_v37 }
 0xa0c   : > { %v1659_v2 = vmul.f32 0.5, %v1658_v39 }
 0xa0e   : > { %v1660_v40 = vsub.f32 1.5, %v1659_v2 }
 0xa10   : > { %v1661_v41 = vmul.f32 %v2099_v36, %v1660_v40 }
 0xa12   : > { %v1665_v43 = vsel %vm1664_vm13, %v2099_v36, %v1661_v41 }
 0xa13   : > { %v1666_v44 = vmul.f32 %v1665_v43, %v1649_v30 }
 0xa15   : > { %v1670_v45 = vmul.f32 %v2076_v42, %v1666_v44  ;;  %1679 = sbr.rel (%p1888_p5) target bundleno = 2731 (0xaab), region = 116 }
 0xa17   : > { %v1674_v46 = vadd.f32 %v2077_v38, %v1670_v45 }
 0xa19   : > { %1675 = vst.msk [vmem:[#allocation2] sm:$0xff] %vm1167_vm2, %v1674_v46 }
 0xa1a   : > { %v1687_v47 = vld [vmem:[%s2667_s0 + $0x38] sm:$0xff]  ;;  %v1686_v48 = vld [vmem:[%s2667_s0 + $0x30] sm:$0xff]  ;;  %v1685_v49 = vld [vmem:[%s2667_s0 + $0x28] sm:$0xff] }
 0xa1b   : > { %1703 = vmatpush.msra.mxu0 %v1687_v47  ;;  %v1684_v50 = vld [vmem:[%s2667_s0 + $0x20] sm:$0xff]  ;;  %v1683_v51 = vld [vmem:[%s2667_s0 + $0x18] sm:$0xff]  ;;  %v1682_v52 = vld [vmem:[%s2667_s0 + $0x10] sm:$0xff] }
 0xa1c   : > { %v1681_v53 = vld [vmem:[%s2667_s0 + $0x8] sm:$0xff]  ;;  %v1680_v54 = vld [vmem:[%s2667_s0] sm:$0xff] }
 0xa1d   : > { %1704 = vmatpush.msra.mxu0 %v1686_v48  ;;  %v2100_v55 = vld [vmem:[%s2668_s26] ss:$0 sm:$0xff] }
 0xa1f   : > { %1705 = vmatpush.msra.mxu0 %v1685_v49 }
 0xa21   : > { %1706 = vmatpush.msra.mxu0 %v1684_v50 }
 0xa23   : > { %1707 = vmatpush.msra.mxu0 %v1683_v51 }
 0xa25   : > { %1708 = vmatpush.msra.mxu0 %v1682_v52 }
 0xa27   : > { %1709 = vmatpush.msra.mxu0 %v1681_v53 }
 0xa29   : > { %1710 = vmatpush.msra.mxu0 %v1680_v54 }
 0xa2a   : > { %1889 = vmatmul.msk.f32.vlgmr.msra.gmra.mxu0 %vm1167_vm2, %v1674_v46 }
 0xaa7   : > { %v1712_v56 = vpop.f32.mrf.mxu0 }
 0xaa8   : > { %v1713_v57 = vadd.f32 %v2100_v55, %v1712_v56 }
 0xaaa   : > { %1715 = vst [vmem:[%s2669_s23] sm:$0xff] %v1713_v57 }
 0xaab PF: > { %s2670_s10 = sld [smem:[#allocation3_spill]] }
 0xab1   : > { %s32_s3 = sadd.s32 1, %s2670_s10  }
 0xab2   : > { %p29_p6 = scmp.ge.s32.totalorder %s32_s3, 5  }
 0xab4   :  { %31 = sbr.rel (!%p29_p6) target bundleno = 16 (0x10), region = 175 }

// kernel: _svort_forward.14
= control target key start
LH: loop header
LB: loop body
LE: loop exit
PB: predicated region body
PF: predicated region fallthrough
CT: control target
= control target key end

     0   :  { %s2757_s0 = inlined_call_operand.vmem [shape: bf16[8,256], index: 0, kind: input, shape index: {}]   ;;  %s2758_s1 = inlined_call_operand.vmem [shape: f32[8,16], index: 1, kind: input, shape index: {}]   ;;  %s2759_s2 = inlined_call_operand.vmem [shape: f32[8,16], index: 2, kind: input, shape index: {}]   ;;  %s2760_s3 = inlined_call_operand.vmem [shape: bf16[16,256], index: 3, kind: input, shape index: {}]   ;;  %s2761_s4 = inlined_call_operand.vmem [shape: bf16[256,64], index: 4, kind: input, shape index: {}]   ;;  %s2762_s5 = inlined_call_operand.vmem [shape: bf16[256,64], index: 5, kind: input, shape index: {}]   ;;  %s2763_s6 = inlined_call_operand.vmem [shape: f32[1,64], index: 6, kind: input, shape index: {}]   ;;  %s2764_s7 = inlined_call_operand.vmem [shape: f32[16,64], index: 7, kind: input, shape index: {}]   ;;  %s2765_s8 = inlined_call_operand.vmem [shape: f32[3,64,192], index: 8, kind: input, shape index: {}]   ;;  %s2766_s9 = inlined_call_operand.vmem [shape: f32[3,1,192], index: 9, kind: input, shape index: {}]   ;;  %s2767_s10 = inlined_call_operand.vmem [shape: f32[3,64,64], index: 10, kind: input, shape index: {}]   ;;  %s2768_s11 = inlined_call_operand.vmem [shape: f32[3,1,64], index: 11, kind: input, shape index: {}]   ;;  %s2769_s12 = inlined_call_operand.vmem [shape: f32[3,64,128], index: 12, kind: input, shape index: {}]   ;;  %s2770_s13 = inlined_call_operand.vmem [shape: f32[3,1,128], index: 13, kind: input, shape index: {}]   ;;  %s2771_s14 = inlined_call_operand.vmem [shape: f32[3,128,64], index: 14, kind: input, shape index: {}]   ;;  %s2772_s15 = inlined_call_operand.vmem [shape: f32[3,1,64], index: 15, kind: input, shape index: {}]   ;;  %s2773_s16 = inlined_call_operand.vmem [shape: f32[3,1,64], index: 16, kind: input, shape index: {}]   ;;  %s2774_s17 = inlined_call_operand.vmem [shape: f32[3,1,64], index: 17, kind: input, shape index: {}]   ;;  %s2775_s18 = inlined_call_operand.vmem [shape: f32[3,1,64], index: 18, kind: input, shape index: {}]   ;;  %s2776_s19 = inlined_call_operand.vmem [shape: f32[3,1,64], index: 19, kind: input, shape index: {}]   ;;  %s2777_s20 = inlined_call_operand.vmem [shape: f32[64,128], index: 20, kind: input, shape index: {}]   ;;  %s2778_s21 = inlined_call_operand.vmem [shape: f32[1,128], index: 21, kind: input, shape index: {}]   ;;  %s2779_s22 = inlined_call_operand.vmem [shape: f32[8,128], index: 22, kind: output, shape index: {0}]   ;;  %s2780_s23 = inlined_call_operand.hbm [shape: f32[4,8,8], index: 23, kind: output, shape index: {1}]  }
   0x1   :  { %2787 = sst [smem:[#allocation7_spill]] %s2757_s0 }
   0x2   :  { %2788 = sst [smem:[#allocation8_spill]] %s2758_s1 }
   0x3   :  { %2789 = sst [smem:[#allocation9_spill]] %s2759_s2 }
   0x4   :  { %2790 = sst [smem:[#allocation10_spill]] %s2760_s3 }
   0x5   :  { %2791 = sst [smem:[#allocation11_spill]] %s2761_s4 }
   0x6   :  { %2792 = sst [smem:[#allocation12_spill]] %s2762_s5 }
   0x7   :  { %2793 = sst [smem:[#allocation13_spill]] %s2763_s6 }
   0x8   :  { %2794 = sst [smem:[#allocation14_spill]] %s2764_s7 }
   0x9   :  { %2795 = sst [smem:[#allocation15_spill]] %s2765_s8 }
   0xa   :  { %2796 = sst [smem:[#allocation16_spill]] %s2766_s9 }
   0xb   :  { %2797 = sst [smem:[#allocation17_spill]] %s2767_s10 }
   0xc   :  { %2798 = sst [smem:[#allocation18_spill]] %s2769_s12 }
   0xd   :  { %2799 = sst [smem:[#allocation19_spill]] %s2777_s20 }
   0xe   :  { %2800 = sst [smem:[#allocation20_spill]] %s2778_s21 }
   0xf   :  { %2801 = sst [smem:[#allocation21_spill]] %s2779_s22 }
  0x10   :  { %2802 = sst [smem:[#allocation22_spill]] %s2780_s23 }
  0x11   :  { %29 = vsyncpa [#allocation4], 0  ;;  %s2360_s4 = smov 0  }
  0x12 LB: > { %2803 = sst [smem:[#allocation6_spill]] %s2227_s4  ;;  %s2366_s30 = sadd.s32 4294967295, %s2227_s4   ;;  %s2227_s4 = sphi %s2360_s4, %s35_s4  }
  0x13   : > { %p1931_p0 = scmp.ge.s32.totalorder %s2227_s4, 1  ;;  %p726_p1 = scmp.lt.s32.totalorder %s2227_s4, 4 }
  0x15   : > { %p727_p2 = pnand %p1931_p0, %p726_p1 }
  0x16   : > { %p825_p3 = scmp.lt.s32.totalorder (!%p727_p2), %s2366_s30, 2  ;;  %s2804_s8 = sld [smem:[#allocation15_spill]] (!%p727_p2) }
  0x17   : > { %730 = sbr.rel (%p727_p2) target bundleno = 3954 (0xf72), region = 108  ;;  %s2805_s9 = sld [smem:[#allocation16_spill]] (!%p727_p2) }
  0x18   : > { %s2806_s10 = sld [smem:[#allocation17_spill]] (!%p727_p2)  ;;  %p1941_p4 = scmp.ne.s32.totalorder (!%p727_p2), %s2366_s30, 0 }
  0x19   : > { %s2807_s12 = sld [smem:[#allocation18_spill]] (!%p727_p2) }
  0x1c   : > { %s2372_s24 = scalar_select %p825_p3, %s2366_s30, 2 }
  0x1d   : > { %s2808_s3 = sld [smem:[#allocation10_spill]] (!%p1941_p4) }
  0x1e   : > { %s1971_s25 = sshll.u32 %s2372_s24, 7  ;;  %s1934_s5 = sshll.u32 %s2372_s24, 1 }
  0x1f   : > { %s2379_s2 = scalar_lea.vmem %s2804_s8, %s1971_s25  ;;  %s2384_s7 = scalar_lea.vmem %s2805_s9, %s1934_s5 }
  0x20   : > { %s1972_s28 = sshll.u32 %s2372_s24, 6  ;;  %s2408_s9 = scalar_lea.vmem %s2771_s14, %s1971_s25 }
  0x21   : > { %s2394_s22 = scalar_lea.vmem %s2806_s10, %s1972_s28  ;;  %s2399_s1 = scalar_lea.vmem %s2807_s12, %s1972_s28 }
  0x22   : > { %s860_s10 = scalar_lea.vmem %s2773_s16, %s2372_s24  ;;  %s863_s28 = scalar_lea.vmem %s2774_s17, %s2372_s24 }
  0x23   : > { %873 = sbr.rel (%p1941_p4) target bundleno = 317 (0x13d), region = 112  ;;  %s2809_s21 = sld [smem:[#allocation11_spill]] (!%p1941_p4) }
  0x24   : > { %s2810_s12 = sld [smem:[#allocation9_spill]] (!%p1941_p4) }
  0x25   : > { %s2811_s8 = sld [smem:[#allocation12_spill]] (!%p1941_p4) }
  0x26   : > { %s2812_s5 = sld [smem:[#allocation14_spill]] (!%p1941_p4) }
  0x27   : > { %s2813_s6 = sld [smem:[#allocation7_spill]] (!%p1941_p4) }
  0x28   : > { %v943_v0 = vld [vmem:[%s2808_s3 + $0x8] sm:$0xff]  ;;  %v942_v1 = vld [vmem:[%s2808_s3] sm:$0xff]  ;;  %vm948_vm0 = vcmask 130048   ;;  %s2814_s27 = sld [smem:[#allocation8_spill]]  ;;  %vm1168_vm1 = vcmask 523264  }
  0x29   : > { %v946_v2 = vunpack.c.l.bf16 %v943_v0  ;;  %v947_v3 = vunpack.c.h.bf16 %v943_v0  ;;  %v944_v4 = vunpack.c.l.bf16 %v942_v1  ;;  %v945_v5 = vunpack.c.h.bf16 %v942_v1  ;;  %v2124_v6 = vld [vmem:[%s2809_s21 + $0x38] sm:$0xff]   ;;  %v2123_v10 = vld [vmem:[%s2809_s21 + $0x30] sm:$0xff]   ;;  %v2122_v23 = vld [vmem:[%s2809_s21 + $0x28] sm:$0xff]   ;;  %s2815_s26 = sld [smem:[#allocation13_spill]] }
  0x2a   : > { %v2132_v7 = vld [vmem:[%s2809_s21 + $0x78] sm:$0xff]   ;;  %v2070_v8 = vunpack.c.h.bf16 %v2124_v6  ;;  %v2131_v11 = vld [vmem:[%s2809_s21 + $0x70] sm:$0xff]   ;;  %v941_v12 = vld [vmem:[%s2810_s12] sm:$0xff]  ;;  %v2069_v13 = vunpack.c.l.bf16 %v2124_v6  ;;  %v2066_v18 = vunpack.c.h.bf16 %v2123_v10  ;;  %v2065_v27 = vunpack.c.l.bf16 %v2123_v10 }
  0x2b   : > { %v2102_v9 = vunpack.c.h.bf16 %v2132_v7  ;;  %966 = vmatpush.msra.mxu0 %v946_v2  ;;  %986 = vmatpush.msra.mxu1 %v947_v3  ;;  %v2101_v14 = vunpack.c.l.bf16 %v2132_v7  ;;  %v2109_v15 = vld [vmem:[%s2811_s8 + $0x38] sm:$0xff]   ;;  %v2098_v19 = vunpack.c.h.bf16 %v2131_v11  ;;  %v2108_v21 = vld [vmem:[%s2811_s8 + $0x30] sm:$0xff]   ;;  %v2130_v24 = vld [vmem:[%s2809_s21 + $0x68] sm:$0xff]   ;;  %v2097_v28 = vunpack.c.l.bf16 %v2131_v11 }
  0x2c   : > { %v2117_v16 = vld [vmem:[%s2811_s8 + $0x78] sm:$0xff]   ;;  %1056 = vmatpush.msra.mxu2 %v2070_v8  ;;  %v2006_v17 = vunpack.c.h.bf16 %v2109_v15  ;;  %v2116_v22 = vld [vmem:[%s2811_s8 + $0x70] sm:$0xff]   ;;  %v2005_v25 = vunpack.c.l.bf16 %v2109_v15  ;;  %v2002_v29 = vunpack.c.h.bf16 %v2108_v21  ;;  %v2062_v31 = vunpack.c.h.bf16 %v2122_v23  ;;  %v2107_v33 = vld [vmem:[%s2811_s8 + $0x28] sm:$0xff]  }
  0x2d   : > { %1076 = vmatpush.msra.mxu3 %v2102_v9  ;;  %967 = vmatpush.msra.mxu0 %v944_v4  ;;  %v2038_v20 = vunpack.c.h.bf16 %v2117_v16  ;;  %v2037_v26 = vunpack.c.l.bf16 %v2117_v16  ;;  %v2034_v30 = vunpack.c.h.bf16 %v2116_v22  ;;  %v2094_v32 = vunpack.c.h.bf16 %v2130_v24  ;;  %v2115_v34 = vld [vmem:[%s2811_s8 + $0x68] sm:$0xff]   ;;  %v2121_v35 = vld [vmem:[%s2809_s21 + $0x20] sm:$0xff]   ;;  %v2120_v47 = vld [vmem:[%s2809_s21 + $0x18] sm:$0xff]  }
  0x2e   : > { %987 = vmatpush.msra.mxu1 %v945_v5  ;;  %1942 = vmatmul.msk.f32.vlgmr.msra.gmra.mxu0 %vm948_vm0, %v941_v12  ;;  %v2129_v36 = vld [vmem:[%s2809_s21 + $0x60] sm:$0xff]   ;;  %v2001_v37 = vunpack.c.l.bf16 %v2108_v21  ;;  %v2033_v38 = vunpack.c.l.bf16 %v2116_v22  ;;  %v2061_v39 = vunpack.c.l.bf16 %v2122_v23  ;;  %v2093_v40 = vunpack.c.l.bf16 %v2130_v24  ;;  %v2128_v48 = vld [vmem:[%s2809_s21 + $0x58] sm:$0xff]   ;;  %v2119_v59 = vld [vmem:[%s2809_s21 + $0x10] sm:$0xff]  }
  0x2f   : > { %1943 = vmatmul.msk.f32.vlgmr.msra.gmra.mxu1 %vm948_vm0, %v941_v12  ;;  %1057 = vmatpush.msra.mxu2 %v2069_v13  ;;  %v1998_v41 = vunpack.c.h.bf16 %v2107_v33  ;;  %v2030_v42 = vunpack.c.h.bf16 %v2115_v34  ;;  %v2058_v43 = vunpack.c.h.bf16 %v2121_v35  ;;  %v2090_v44 = vunpack.c.h.bf16 %v2129_v36  ;;  %v2106_v45 = vld [vmem:[%s2811_s8 + $0x20] sm:$0xff]   ;;  %v2105_v57 = vld [vmem:[%s2811_s8 + $0x18] sm:$0xff]   ;;  %v2127_v60 = vld [vmem:[%s2809_s21 + $0x50] sm:$0xff]  }
  0x30   : > { %1077 = vmatpush.msra.mxu3 %v2101_v14  ;;  %1096 = vmatpush.msrb.mxu0 %v2006_v17  ;;  %v2114_v46 = vld [vmem:[%s2811_s8 + $0x60] sm:$0xff]   ;;  %v1997_v49 = vunpack.c.l.bf16 %v2107_v33  ;;  %v2029_v50 = vunpack.c.l.bf16 %v2115_v34  ;;  %v2057_v51 = vunpack.c.l.bf16 %v2121_v35  ;;  %v2089_v52 = vunpack.c.l.bf16 %v2129_v36  ;;  %v2113_v58 = vld [vmem:[%s2811_s8 + $0x58] sm:$0xff]   ;;  %v2104_v5 = vld [vmem:[%s2811_s8 + $0x10] sm:$0xff]  }
  0x31   : > { %1116 = vmatpush.msrb.mxu1 %v2038_v20  ;;  %1058 = vmatpush.msra.mxu2 %v2066_v18  ;;  %v1994_v53 = vunpack.c.h.bf16 %v2106_v45  ;;  %v2026_v54 = vunpack.c.h.bf16 %v2114_v46  ;;  %v2054_v55 = vunpack.c.h.bf16 %v2120_v47  ;;  %v2086_v56 = vunpack.c.h.bf16 %v2128_v48  ;;  %v2118_v6 = vld [vmem:[%s2809_s21 + $0x8] sm:$0xff]   ;;  %v2040_v15 = vld [vmem:[%s2809_s21] sm:$0xff]   ;;  %v2112_v21 = vld [vmem:[%s2811_s8 + $0x50] sm:$0xff]  }
  0x32   : > { %1078 = vmatpush.msra.mxu3 %v2098_v19  ;;  %1097 = vmatpush.msrb.mxu0 %v2005_v25  ;;  %v1993_v61 = vunpack.c.l.bf16 %v2106_v45  ;;  %v2025_v62 = vunpack.c.l.bf16 %v2114_v46  ;;  %v2053_v63 = vunpack.c.l.bf16 %v2120_v47  ;;  %v2085_v0 = vunpack.c.l.bf16 %v2128_v48  ;;  %v2126_v7 = vld [vmem:[%s2809_s21 + $0x48] sm:$0xff]   ;;  %v2125_v16 = vld [vmem:[%s2809_s21 + $0x40] sm:$0xff]  }
  0x33   : > { %1117 = vmatpush.msrb.mxu1 %v2037_v26  ;;  %1059 = vmatpush.msra.mxu2 %v2065_v27  ;;  %v1990_v1 = vunpack.c.h.bf16 %v2105_v57  ;;  %v2022_v2 = vunpack.c.h.bf16 %v2113_v58  ;;  %v2050_v3 = vunpack.c.h.bf16 %v2119_v59  ;;  %v2082_v4 = vunpack.c.h.bf16 %v2127_v60  ;;  %v2103_v26 = vld [vmem:[%s2811_s8 + $0x8] sm:$0xff]   ;;  %v1976_v34 = vld [vmem:[%s2811_s8] sm:$0xff]  }
  0x34   : > { %1079 = vmatpush.msra.mxu3 %v2097_v28  ;;  %1098 = vmatpush.msrb.mxu0 %v2002_v29  ;;  %v1989_v8 = vunpack.c.l.bf16 %v2105_v57  ;;  %v2021_v9 = vunpack.c.l.bf16 %v2113_v58  ;;  %v2049_v10 = vunpack.c.l.bf16 %v2119_v59  ;;  %v2081_v11 = vunpack.c.l.bf16 %v2127_v60  ;;  %v1138_v29 = vld [vmem:[%s2812_s5 + $0x8] sm:$0xff]  ;;  %v2110_v35 = vld [vmem:[%s2811_s8 + $0x40] sm:$0xff]  }
  0x35   : > { %1118 = vmatpush.msrb.mxu1 %v2034_v30  ;;  %1060 = vmatpush.msra.mxu2 %v2062_v31  ;;  %v1986_v12 = vunpack.c.h.bf16 %v2104_v5  ;;  %v2046_v13 = vunpack.c.h.bf16 %v2118_v6  ;;  %v2078_v14 = vunpack.c.h.bf16 %v2126_v7  ;;  %v2045_v17 = vunpack.c.l.bf16 %v2118_v6  ;;  %v2111_v31 = vld [vmem:[%s2811_s8 + $0x48] sm:$0xff]   ;;  %v1136_v46 = vld [vmem:[%s2814_s27] sm:$0xff] }
  0x36   : > { %1080 = vmatpush.msra.mxu3 %v2094_v32  ;;  %1099 = vmatpush.msrb.mxu0 %v2001_v37  ;;  %v2077_v18 = vunpack.c.l.bf16 %v2126_v7  ;;  %v2042_v19 = vunpack.c.h.bf16 %v2040_v15  ;;  %v2074_v20 = vunpack.c.h.bf16 %v2125_v16  ;;  %v2041_v22 = vunpack.c.l.bf16 %v2040_v15  ;;  %v1137_v32 = vld [vmem:[%s2812_s5] sm:$0xff] }
  0x37   : > { %1119 = vmatpush.msrb.mxu1 %v2033_v38  ;;  %1061 = vmatpush.msra.mxu2 %v2061_v39  ;;  %v2073_v23 = vunpack.c.l.bf16 %v2125_v16  ;;  %v1985_v24 = vunpack.c.l.bf16 %v2104_v5  ;;  %v2018_v25 = vunpack.c.h.bf16 %v2112_v21  ;;  %v1982_v27 = vunpack.c.h.bf16 %v2103_v26  ;;  %v874_v38 = vld [vmem:[%s2813_s6] sm:$0xff] }
  0x38   : > { %1081 = vmatpush.msra.mxu3 %v2093_v40  ;;  %1100 = vmatpush.msrb.mxu0 %v1998_v41  ;;  %v2017_v28 = vunpack.c.l.bf16 %v2112_v21  ;;  %v1981_v30 = vunpack.c.l.bf16 %v2103_v26  ;;  %v2014_v33 = vunpack.c.h.bf16 %v2111_v31  ;;  %v1978_v36 = vunpack.c.h.bf16 %v1976_v34 }
  0x39   : > { %1120 = vmatpush.msrb.mxu1 %v2030_v42  ;;  %1062 = vmatpush.msra.mxu2 %v2058_v43  ;;  %v2013_v37 = vunpack.c.l.bf16 %v2111_v31  ;;  %v1977_v39 = vunpack.c.l.bf16 %v1976_v34  ;;  %v2010_v40 = vunpack.c.h.bf16 %v2110_v35  ;;  %v875_v41 = vunpack.c.l.bf16 %v874_v38 }
  0x3a   : > { %1082 = vmatpush.msra.mxu3 %v2090_v44  ;;  %1101 = vmatpush.msrb.mxu0 %v1997_v49  ;;  %v2009_v42 = vunpack.c.l.bf16 %v2110_v35  ;;  %v876_v43 = vunpack.c.h.bf16 %v874_v38 }
  0x3b   : > { %1121 = vmatpush.msrb.mxu1 %v2029_v50  ;;  %1063 = vmatpush.msra.mxu2 %v2057_v51 }
  0x3c   : > { %1083 = vmatpush.msra.mxu3 %v2089_v52  ;;  %1102 = vmatpush.msrb.mxu0 %v1994_v53 }
  0x3d   : > { %1122 = vmatpush.msrb.mxu1 %v2026_v54  ;;  %1064 = vmatpush.msra.mxu2 %v2054_v55  ;;  %v2158_v54 = vld [vmem:[%s2815_s26] ss:$0 sm:$0xff] }
  0x3e   : > { %1084 = vmatpush.msra.mxu3 %v2086_v56  ;;  %1103 = vmatpush.msrb.mxu0 %v1993_v61 }
  0x3f   : > { %1123 = vmatpush.msrb.mxu1 %v2025_v62  ;;  %1065 = vmatpush.msra.mxu2 %v2053_v63 }
  0x40   : > { %1085 = vmatpush.msra.mxu3 %v2085_v0  ;;  %1104 = vmatpush.msrb.mxu0 %v1990_v1 }
  0x41   : > { %1124 = vmatpush.msrb.mxu1 %v2022_v2  ;;  %1066 = vmatpush.msra.mxu2 %v2050_v3 }
  0x42   : > { %1086 = vmatpush.msra.mxu3 %v2082_v4  ;;  %1105 = vmatpush.msrb.mxu0 %v1989_v8 }
  0x43   : > { %1125 = vmatpush.msrb.mxu1 %v2021_v9  ;;  %1067 = vmatpush.msra.mxu2 %v2049_v10 }
  0x44   : > { %1087 = vmatpush.msra.mxu3 %v2081_v11  ;;  %1106 = vmatpush.msrb.mxu0 %v1986_v12 }
  0x45   : > { %1068 = vmatpush.msra.mxu2 %v2046_v13  ;;  %1126 = vmatpush.msrb.mxu1 %v2018_v25 }
  0x46   : > { %1088 = vmatpush.msra.mxu3 %v2078_v14  ;;  %1107 = vmatpush.msrb.mxu0 %v1985_v24 }
  0x47   : > { %1069 = vmatpush.msra.mxu2 %v2045_v17  ;;  %1127 = vmatpush.msrb.mxu1 %v2017_v28 }
  0x48   : > { %1089 = vmatpush.msra.mxu3 %v2077_v18  ;;  %1108 = vmatpush.msrb.mxu0 %v1982_v27 }
  0x49   : > { %1070 = vmatpush.msra.mxu2 %v2042_v19  ;;  %1128 = vmatpush.msrb.mxu1 %v2014_v33 }
  0x4a   : > { %1090 = vmatpush.msra.mxu3 %v2074_v20  ;;  %1109 = vmatpush.msrb.mxu0 %v1981_v30 }
  0x4b   : > { %1071 = vmatpush.msra.mxu2 %v2041_v22  ;;  %1129 = vmatpush.msrb.mxu1 %v2013_v37 }
  0x4c   : > { %1091 = vmatpush.msra.mxu3 %v2073_v23  ;;  %1110 = vmatpush.msrb.mxu0 %v1978_v36 }
  0x4d   : > { %1156 = vmatpush.msrb.mxu2 %v1138_v29  ;;  %1130 = vmatpush.msrb.mxu1 %v2010_v40 }
  0x4e   : > { %1111 = vmatpush.msrb.mxu0 %v1977_v39 }
  0x4f   : > { %1157 = vmatpush.msrb.mxu2 %v1137_v32  ;;  %1112 = vmatmul.f32.vlgmr.msrb.gmra.mxu0 %v875_v41 }
  0x50   : > { %1131 = vmatpush.msrb.mxu1 %v2009_v42 }
  0x51   : > { %1132 = vmatmul.f32.vlgmr.msrb.gmra.mxu1 %v876_v43 }
  0xab   : > { %v969_v44 = vpop.f32.mrf.mxu0 }
  0xac   : > { %v989_v45 = vpop.f32.mrf.mxu1  ;;  %1072 = vmatmul.f32.vlgmr.msra.gmra.mxu2 %v969_v44 }
  0xad   : > { %1092 = vmatmul.f32.vlgmr.msra.gmra.mxu3 %v989_v45 }
  0xb4   : > { %1944 = vmatmul.msk.f32.vlgmr.msrb.gmra.mxu2 %vm948_vm0, %v1136_v46 }
  0xcc   : > { %v1113_v47 = vpop.f32.mrf.mxu0 }
  0xce   : > { %v1133_v52 = vpop.f32.mrf.mxu1 }
 0x12f   : > { %v1073_v48 = vpop.f32.mrf.mxu2 }
 0x130   : > { %v1093_v49 = vpop.f32.mrf.mxu3 }
 0x131   : > { %v1094_v50 = vadd.f32 %v1093_v49, %v1073_v48 }
 0x133   : > { %v1114_v51 = vadd.f32 %v1113_v47, %v1094_v50 }
 0x135   : > { %v1134_v53 = vadd.f32 %v1133_v52, %v1114_v51 }
 0x137   : > { %v1159_v55 = vpop.f32.mrf.mxu2 }
 0x138   : > { %v1162_v56 = vadd.f32 %v1159_v55, %v1134_v53 }
 0x13a   : > { %v1167_v57 = vadd.f32 %v2158_v54, %v1162_v56 }
 0x13c   : > { %1169 = vst.msk [vmem:[#allocation2] sm:$0xff] %vm1168_vm1, %v1167_v57 }
 0x13d PF: > { %v1185_v58 = vld [vmem:[%s2379_s2 + $0x70] sm:$0xff]  ;;  %v1183_v59 = vld [vmem:[%s2379_s2 + $0x60] sm:$0xff]  ;;  %vm1193_vm2 = vcmask 523264   ;;  %s2229_s4 = smov 64   ;;  %vm1240_vm3 = vcmask 130048   ;;  %v1186_v8 = vld [vmem:[%s2379_s2 + $0x78] sm:$0xff] }
 0x13e   : > { %1205 = vmatpush.msra.mxu1 %v1185_v58  ;;  %v1181_v60 = vld [vmem:[%s2379_s2 + $0x50] sm:$0xff]  ;;  %v1179_v61 = vld [vmem:[%s2379_s2 + $0x40] sm:$0xff]  ;;  %v1184_v9 = vld [vmem:[%s2379_s2 + $0x68] sm:$0xff]  ;;  %vm1266_vm4 = vcmask 64512   ;;  %p1949_p5 = scmp.ne.s32.totalorder %s2366_s30, 2 }
 0x13f   : > { %v1177_v62 = vld [vmem:[%s2379_s2 + $0x30] sm:$0xff]  ;;  %v1175_v63 = vld [vmem:[%s2379_s2 + $0x20] sm:$0xff]  ;;  %v1182_v10 = vld [vmem:[%s2379_s2 + $0x58] sm:$0xff] }
 0x140   : > { %1206 = vmatpush.msra.mxu1 %v1183_v59  ;;  %v1173_v0 = vld [vmem:[%s2379_s2 + $0x10] sm:$0xff]  ;;  %v1171_v1 = vld [vmem:[%s2379_s2] sm:$0xff]  ;;  %v1180_v14 = vld [vmem:[%s2379_s2 + $0x48] sm:$0xff] }
 0x141   : > { %v1187_v3 = vld [vmem:[%s2384_s7] sm:$0x3]  ;;  %v1178_v15 = vld [vmem:[%s2379_s2 + $0x38] sm:$0xff]  ;;  %v1176_v16 = vld [vmem:[%s2379_s2 + $0x28] sm:$0xff] }
 0x142   : > { %1207 = vmatpush.msra.mxu1 %v1181_v60  ;;  %v1189_v4 = vperm.slane %v1187_v3, 0  ;;  %v1174_v17 = vld [vmem:[%s2379_s2 + $0x18] sm:$0xff]  ;;  %v1172_v18 = vld [vmem:[%s2379_s2 + $0x8] sm:$0xff]  ;;  %v1190_v24 = vperm.slane %v1187_v3, 1 }
 0x143   : > { %v2562_v2 = vld [vmem:[#allocation2] sm:$0xff] }
 0x144   : > { %1208 = vmatpush.msra.mxu1 %v1179_v61 }
 0x146   : > { %1209 = vmatpush.msra.mxu1 %v1177_v62 }
 0x148   : > { %1210 = vmatpush.msra.mxu1 %v1175_v63 }
 0x14a   : > { %1211 = vmatpush.msra.mxu1 %v1173_v0 }
 0x14c   : > { %1212 = vmatpush.msra.mxu1 %v1171_v1 }
 0x14d   : > { %1945 = vmatmul.msk.f32.vlgmr.msra.gmra.mxu1 %vm1193_vm2, %v2562_v2 }
 0x14e   : > { %1225 = vmatpush.msrb.mxu1 %v1186_v8 }
 0x150   : > { %1226 = vmatpush.msrb.mxu1 %v1184_v9 }
 0x152   : > { %1227 = vmatpush.msrb.mxu1 %v1182_v10 }
 0x154   : > { %1228 = vmatpush.msrb.mxu1 %v1180_v14 }
 0x156   : > { %1229 = vmatpush.msrb.mxu1 %v1178_v15 }
 0x158   : > { %1230 = vmatpush.msrb.mxu1 %v1176_v16 }
 0x15a   : > { %1231 = vmatpush.msrb.mxu1 %v1174_v17 }
 0x15c   : > { %1232 = vmatpush.msrb.mxu1 %v1172_v18 }
 0x15d   : > { %1946 = vmatmul.msk.f32.vlgmr.msrb.gmra.mxu1 %vm1193_vm2, %v2562_v2 }
 0x1ca   : > { %v1214_v5 = vpop.f32.mrf.mxu1 }
 0x1cb   : > { %v2567_v6 = vadd.f32 %v1214_v5, %v1189_v4 }
 0x1cd   : > { %1238 = vrot.lane.b32.xlu0 %v2567_v6, %s2229_s4 }
 0x1da   : > { %v1234_v25 = vpop.f32.mrf.mxu1 }
 0x1db   : > { %v2585_v26 = vadd.f32 %v1234_v25, %v1190_v24 }
 0x23f   : > { %v1239_v7 = vpop.permute.xlu0 %1238 }
 0x240   : > { %1947 = vmatpush.xpose.msk.msra.mxu2 %vm1240_vm3, %v1239_v7 }
 0x243   : > { %1948 = vmatmul.msk.f32.vlgmr.msra.gmra.mxu2 %vm1240_vm3, %v2567_v6 }
 0x2c6   : > { %v1262_v11 = vpop.f32.mrf.mxu2 }
 0x2c7   : > { %v1265_v12 = vmul.f32 0.25, %v1262_v11 }
 0x2c9   : > { %v1267_v13 = vsel %vm1266_vm4, %v1265_v12, -inf }
 0x2ca   : > { %1268 = vmax.xlane.f32.xlu0 %v1267_v13 }
 0x33d   : > { %v1269_v19 = vpop.xlane.xlu0 %1268 }
 0x33e   : > { %v1270_v20 = vsub.f32 %v1265_v12, %v1269_v19 }
 0x340   : > { %v1271_v21 = vmul.f32 1.442695, %v1270_v20 }
 0x342   : > { %2159 = vpow2.f32 %v1271_v21 }
 0x348   : > { %v2160_v22 = vpop.eup %2159 }
 0x349   : > { %v1273_v23 = vsel %vm1266_vm4, %v2160_v22, 0.0 }
 0x34a   : > { %1274 = vadd.xlane.f32.xlu1 %v1273_v23 }
 0x3bd   : > { %v1275_v27 = vpop.xlane.xlu1 %1274 }
 0x3be   : > { %2161 = vrcp.f32 %v1275_v27 }
 0x3c1   : > { %1281 = sbr.rel (%p1949_p5) target bundleno = 968 (0x3c8), region = 116 }
 0x3c4   : > { %v2162_v28 = vpop.eup %2161 }
 0x3c5   : > { %v1277_v29 = vmul.f32 %v2162_v28, %v2160_v22 }
 0x3c7   : > { %1282 = vst.msk [vmem:[#allocation3] sm:$0xff] %vm1266_vm4, %v1277_v29 }
 0x3c8 PF: > { %1301 = vmatpush.msra.mxu3 %v2585_v26  ;;  %s2230_s2 = smov 48   ;;  %s2231_s7 = smov 112  }
 0x3c9   : > { %1308 = vrot.lane.b32.xlu0 %v2567_v6, %s2230_s2  ;;  %1950 = vmatmul.msk.f32.vlgmr.msra.gmra.mxu3 %vm1266_vm4, %v1277_v29 }
 0x3d1   : > { %1306 = vrot.lane.b32.xlu0 %v2567_v6, %s2231_s7 }
 0x43b   : > { %v1309_v30 = vpop.permute.xlu0 %1308 }
 0x43c   : > { %1951 = vmatpush.xpose.msk.msrb.mxu3 %vm1240_vm3, %v1309_v30 }
 0x443   : > { %v1307_v31 = vpop.permute.xlu0 %1306 }
 0x444   : > { %1952 = vmatmul.msk.f32.vlgmr.msrb.gmra.mxu3 %vm1240_vm3, %v1307_v31 }
 0x44c   : > { %v2598_v32 = vpop.f32.mrf.mxu3 }
 0x4c7   : > { %v1331_v33 = vpop.f32.mrf.mxu3 }
 0x4c8   : > { %v1334_v34 = vmul.f32 0.25, %v1331_v33 }
 0x4ca   : > { %v1335_v35 = vsel %vm1266_vm4, %v1334_v34, -inf }
 0x4cb   : > { %1336 = vmax.xlane.f32.xlu1 %v1335_v35 }
 0x53e   : > { %v1337_v36 = vpop.xlane.xlu1 %1336 }
 0x53f   : > { %v1338_v37 = vsub.f32 %v1334_v34, %v1337_v36 }
 0x541   : > { %v1339_v38 = vmul.f32 1.442695, %v1338_v37 }
 0x543   : > { %2163 = vpow2.f32 %v1339_v38 }
 0x549   : > { %v2164_v39 = vpop.eup %2163 }
 0x54a   : > { %v1341_v40 = vsel %vm1266_vm4, %v2164_v39, 0.0 }
 0x54b   : > { %1342 = vadd.xlane.f32.xlu1 %v1341_v40 }
 0x5be   : > { %v1343_v41 = vpop.xlane.xlu1 %1342 }
 0x5bf   : > { %2165 = vrcp.f32 %v1343_v41 }
 0x5c2   : > { %1348 = sbr.rel (%p1949_p5) target bundleno = 1481 (0x5c9), region = 120 }
 0x5c5   : > { %v2166_v42 = vpop.eup %2165 }
 0x5c6   : > { %v1345_v43 = vmul.f32 %v2166_v42, %v2164_v39 }
 0x5c8   : > { %1350 = vst.msk [vmem:[#allocation3 + $0x8] sm:$0xff] %vm1266_vm4, %v1345_v43 }
 0x5c9 PF: > { %1352 = vrot.lane.b32.xlu1 %v2585_v26, %s2231_s7  ;;  %s2232_s12 = smov 32   ;;  %s2233_s20 = smov 96  }
 0x5ca   : > { %1380 = vrot.lane.b32.xlu0 %v2567_v6, %s2232_s12 }
 0x5d2   : > { %1378 = vrot.lane.b32.xlu0 %v2567_v6, %s2233_s20 }
 0x63b   : > { %v1353_v46 = vpop.permute.xlu1 %1352 }
 0x63c   : > { %v1381_v44 = vpop.permute.xlu0 %1380  ;;  %1373 = vmatpush.msrb.mxu2 %v1353_v46 }
 0x63d   : > { %1955 = vmatpush.xpose.msk.msra.mxu3 %vm1240_vm3, %v1381_v44  ;;  %1954 = vmatmul.msk.f32.vlgmr.msrb.gmra.mxu2 %vm1266_vm4, %v1345_v43 }
 0x644   : > { %v1379_v45 = vpop.permute.xlu0 %1378 }
 0x645   : > { %1956 = vmatmul.msk.f32.vlgmr.msra.gmra.mxu3 %vm1240_vm3, %v1379_v45 }
 0x6c0   : > { %v1375_v55 = vpop.f32.mrf.mxu2 }
 0x6c8   : > { %v1403_v47 = vpop.f32.mrf.mxu3 }
 0x6c9   : > { %v1406_v48 = vmul.f32 0.25, %v1403_v47 }
 0x6cb   : > { %v1407_v49 = vsel %vm1266_vm4, %v1406_v48, -inf }
 0x6cc   : > { %1408 = vmax.xlane.f32.xlu1 %v1407_v49 }
 0x73f   : > { %v1409_v50 = vpop.xlane.xlu1 %1408 }
 0x740   : > { %v1410_v51 = vsub.f32 %v1406_v48, %v1409_v50 }
 0x742   : > { %v1411_v52 = vmul.f32 1.442695, %v1410_v51 }
 0x744   : > { %2167 = vpow2.f32 %v1411_v52 }
 0x74a   : > { %v2168_v53 = vpop.eup %2167 }
 0x74b   : > { %v1413_v54 = vsel %vm1266_vm4, %v2168_v53, 0.0 }
 0x74c   : > { %1414 = vadd.xlane.f32.xlu2 %v1413_v54 }
 0x7bf   : > { %v1415_v56 = vpop.xlane.xlu2 %1414 }
 0x7c0   : > { %2169 = vrcp.f32 %v1415_v56 }
 0x7c3   : > { %1420 = sbr.rel (%p1949_p5) target bundleno = 1994 (0x7ca), region = 124 }
 0x7c6   : > { %v2170_v57 = vpop.eup %2169 }
 0x7c7   : > { %v1417_v58 = vmul.f32 %v2170_v57, %v2168_v53 }
 0x7c9   : > { %1422 = vst.msk [vmem:[#allocation3 + $0x10] sm:$0xff] %vm1266_vm4, %v1417_v58 }
 0x7ca PF: > { %1423 = vrot.lane.b32.xlu1 %v2585_v26, %s2233_s20  ;;  %s2234_s6 = smov 16   ;;  %s2235_s23 = smov 80  }
 0x7cb   : > { %1451 = vrot.lane.b32.xlu0 %v2567_v6, %s2234_s6 }
 0x7d3   : > { %1449 = vrot.lane.b32.xlu0 %v2567_v6, %s2235_s23 }
 0x83c   : > { %v1424_v61 = vpop.permute.xlu1 %1423 }
 0x83d   : > { %v1452_v59 = vpop.permute.xlu0 %1451  ;;  %1444 = vmatpush.msra.mxu2 %v1424_v61 }
 0x83e   : > { %1959 = vmatpush.xpose.msk.msra.mxu0 %vm1240_vm3, %v1452_v59  ;;  %1958 = vmatmul.msk.f32.vlgmr.msra.gmra.mxu2 %vm1266_vm4, %v1417_v58 }
 0x845   : > { %v1450_v60 = vpop.permute.xlu0 %1449 }
 0x846   : > { %1960 = vmatmul.msk.f32.vlgmr.msra.gmra.mxu0 %vm1240_vm3, %v1450_v60 }
 0x8c1   : > { %v1446_v7 = vpop.f32.mrf.mxu2 }
 0x8c3   : > { %v1474_v62 = vpop.f32.mrf.mxu0 }
 0x8c4   : > { %v1477_v63 = vmul.f32 0.25, %v1474_v62 }
 0x8c6   : > { %v1478_v0 = vsel %vm1266_vm4, %v1477_v63, -inf }
 0x8c7   : > { %1479 = vmax.xlane.f32.xlu1 %v1478_v0 }
 0x93a   : > { %v1480_v1 = vpop.xlane.xlu1 %1479 }
 0x93b   : > { %v1481_v3 = vsub.f32 %v1477_v63, %v1480_v1 }
 0x93d   : > { %v1482_v4 = vmul.f32 1.442695, %v1481_v3 }
 0x93f   : > { %2171 = vpow2.f32 %v1482_v4 }
 0x945   : > { %v2172_v5 = vpop.eup %2171 }
 0x946   : > { %v1484_v6 = vsel %vm1266_vm4, %v2172_v5, 0.0 }
 0x947   : > { %1485 = vadd.xlane.f32.xlu2 %v1484_v6 }
 0x9ba   : > { %v1486_v8 = vpop.xlane.xlu2 %1485 }
 0x9bb   : > { %2173 = vrcp.f32 %v1486_v8 }
 0x9be   : > { %1491 = sbr.rel (%p1949_p5) target bundleno = 2501 (0x9c5), region = 128 }
 0x9c1   : > { %v2174_v9 = vpop.eup %2173 }
 0x9c2   : > { %v1488_v10 = vmul.f32 %v2174_v9, %v2172_v5 }
 0x9c4   : > { %1493 = vst.msk [vmem:[#allocation3 + $0x18] sm:$0xff] %vm1266_vm4, %v1488_v10 }
 0x9c5 PF: > { %1494 = vrot.lane.b32.xlu0 %v2585_v26, %s2235_s23  ;;  %1525 = vrot.lane.b32.xlu1 %v1446_v7, %s2232_s12  ;;  %v1544_v12 = vld [vmem:[%s2394_s22 + $0x38] sm:$0xff]  ;;  %v1543_v13 = vld [vmem:[%s2394_s22 + $0x30] sm:$0xff]  ;;  %vm1533_vm5 = vcmask 261120   ;;  %vm1535_vm6 = vcmask 392192   ;;  %s2816_s29 = scalar_lea.vmem %s2768_s11, %s2372_s24  ;;  %s2818_s12 = scalar_lea.vmem %s2772_s15, %s2372_s24 }
 0x9c6   : > { %1560 = vmatpush.msrb.mxu3 %v1544_v12  ;;  %v1542_v14 = vld [vmem:[%s2394_s22 + $0x28] sm:$0xff]  ;;  %v1541_v15 = vld [vmem:[%s2394_s22 + $0x20] sm:$0xff]  ;;  %v1540_v16 = vld [vmem:[%s2394_s22 + $0x18] sm:$0xff]  ;;  %s2820_s27 = scalar_lea.vmem %s2776_s19, %s2372_s24 }
 0x9c7   : > { %v1539_v17 = vld [vmem:[%s2394_s22 + $0x10] sm:$0xff]  ;;  %v1538_v18 = vld [vmem:[%s2394_s22 + $0x8] sm:$0xff]  ;;  %v1537_v20 = vld [vmem:[%s2394_s22] sm:$0xff]  ;;  %s2822_s22 = sld [smem:[#allocation20_spill]] (!%p1949_p5) }
 0x9c8   : > { %1561 = vmatpush.msrb.mxu3 %v1543_v13  ;;  %v2175_v27 = vld [vmem:[%s2816_s29] ss:$0 sm:$0xff]  ;;  %v1619_v43 = vld [vmem:[%s2399_s1 + $0x38] sm:$0xff]  ;;  %v1618_v44 = vld [vmem:[%s2399_s1 + $0x30] sm:$0xff] }
 0x9c9   : > { %1635 = vmatpush.msrb.mxu2 %v1619_v43  ;;  %v1617_v45 = vld [vmem:[%s2399_s1 + $0x28] sm:$0xff]  ;;  %v1616_v46 = vld [vmem:[%s2399_s1 + $0x20] sm:$0xff]  ;;  %v1615_v47 = vld [vmem:[%s2399_s1 + $0x18] sm:$0xff] }
 0x9ca   : > { %1562 = vmatpush.msrb.mxu3 %v1542_v14  ;;  %v1614_v48 = vld [vmem:[%s2399_s1 + $0x10] sm:$0xff]  ;;  %v1613_v49 = vld [vmem:[%s2399_s1 + $0x8] sm:$0xff]  ;;  %v1612_v50 = vld [vmem:[%s2399_s1] sm:$0xff]  ;;  %s2821_s1 = sld [smem:[#allocation19_spill]] (!%p1949_p5) }
 0x9cb   : > { %1636 = vmatpush.msrb.mxu2 %v1618_v44  ;;  %v1663_v51 = vld [vmem:[%s2408_s9 + $0x78] sm:$0xff]  ;;  %v1662_v52 = vld [vmem:[%s2408_s9 + $0x70] sm:$0xff]  ;;  %v1661_v53 = vld [vmem:[%s2408_s9 + $0x68] sm:$0xff] }
 0x9cc   : > { %1563 = vmatpush.msrb.mxu3 %v1541_v15  ;;  %1668 = vmatpush.msrb.mxu0 %v1663_v51  ;;  %v1660_v56 = vld [vmem:[%s2408_s9 + $0x60] sm:$0xff]  ;;  %v1659_v58 = vld [vmem:[%s2408_s9 + $0x58] sm:$0xff]  ;;  %v1658_v59 = vld [vmem:[%s2408_s9 + $0x50] sm:$0xff] }
 0x9cd   : > { %1521 = vrot.lane.b32.xlu0 %v1375_v55, %s2234_s6  ;;  %1637 = vmatpush.msrb.mxu2 %v1617_v45  ;;  %v1657_v60 = vld [vmem:[%s2408_s9 + $0x48] sm:$0xff]  ;;  %v1656_v61 = vld [vmem:[%s2408_s9 + $0x40] sm:$0xff]  ;;  %v1655_v63 = vld [vmem:[%s2408_s9 + $0x38] sm:$0xff]  ;;  %s2819_s6 = scalar_lea.vmem %s2775_s18, %s2372_s24 }
 0x9ce   : > { %1564 = vmatpush.msrb.mxu3 %v1540_v16  ;;  %1669 = vmatpush.msrb.mxu0 %v1662_v52  ;;  %v1654_v1 = vld [vmem:[%s2408_s9 + $0x30] sm:$0xff]  ;;  %v1653_v4 = vld [vmem:[%s2408_s9 + $0x28] sm:$0xff]  ;;  %v1652_v6 = vld [vmem:[%s2408_s9 + $0x20] sm:$0xff] }
 0x9cf   : > { %1638 = vmatpush.msrb.mxu2 %v1616_v46  ;;  %v1651_v8 = vld [vmem:[%s2408_s9 + $0x18] sm:$0xff]  ;;  %v2177_v13 = vld [vmem:[%s863_s28] ss:$0 sm:$0xff]  ;;  %v1650_v16 = vld [vmem:[%s2408_s9 + $0x10] sm:$0xff] }
 0x9d0   : > { %1565 = vmatpush.msrb.mxu3 %v1539_v17  ;;  %1670 = vmatpush.msrb.mxu0 %v1661_v53  ;;  %v1649_v17 = vld [vmem:[%s2408_s9 + $0x8] sm:$0xff] }
 0x9d1   : > { %1639 = vmatpush.msrb.mxu2 %v1615_v47 }
 0x9d2   : > { %1566 = vmatpush.msrb.mxu3 %v1538_v18  ;;  %1671 = vmatpush.msrb.mxu0 %v1660_v56  ;;  %v1648_v18 = vld [vmem:[%s2408_s9] sm:$0xff] }
 0x9d3   : > { %1640 = vmatpush.msrb.mxu2 %v1614_v48 }
 0x9d4   : > { %1567 = vmatpush.msrb.mxu3 %v1537_v20  ;;  %1672 = vmatpush.msrb.mxu0 %v1659_v58 }
 0x9d5   : > { %1641 = vmatpush.msrb.mxu2 %v1613_v49 }
 0x9d6   : > { %1673 = vmatpush.msrb.mxu0 %v1658_v59 }
 0x9d7   : > { %1642 = vmatpush.msrb.mxu2 %v1612_v50 }
 0x9d8   : > { %1674 = vmatpush.msrb.mxu0 %v1657_v60 }
 0x9da   : > { %1675 = vmatpush.msrb.mxu0 %v1656_v61 }
 0x9dc   : > { %1676 = vmatpush.msrb.mxu0 %v1655_v63 }
 0x9de   : > { %1677 = vmatpush.msrb.mxu0 %v1654_v1 }
 0x9e0   : > { %1678 = vmatpush.msrb.mxu0 %v1653_v4 }
 0x9e2   : > { %1679 = vmatpush.msrb.mxu0 %v1652_v6 }
 0x9e4   : > { %1680 = vmatpush.msrb.mxu0 %v1651_v8 }
 0x9e6   : > { %1681 = vmatpush.msrb.mxu0 %v1650_v16 }
 0x9e8   : > { %1682 = vmatpush.msrb.mxu0 %v1649_v17 }
 0x9ea   : > { %1683 = vmatpush.msrb.mxu0 %v1648_v18 }
 0xa37   : > { %v1495_v11 = vpop.permute.xlu0 %1494  ;;  %v1526_v21 = vpop.permute.xlu1 %1525 }
 0xa38   : > { %1515 = vmatpush.msra.mxu1 %v1495_v11 }
 0xa39   : > { %1962 = vmatmul.msk.f32.vlgmr.msra.gmra.mxu1 %vm1266_vm4, %v1488_v10  ;;  %v2176_v10 = vld [vmem:[%s860_s10] ss:$0 sm:$0xff]  ;;  %s2823_s10 = sld [smem:[#allocation21_spill]] (!%p1949_p5) }
 0xa3f   : > { %v1522_v22 = vpop.permute.xlu0 %1521 }
 0xa40   : > { %v1532_v23 = vsel %vm1240_vm3, %v2598_v32, %v1522_v22  ;;  %v2236_v32 = vmov 64.0  }
 0xa41   : > { %v1534_v24 = vsel %vm1533_vm5, %v1532_v23, %v1526_v21  ;;  %2182 = vrcp.f32 %v2236_v32  ;;  %v2179_v23 = vld [vmem:[%s2818_s12] ss:$0 sm:$0xff] }
 0xa47   : > { %v2183_v33 = vpop.eup %2182 }
 0xa48   : > { %v1579_v34 = vmul.f32 64.0, %v2183_v33  ;;  %vm1583_vm7 = vweird.f32 %v2183_v33 }
 0xa4a   : > { %v1580_v35 = vsub.f32 1.0, %v1579_v34 }
 0xa4c   : > { %v1581_v36 = vmul.f32 %v2183_v33, %v1580_v35 }
 0xa4e   : > { %v1582_v37 = vadd.f32 %v2183_v33, %v1581_v36 }
 0xa50   : > { %v2652_v38 = vsel %vm1583_vm7, %v2183_v33, %v1582_v37 }
 0xab6   : > { %v1517_v19 = vpop.f32.mrf.mxu1 }
 0xab7   : > { %1529 = vrot.lane.b32.xlu1 %v1517_v19, %s2230_s2  ;;  %s2817_s2 = scalar_lea.vmem %s2770_s13, %s2372_s24 }
 0xab8   : > { %v2178_v19 = vld [vmem:[%s2817_s2] ss:$0 sm:$0xff] }
 0xb29   : > { %v1530_v25 = vpop.permute.xlu1 %1529 }
 0xb2a   : > { %v1536_v26 = vsel %vm1535_vm6, %v1534_v24, %v1530_v25 }
 0xb2b   : > { %1963 = vmatmul.msk.f32.vlgmr.msrb.gmra.mxu3 %vm1193_vm2, %v1536_v26 }
 0xbae   : > { %v1569_v28 = vpop.f32.mrf.mxu3 }
 0xbaf   : > { %v1570_v29 = vadd.f32 %v2175_v27, %v1569_v28 }
 0xbb1   : > { %v1572_v30 = vadd.f32 %v1570_v29, %v2562_v2 }
 0xbb3   : > { %v1575_v31 = vsel %vm1193_vm2, %v1572_v30, 0.0 }
 0xbb4   : > { %1576 = vadd.xlane.f32.xlu2 %v1575_v31 }
 0xc27   : > { %v1577_v2 = vpop.xlane.xlu2 %1576 }
 0xc28   : > { %v1585_v39 = vmul.f32 %v2652_v38, %v1577_v2 }
 0xc2a   : > { %v1586_v40 = vsub.f32 %v1572_v30, %v1585_v39 }
 0xc2c   : > { %v1587_v41 = vmul.f32 %v1586_v40, %v1586_v40 }
 0xc2e   : > { %v1588_v42 = vsel %vm1193_vm2, %v1587_v41, 0.0 }
 0xc2f   : > { %1589 = vadd.xlane.f32.xlu2 %v1588_v42  ;;  %v2180_v42 = vld [vmem:[%s2819_s6] ss:$0 sm:$0xff] }
 0xca2   : > { %v1590_v54 = vpop.xlane.xlu2 %1589 }
 0xca3   : > { %v1591_v55 = vmul.f32 %v1590_v54, %v2652_v38 }
 0xca5   : > { %v1592_v57 = vadd.f32 1e-05, %v1591_v55 }
 0xca7   : > { %2184 = vrsqrt.f32 %v1592_v57  ;;  %vm1599_vm9 = vweird.f32 %v1592_v57 }
 0xcad   : > { %v2185_v62 = vpop.eup %2184 }
 0xcae   : > { %v1594_v0 = vmul.f32 %v2185_v62, %v1592_v57  ;;  %vm1600_vm8 = vweird.f32 %v2185_v62 }
 0xcaf   : > { %vm1601_vm10 = vmor %vm1599_vm9, %vm1600_vm8 }
 0xcb0   : > { %v1595_v3 = vmul.f32 %v2185_v62, %v1594_v0 }
 0xcb2   : > { %v1596_v5 = vmul.f32 0.5, %v1595_v3 }
 0xcb4   : > { %v1597_v7 = vsub.f32 1.5, %v1596_v5 }
 0xcb6   : > { %v1598_v9 = vmul.f32 %v2185_v62, %v1597_v7 }
 0xcb8   : > { %v1602_v11 = vsel %vm1601_vm10, %v2185_v62, %v1598_v9 }
 0xcb9   : > { %v1603_v12 = vmul.f32 %v1602_v11, %v1586_v40 }
 0xcbb   : > { %v1607_v14 = vmul.f32 %v2176_v10, %v1603_v12 }
 0xcbd   : > { %v1611_v15 = vadd.f32 %v2177_v13, %v1607_v14 }
 0xcbf   : > { %1964 = vmatmul.msk.f32.vlgmr.msrb.gmra.mxu2 %vm1193_vm2, %v1611_v15 }
 0xd42   : > { %v1644_v20 = vpop.f32.mrf.mxu2 }
 0xd43   : > { %v1645_v21 = vadd.f32 %v2178_v19, %v1644_v20 }
 0xd45   : > { %v1647_v22 = vmax.f32 %v1645_v21, 0.0 }
 0xd47   : > { %1684 = vmatmul.f32.vlgmr.msrb.gmra.mxu0 %v1647_v22 }
 0xdc4   : > { %v1685_v24 = vpop.f32.mrf.mxu0 }
 0xdc5   : > { %v1686_v25 = vadd.f32 %v2179_v23, %v1685_v24 }
 0xdc7   : > { %v1688_v26 = vadd.f32 %v1686_v25, %v1611_v15 }
 0xdc9   : > { %v1691_v27 = vsel %vm1193_vm2, %v1688_v26, 0.0 }
 0xdca   : > { %1692 = vadd.xlane.f32.xlu0 %v1691_v27 }
 0xe3d   : > { %v1693_v28 = vpop.xlane.xlu0 %1692 }
 0xe3e   : > { %v1694_v29 = vmul.f32 %v1693_v28, %v2652_v38 }
 0xe40   : > { %v1695_v30 = vsub.f32 %v1688_v26, %v1694_v29 }
 0xe42   : > { %v1696_v31 = vmul.f32 %v1695_v30, %v1695_v30 }
 0xe44   : > { %v1697_v32 = vsel %vm1193_vm2, %v1696_v31, 0.0 }
 0xe45   : > { %1698 = vadd.xlane.f32.xlu1 %v1697_v32 }
 0xeb8   : > { %v1699_v33 = vpop.xlane.xlu1 %1698 }
 0xeb9   : > { %v1700_v34 = vmul.f32 %v1699_v33, %v2652_v38  ;;  %v2181_v38 = vld [vmem:[%s2820_s27] ss:$0 sm:$0xff] }
 0xebb   : > { %v1701_v35 = vadd.f32 1e-05, %v1700_v34 }
 0xebd   : > { %2186 = vrsqrt.f32 %v1701_v35  ;;  %vm1708_vm12 = vweird.f32 %v1701_v35 }
 0xec3   : > { %v2187_v36 = vpop.eup %2186 }
 0xec4   : > { %v1703_v37 = vmul.f32 %v2187_v36, %v1701_v35  ;;  %vm1709_vm11 = vweird.f32 %v2187_v36 }
 0xec5   : > { %vm1710_vm13 = vmor %vm1708_vm12, %vm1709_vm11 }
 0xec6   : > { %v1704_v2 = vmul.f32 %v2187_v36, %v1703_v37 }
 0xec8   : > { %v1705_v39 = vmul.f32 0.5, %v1704_v2 }
 0xeca   : > { %v1706_v40 = vsub.f32 1.5, %v1705_v39 }
 0xecc   : > { %v1707_v41 = vmul.f32 %v2187_v36, %v1706_v40 }
 0xece   : > { %v1711_v43 = vsel %vm1710_vm13, %v2187_v36, %v1707_v41 }
 0xecf   : > { %v1712_v44 = vmul.f32 %v1711_v43, %v1695_v30 }
 0xed1   : > { %v1716_v45 = vmul.f32 %v2180_v42, %v1712_v44  ;;  %1724 = sbr.rel (%p1949_p5) target bundleno = 3943 (0xf67), region = 132 }
 0xed3   : > { %v1720_v46 = vadd.f32 %v2181_v38, %v1716_v45 }
 0xed5   : > { %1721 = vst.msk [vmem:[#allocation2] sm:$0xff] %vm1193_vm2, %v1720_v46 }
 0xed6   : > { %v1732_v47 = vld [vmem:[%s2821_s1 + $0x38] sm:$0xff]  ;;  %v1731_v48 = vld [vmem:[%s2821_s1 + $0x30] sm:$0xff]  ;;  %v1730_v49 = vld [vmem:[%s2821_s1 + $0x28] sm:$0xff] }
 0xed7   : > { %1748 = vmatpush.msra.mxu0 %v1732_v47  ;;  %v1729_v50 = vld [vmem:[%s2821_s1 + $0x20] sm:$0xff]  ;;  %v1728_v51 = vld [vmem:[%s2821_s1 + $0x18] sm:$0xff]  ;;  %v1727_v52 = vld [vmem:[%s2821_s1 + $0x10] sm:$0xff] }
 0xed8   : > { %v1726_v53 = vld [vmem:[%s2821_s1 + $0x8] sm:$0xff]  ;;  %v1725_v54 = vld [vmem:[%s2821_s1] sm:$0xff] }
 0xed9   : > { %1749 = vmatpush.msra.mxu0 %v1731_v48  ;;  %v2188_v55 = vld [vmem:[%s2822_s22] ss:$0 sm:$0xff] }
 0xedb   : > { %1750 = vmatpush.msra.mxu0 %v1730_v49 }
 0xedd   : > { %1751 = vmatpush.msra.mxu0 %v1729_v50 }
 0xedf   : > { %1752 = vmatpush.msra.mxu0 %v1728_v51 }
 0xee1   : > { %1753 = vmatpush.msra.mxu0 %v1727_v52 }
 0xee3   : > { %1754 = vmatpush.msra.mxu0 %v1726_v53 }
 0xee5   : > { %1755 = vmatpush.msra.mxu0 %v1725_v54 }
 0xee6   : > { %1966 = vmatmul.msk.f32.vlgmr.msra.gmra.mxu0 %vm1193_vm2, %v1720_v46 }
 0xf63   : > { %v1757_v56 = vpop.f32.mrf.mxu0 }
 0xf64   : > { %v1758_v57 = vadd.f32 %v2188_v55, %v1757_v56 }
 0xf66   : > { %1760 = vst [vmem:[%s2823_s10] sm:$0xff] %v1758_v57 }
 0xf67 PF: > { %p2137_p6 = scmp.eq.s32.totalorder %s2366_s30, 2  ;;  %s2237_s24 = smov [#allocation3]  }
 0xf68   : > { %s1769_s4 = sshll.u32 %s2237_s24, 4  ;;  %s2824_s7 = sld [smem:[#allocation22_spill]]  ;;  %s1770_s4 = int_to_ptr.vmem [resolvable:$true] %s1769_s4 }
 0xf69   : > { %s2238_s9 = smov 128   ;;  %s2239_s20 = smov 8  }
 0xf6e   : > { %s1771_s12 = sshll.u32 %s2824_s7, 4  ;;  %s1772_s12 = int_to_ptr.hbm [resolvable:$true] %s1771_s12 }
 0xf6f   : > { %2134 = dma.vmem_to_hbm [thread:$0]  (%p2137_p6), %s1770_s4, 512, %s1772_s12, [#allocation4], %s2238_s9, %s2238_s9, %s2239_s20  }
 0xf70   : > { %2222 = dma.done.wait (%p2137_p6), [#allocation4], 512  }
 0xf71   : > { %2224 = vsyncadd (%p2137_p6), [#allocation4], 4294966784 }
 0xf72 PF: > { %s2825_s6 = sld [smem:[#allocation6_spill]] }
 0xf78   : > { %s35_s4 = sadd.s32 1, %s2825_s6  }
 0xf79   : > { %p32_p7 = scmp.ge.s32.totalorder %s35_s4, 5  }
 0xf7b   :  { %34 = sbr.rel (!%p32_p7) target bundleno = 18 (0x12), region = 203 }
 0xf80   :  { %1791 = vsyncpa [#allocation4], 1 }
 0xf81   :  { %1793 = vsyncpa [#allocation4 + $0x1], 1 }

</bundles_post_ra>
